<compile_context>
chip_gen: v5e
topology: v5e:2x2
jax: 0.10.0
libtpu: 0.0.40
codegen_flags: <defaults>
</compile_context>

<pallas_src>
import math

import jax
import jax.numpy as jnp
from jax.experimental import pallas as pl
from jax.experimental.pallas import tpu as pltpu

LANE = 128      # TPU lane width: last dim a multiple of 128 -> unmasked vst
SUBLANE = 8
_TARGET_BLOCK_BYTES = 4 * 1024 * 1024   # ~4 MiB per block, constant across dtypes
_KERNEL_MIN_BYTES = 1 * 1024 * 1024     # below this, launch/grid overhead dominates


def _copy_kernel(x_ref, o_ref):
    # One lane-dense (block_rows, 128) slab per grid step; pure data movement.
    o_ref[...] = x_ref[...]


def _pallas_flat_copy(flat):
    """Identity copy of a lane-aligned 1-D array through a Pallas kernel."""
    total = flat.shape[0]
    itemsize = jnp.dtype(flat.dtype).itemsize
    assert total % LANE == 0, "caller guarantees lane alignment"
    rows = total // LANE
    x2d = flat.reshape(rows, LANE)  # metadata-only reshape

    # Constant-byte blocks (~4 MiB) regardless of dtype; rows a multiple of 8.
    block_rows = max(
        SUBLANE, (_TARGET_BLOCK_BYTES // (LANE * itemsize)) // SUBLANE * SUBLANE
    )
    if rows <= block_rows:
        block_rows = rows  # block == full extent: no (8, .) divisibility needed
    block_bytes = block_rows * LANE * itemsize

    # in + out, double-buffered, plus headroom.  ~24 MiB for 4 MiB blocks: above
    # v5e's 16 MiB default scoped limit (so set explicitly), well under v7x's
    # 64 MiB physical VMEM.
    vmem_limit = int(min(4 * block_bytes + 8 * 1024 * 1024, 48 * 1024 * 1024))

    grid = (pl.cdiv(rows, block_rows),)
    out2d = pl.pallas_call(
        _copy_kernel,
        out_shape=jax.ShapeDtypeStruct((rows, LANE), flat.dtype),
        grid_spec=pltpu.PrefetchScalarGridSpec(
            num_scalar_prefetch=0,
            grid=grid,
            in_specs=[pl.BlockSpec((block_rows, LANE), lambda i: (i, 0))],
            out_specs=pl.BlockSpec((block_rows, LANE), lambda i: (i, 0)),
        ),
        compiler_params=pltpu.CompilerParams(
            # "parallel" vs "arbitrary" has near-zero codegen impact; this kernel is
            # HBM-bound so we do not request CORE_PARALLEL (2 TCs share HBM BW).
            dimension_semantics=("parallel",),
            vmem_limit_bytes=vmem_limit,
        ),
        cost_estimate=pl.CostEstimate(
            flops=0,
            transcendentals=0,
            bytes_accessed=2 * rows * LANE * itemsize,  # read + write every byte
        ),
    )(x2d)
    return out2d.reshape(total)


def _flattened_shape(shape, start_dim, end_dim):
    """Output shape of torch.flatten(x, start_dim, end_dim) for a given shape."""
    nd = len(shape)
    if nd == 0:
        return (1,)  # torch.flatten on a 0-d tensor yields shape (1,)
    start = start_dim if start_dim >= 0 else nd + start_dim
    end = end_dim if end_dim >= 0 else nd + end_dim
    middle = math.prod(shape[start:end + 1])  # 1 for an empty/degenerate range
    return tuple(shape[:start]) + (middle,) + tuple(shape[end + 1:])


def flatten_pallas(x, start_dim=1, end_dim=-1):
    """Equivalent of torch.flatten(x, start_dim, end_dim) / the Flatten module."""
    new_shape = _flattened_shape(x.shape, start_dim, end_dim)
    total = math.prod(x.shape) if x.ndim else 1
    nbytes = total * jnp.dtype(x.dtype).itemsize

    # Row-major flatten is metadata-only; only run the copy kernel when the input is
    # lane-aligned and big enough for the copy to sit near HBM roofline.  Empty,
    # ragged and small inputs take the (strictly cheaper) reshape path — no padding,
    # no slicing, no extra HBM traffic.
    if total == 0 or total % LANE != 0 or nbytes < _KERNEL_MIN_BYTES:
        return jnp.reshape(x, new_shape)

    flat = jnp.reshape(x, (total,))            # metadata-only
    return jnp.reshape(_pallas_flat_copy(flat), new_shape)


class Flatten:
    """JAX/Pallas port of the PyTorch Flatten module."""

    def __init__(self, start_dim: int = 1, end_dim: int = -1) -> None:
        self.start_dim = start_dim
        self.end_dim = end_dim

    def __call__(self, x):
        return flatten_pallas(x, self.start_dim, self.end_dim)

    def extra_repr(self) -> str:
        return ", ".join(f"{k}={getattr(self, k)}" for k in ["start_dim", "end_dim"])


if __name__ == "__main__":
    key = jax.random.PRNGKey(0)
    k1, k2, k3 = jax.random.split(key, 3)

    # Case 1: default Flatten(start_dim=1, end_dim=-1) on a small NCHW batch
    # (metadata-only fast path).
    x = jax.random.normal(k1, (2, 4, 16, 16), dtype=jnp.float32)
    y = jax.block_until_ready(Flatten()(x))
    assert y.shape == (2, 4 * 16 * 16), y.shape
    assert jnp.array_equal(y, jnp.reshape(x, (2, 1024)))

    # Case 2: inner-dim flatten, Flatten(start_dim=1, end_dim=2).
    y2 = jax.block_until_ready(Flatten(start_dim=1, end_dim=2)(x))
    assert y2.shape == (2, 64, 16), y2.shape
    assert jnp.array_equal(y2, jnp.reshape(x, (2, 64, 16)))

    # Case 3: ragged total (not a multiple of 128) -> pure reshape, no pad/slice.
    x3 = jax.random.normal(k2, (2, 3, 5), dtype=jnp.float32)
    y3 = jax.block_until_ready(Flatten(0, -1)(x3))
    assert y3.shape == (30,), y3.shape
    assert jnp.array_equal(y3, jnp.reshape(x3, (30,)))

    # Case 4: large lane-aligned f32 input (8 MiB) -> Pallas copy kernel, 2 grid
    # blocks of 4 MiB each (pipelined).
    x4 = jax.random.normal(k3, (2, 16, 256, 256), dtype=jnp.float32)
    y4 = jax.block_until_ready(Flatten()(x4))
    assert y4.shape == (2, 16 * 256 * 256), y4.shape
    assert jnp.array_equal(y4, jnp.reshape(x4, (2, 16 * 256 * 256)))

    # Case 5: bf16 input -> dtype-scaled block rows keep the block at ~4 MiB.
    x5 = x4.astype(jnp.bfloat16)
    y5 = jax.block_until_ready(Flatten()(x5))
    assert y5.shape == (2, 16 * 256 * 256), y5.shape
    assert jnp.array_equal(y5, jnp.reshape(x5, (2, 16 * 256 * 256)))

    print("KERNEL_OK")
</pallas_src>

<mosaic_0001>
module attributes {stable_mosaic.version = 11 : i64} {
  func.func @_copy_kernel(%arg0: i32, %arg1: memref<8192x128xf32, #tpu.memory_space<vmem>>, %arg2: memref<8192x128xf32, #tpu.memory_space<vmem>>) attributes {dimension_semantics = [#tpu.dimension_semantics<parallel>], iteration_bounds = array<i64: 2>, scalar_prefetch = 0 : i64, scratch_operands = 0 : i64, tpu.core_type = #tpu.core_type<tc>, window_params = [{transform_indices = @transform_0, window_bounds = array<i64: 8192, 128>}, {transform_indices = @transform_1, window_bounds = array<i64: 8192, 128>}]} {
    %c0 = arith.constant 0 : index
    %c0_0 = arith.constant 0 : index
    %0 = vector.load %arg1[%c0, %c0_0] : memref<8192x128xf32, #tpu.memory_space<vmem>>, vector<8192x128xf32>
    %c0_1 = arith.constant 0 : index
    %c0_2 = arith.constant 0 : index
    %1 = vector.load %arg2[%c0_1, %c0_2] : memref<8192x128xf32, #tpu.memory_space<vmem>>, vector<8192x128xf32>
    tpu.vector_store %arg2[%c0_1, %c0_2], %0 {strides = array<i32>} : memref<8192x128xf32, #tpu.memory_space<vmem>>, vector<8192x128xf32>,
    return
  }
  func.func @transform_0(%arg0: i32) -> (i32, i32) {
    %c0_i32 = arith.constant 0 : i32
    %c0_i32_0 = arith.constant 0 : i32
    return %arg0, %c0_i32 : i32, i32
  }
  func.func @transform_1(%arg0: i32) -> (i32, i32) {
    %c0_i32 = arith.constant 0 : i32
    %c0_i32_0 = arith.constant 0 : i32
    return %arg0, %c0_i32 : i32, i32
  }
}

</mosaic_0001>

<bundles_post_ra>
// kernel: tpu_custom_call.1
= control target key start
LH: loop header
LB: loop body
LE: loop exit
PB: predicated region body
PF: predicated region fallthrough
CT: control target
= control target key end

     0   :  { %6 = vsyncpa [#allocation3], 0  ;;  %s4634_s0 = inlined_call_operand.hbm [shape: f32[16384,128], index: 0, kind: input, shape index: {}]   ;;  %s4635_s1 = inlined_call_operand.hbm [shape: f32[16384,128], index: 1, kind: output, shape index: {}]  }
   0x1   :  { %8 = vsyncpa [#allocation3 + $0x1], 0 }
   0x2   :  { %9 = vsyncpa [#allocation4], 0 }
   0x3   :  { %11 = vsyncpa [#allocation4 + $0x1], 0  ;;  %s2454_s6 = smov 0   ;;  %s2456_s7 = smov 0  }
   0x4   :  { %s2458_s8 = smov 0   ;;  %s2460_s9 = smov 0  }
   0x5 LB: > { %s2475_s10 = sadd.s32 4294967295, %s2438_s9   ;;  %s2276_s11 = sadd.s32 4294967294, %s2438_s9   ;;  %s2438_s9 = sphi %s2460_s9, %s4645_s9   ;;  %s2434_s8 = sphi %s2458_s8, %s4644_s8   ;;  %s2430_s7 = sphi %s2456_s7, %s4643_s7   ;;  %s2426_s6 = sphi %s2454_s6, %s4642_s6  }
   0x6   : > { %s2479_s12 = sadd.s32 1, %s2438_s9   ;;  %s24_s13 = sadd.s32 1, %s2434_s8 }
   0x7   : > { %s21_s14 = ssub.s32 %s2438_s9, %s2479_s12  ;;  %p31_p0 = scmp.ne.s32.totalorder %s2434_s8, %s2430_s7 }
   0x8   : > { %p22_p1 = scmp.eq.s32.totalorder %s21_s14, 0  ;;  %p32_p2 = scmp.eq.s32.totalorder %s2438_s9, 0 }
   0x9   : > { %p37_p3 = scmp.ne.s32.totalorder %s2430_s7, %s2426_s6  ;;  %p38_p4 = scmp.eq.s32.totalorder %s2475_s10, 0 }
   0xa   : > { %s2491_s15 = scalar_select %p22_p1, %s2434_s8, %s24_s13  }
   0xb   : > { %p2493_p5 = por %p32_p2, %p31_p0  ;;  %p2497_p6 = por %p38_p4, %p37_p3 }
   0xc   : > { %p61_p7 = scmp.eq.s32.totalorder %s2475_s10, 1  ;;  %p67_p8 = scmp.eq.s32.totalorder %s2276_s11, 1 }
   0xd   : > { %p2304_p10 = scmp.lt.s32.totalorder %s2438_s9, 2  ;;  %s87_s20 = sand.u32 1, %s2434_s8  }
   0xe   : > { %p2504_p11 = por %p61_p7, %p31_p0  ;;  %p2508_p12 = por %p67_p8, %p37_p3 }
   0xf   : > { %s2290_s21 = sshll.u32 %s2438_s9, 13  ;;  %s2279_s22 = sshll.u32 %s87_s20, 13 }
  0x10   : > { %s96_s25 = scalar_lea.hbm %s4634_s0, %s2290_s21  ;;  %s91_s27 = scalar_lea.vmem [#allocation2], %s2279_s22 }
  0x11   : > { %s97_s26 = sshll.u32 %s96_s25, 4  ;;  %s99_s28 = sshll.u32 %s91_s27, 4  ;;  %s98_s26 = int_to_ptr.hbm [resolvable:$true] %s97_s26  ;;  %s100_s28 = int_to_ptr.vmem [resolvable:$true] %s99_s28 }
  0x12   : > { %p2519_p13 = pnand %p2304_p10, %p2493_p5  ;;  %p2282_p0 = scmp.ge.s32.totalorder %s2438_s9, 1 }
  0x13   : > { %p107_p1 = scmp.lt.s32.totalorder %s2438_s9, 3  ;;  %s88_s30 = scalar_lea.sflag [#allocation3], %s87_s20 }
  0x14   : > { %s2342_s2 = sshra.s32 %s98_s26, 4  ;;  %p2346_p3 = pneg %p2519_p13  ;;  %s2343_s2 = int_to_ptr.hbm [resolvable:$true] %s2342_s2 }
  0x15   : > { %s2344_s3 = scalar_lea.hbm %s2343_s2, 8192  ;;  %s2349_s11 = scalar_lea.hbm %s4634_s0, 16384 }
  0x16   : > { %p2345_p2 = scmp.ne.s32.totalorder %s2343_s2, %s2344_s3  ;;  %p2350_p5 = scmp.lt.s32.totalorder %s2343_s2, %s4634_s0 }
  0x17   : > { %p2351_p8 = scmp.lt.s32.totalorder %s2349_s11, %s2344_s3 }
  0x18   : > { %p2347_p4 = pnand %p2346_p3, %p2345_p2 }
  0x19   : > { %p2352_p10 = por %p2351_p8, %p2350_p5 }
  0x1a   : > { %p2348_p7 = pneg %p2347_p4 }
  0x1c   : > { %p2353_p9 = pnand %p2352_p10, %p2348_p7 }
  0x1e   : > { %2356 = shalt.err (!%p2353_p9)
}
  0x1f   : > { %s2440_s16 = smov 128   ;;  %s2441_s20 = smov 8  }
  0x20   : > { %2299 = dma.hbm_to_vmem [thread:$0]  (!%p2519_p13), %s98_s26, 131072, %s100_s28, %s88_s30, %s2440_s16, %s2440_s16, %s2441_s20  }
  0x21   : > { %p108_p2 = pnand %p2282_p0, %p107_p1 }
  0x22   : > { %s2540_s21 = sand.u32 (!%p108_p2), 1, %s2430_s7  }
  0x23   : > { %111 = sbr.rel (%p108_p2) target bundleno = 1069 (0x42d), region = 24  ;;  %s2283_s22 = sshll.u32 (!%p108_p2), %s2540_s21, 13 }
  0x24   : > { %s114_s23 = scalar_lea.sflag (!%p108_p2), [#allocation3], %s2540_s21  ;;  %s2544_s24 = scalar_lea.vmem (!%p108_p2), [#allocation2], %s2283_s22 }
  0x28   : > { %2417 = dma.done.wait (%p2497_p6), %s114_s23, 131072  }
  0x29   : > { %2419 = vsyncadd (%p2497_p6), %s114_s23, 4294836224  ;;  %v139_v0 = vld [vmem:[%s2544_s24] sm:$0xff]  ;;  %v140_v1 = vld [vmem:[%s2544_s24 + $0x8] sm:$0xff]  ;;  %s2553_s25 = scalar_lea.vmem [#allocation5], %s2283_s22  ;;  %s2291_s17 = sshll.u32 %s2475_s10, 13 }
  0x2a   : > { %v141_v2 = vld [vmem:[%s2544_s24 + $0x10] sm:$0xff]  ;;  %1163 = vst [vmem:[%s2553_s25] sm:$0xff] %v139_v0  ;;  %v142_v3 = vld [vmem:[%s2544_s24 + $0x18] sm:$0xff]  ;;  %v143_v4 = vld [vmem:[%s2544_s24 + $0x20] sm:$0xff]  ;;  %s2199_s28 = scalar_lea.hbm %s4635_s1, %s2291_s17  ;;  %s2200_s10 = sshll.u32 %s2553_s25, 4  ;;  %s2201_s10 = int_to_ptr.vmem [resolvable:$true] %s2200_s10 }
  0x2b   : > { %1164 = vst [vmem:[%s2553_s25 + $0x8] sm:$0xff] %v140_v1  ;;  %v144_v5 = vld [vmem:[%s2544_s24 + $0x28] sm:$0xff]  ;;  %v145_v6 = vld [vmem:[%s2544_s24 + $0x30] sm:$0xff]  ;;  %v146_v7 = vld [vmem:[%s2544_s24 + $0x38] sm:$0xff]  ;;  %s2202_s29 = sshll.u32 %s2199_s28, 4  ;;  %s2188_s30 = scalar_lea.sflag [#allocation4], %s2540_s21  ;;  %s2203_s29 = int_to_ptr.hbm [resolvable:$true] %s2202_s29 }
  0x2c   : > { %1165 = vst [vmem:[%s2553_s25 + $0x10] sm:$0xff] %v141_v2  ;;  %v147_v8 = vld [vmem:[%s2544_s24 + $0x40] sm:$0xff]  ;;  %v148_v9 = vld [vmem:[%s2544_s24 + $0x48] sm:$0xff]  ;;  %v149_v10 = vld [vmem:[%s2544_s24 + $0x50] sm:$0xff]  ;;  %s2386_s2 = sshra.s32 %s2203_s29, 4  ;;  %s2392_s11 = scalar_lea.hbm %s4635_s1, 16384  ;;  %s2387_s2 = int_to_ptr.hbm [resolvable:$true] %s2386_s2 }
  0x2d   : > { %1166 = vst [vmem:[%s2553_s25 + $0x18] sm:$0xff] %v142_v3  ;;  %v150_v11 = vld [vmem:[%s2544_s24 + $0x58] sm:$0xff]  ;;  %v151_v12 = vld [vmem:[%s2544_s24 + $0x60] sm:$0xff]  ;;  %v152_v13 = vld [vmem:[%s2544_s24 + $0x68] sm:$0xff]  ;;  %s2388_s3 = scalar_lea.hbm %s2387_s2, 8192  ;;  %p2393_p0 = scmp.lt.s32.totalorder %s2387_s2, %s4635_s1 }
  0x2e   : > { %1167 = vst [vmem:[%s2553_s25 + $0x20] sm:$0xff] %v143_v4  ;;  %v153_v14 = vld [vmem:[%s2544_s24 + $0x70] sm:$0xff]  ;;  %v154_v15 = vld [vmem:[%s2544_s24 + $0x78] sm:$0xff]  ;;  %v155_v16 = vld [vmem:[%s2544_s24 + $0x80] sm:$0xff]  ;;  %p2389_p6 = scmp.ne.s32.totalorder %s2387_s2, %s2388_s3  ;;  %p2394_p1 = scmp.lt.s32.totalorder %s2392_s11, %s2388_s3 }
  0x2f   : > { %1168 = vst [vmem:[%s2553_s25 + $0x28] sm:$0xff] %v144_v5  ;;  %v156_v17 = vld [vmem:[%s2544_s24 + $0x88] sm:$0xff]  ;;  %v157_v18 = vld [vmem:[%s2544_s24 + $0x90] sm:$0xff]  ;;  %v158_v19 = vld [vmem:[%s2544_s24 + $0x98] sm:$0xff] }
  0x30   : > { %1169 = vst [vmem:[%s2553_s25 + $0x30] sm:$0xff] %v145_v6  ;;  %v159_v20 = vld [vmem:[%s2544_s24 + $0xa0] sm:$0xff]  ;;  %v160_v21 = vld [vmem:[%s2544_s24 + $0xa8] sm:$0xff]  ;;  %v161_v22 = vld [vmem:[%s2544_s24 + $0xb0] sm:$0xff]  ;;  %p2390_p9 = pnand %p2389_p6, %p2504_p11  ;;  %p2395_p3 = por %p2394_p1, %p2393_p0 }
  0x31   : > { %1170 = vst [vmem:[%s2553_s25 + $0x38] sm:$0xff] %v146_v7  ;;  %v162_v23 = vld [vmem:[%s2544_s24 + $0xb8] sm:$0xff]  ;;  %v163_v24 = vld [vmem:[%s2544_s24 + $0xc0] sm:$0xff]  ;;  %v164_v25 = vld [vmem:[%s2544_s24 + $0xc8] sm:$0xff] }
  0x32   : > { %1171 = vst [vmem:[%s2553_s25 + $0x40] sm:$0xff] %v147_v8  ;;  %v165_v26 = vld [vmem:[%s2544_s24 + $0xd0] sm:$0xff]  ;;  %v166_v27 = vld [vmem:[%s2544_s24 + $0xd8] sm:$0xff]  ;;  %v167_v28 = vld [vmem:[%s2544_s24 + $0xe0] sm:$0xff]  ;;  %p2391_p13 = pneg %p2390_p9 }
  0x33   : > { %1172 = vst [vmem:[%s2553_s25 + $0x48] sm:$0xff] %v148_v9  ;;  %v168_v29 = vld [vmem:[%s2544_s24 + $0xe8] sm:$0xff]  ;;  %v169_v30 = vld [vmem:[%s2544_s24 + $0xf0] sm:$0xff]  ;;  %v170_v31 = vld [vmem:[%s2544_s24 + $0xf8] sm:$0xff] }
  0x34   : > { %1173 = vst [vmem:[%s2553_s25 + $0x50] sm:$0xff] %v149_v10  ;;  %v171_v32 = vld [vmem:[%s2544_s24 + $0x100] sm:$0xff]  ;;  %v172_v33 = vld [vmem:[%s2544_s24 + $0x108] sm:$0xff]  ;;  %v173_v34 = vld [vmem:[%s2544_s24 + $0x110] sm:$0xff]  ;;  %p2396_p4 = pnand %p2395_p3, %p2391_p13 }
  0x35   : > { %1174 = vst [vmem:[%s2553_s25 + $0x58] sm:$0xff] %v150_v11  ;;  %v174_v35 = vld [vmem:[%s2544_s24 + $0x118] sm:$0xff]  ;;  %v175_v36 = vld [vmem:[%s2544_s24 + $0x120] sm:$0xff]  ;;  %v176_v37 = vld [vmem:[%s2544_s24 + $0x128] sm:$0xff] }
  0x36   : > { %1175 = vst [vmem:[%s2553_s25 + $0x60] sm:$0xff] %v151_v12  ;;  %v177_v38 = vld [vmem:[%s2544_s24 + $0x130] sm:$0xff]  ;;  %v178_v39 = vld [vmem:[%s2544_s24 + $0x138] sm:$0xff]  ;;  %v179_v40 = vld [vmem:[%s2544_s24 + $0x140] sm:$0xff] }
  0x37   : > { %1176 = vst [vmem:[%s2553_s25 + $0x68] sm:$0xff] %v152_v13  ;;  %v180_v41 = vld [vmem:[%s2544_s24 + $0x148] sm:$0xff]  ;;  %v181_v42 = vld [vmem:[%s2544_s24 + $0x150] sm:$0xff]  ;;  %v182_v43 = vld [vmem:[%s2544_s24 + $0x158] sm:$0xff] }
  0x38   : > { %1177 = vst [vmem:[%s2553_s25 + $0x70] sm:$0xff] %v153_v14  ;;  %v183_v44 = vld [vmem:[%s2544_s24 + $0x160] sm:$0xff]  ;;  %v184_v45 = vld [vmem:[%s2544_s24 + $0x168] sm:$0xff]  ;;  %v185_v46 = vld [vmem:[%s2544_s24 + $0x170] sm:$0xff] }
  0x39   : > { %1178 = vst [vmem:[%s2553_s25 + $0x78] sm:$0xff] %v154_v15  ;;  %v186_v47 = vld [vmem:[%s2544_s24 + $0x178] sm:$0xff]  ;;  %v187_v48 = vld [vmem:[%s2544_s24 + $0x180] sm:$0xff]  ;;  %v188_v49 = vld [vmem:[%s2544_s24 + $0x188] sm:$0xff] }
  0x3a   : > { %1179 = vst [vmem:[%s2553_s25 + $0x80] sm:$0xff] %v155_v16  ;;  %v189_v50 = vld [vmem:[%s2544_s24 + $0x190] sm:$0xff]  ;;  %v190_v51 = vld [vmem:[%s2544_s24 + $0x198] sm:$0xff]  ;;  %v191_v52 = vld [vmem:[%s2544_s24 + $0x1a0] sm:$0xff] }
  0x3b   : > { %1180 = vst [vmem:[%s2553_s25 + $0x88] sm:$0xff] %v156_v17  ;;  %v192_v53 = vld [vmem:[%s2544_s24 + $0x1a8] sm:$0xff]  ;;  %v193_v54 = vld [vmem:[%s2544_s24 + $0x1b0] sm:$0xff]  ;;  %v194_v55 = vld [vmem:[%s2544_s24 + $0x1b8] sm:$0xff] }
  0x3c   : > { %1181 = vst [vmem:[%s2553_s25 + $0x90] sm:$0xff] %v157_v18  ;;  %v195_v56 = vld [vmem:[%s2544_s24 + $0x1c0] sm:$0xff]  ;;  %v196_v57 = vld [vmem:[%s2544_s24 + $0x1c8] sm:$0xff]  ;;  %v197_v58 = vld [vmem:[%s2544_s24 + $0x1d0] sm:$0xff] }
  0x3d   : > { %1182 = vst [vmem:[%s2553_s25 + $0x98] sm:$0xff] %v158_v19  ;;  %v198_v59 = vld [vmem:[%s2544_s24 + $0x1d8] sm:$0xff]  ;;  %v199_v60 = vld [vmem:[%s2544_s24 + $0x1e0] sm:$0xff]  ;;  %v200_v61 = vld [vmem:[%s2544_s24 + $0x1e8] sm:$0xff] }
  0x3e   : > { %1183 = vst [vmem:[%s2553_s25 + $0xa0] sm:$0xff] %v159_v20  ;;  %v201_v62 = vld [vmem:[%s2544_s24 + $0x1f0] sm:$0xff]  ;;  %v202_v63 = vld [vmem:[%s2544_s24 + $0x1f8] sm:$0xff]  ;;  %v203_v0 = vld [vmem:[%s2544_s24 + $0x200] sm:$0xff] }
  0x3f   : > { %1184 = vst [vmem:[%s2553_s25 + $0xa8] sm:$0xff] %v160_v21  ;;  %v204_v1 = vld [vmem:[%s2544_s24 + $0x208] sm:$0xff]  ;;  %v205_v2 = vld [vmem:[%s2544_s24 + $0x210] sm:$0xff]  ;;  %v206_v3 = vld [vmem:[%s2544_s24 + $0x218] sm:$0xff] }
  0x40   : > { %1185 = vst [vmem:[%s2553_s25 + $0xb0] sm:$0xff] %v161_v22  ;;  %v207_v4 = vld [vmem:[%s2544_s24 + $0x220] sm:$0xff]  ;;  %v208_v5 = vld [vmem:[%s2544_s24 + $0x228] sm:$0xff]  ;;  %v209_v6 = vld [vmem:[%s2544_s24 + $0x230] sm:$0xff] }
  0x41   : > { %1186 = vst [vmem:[%s2553_s25 + $0xb8] sm:$0xff] %v162_v23  ;;  %v210_v7 = vld [vmem:[%s2544_s24 + $0x238] sm:$0xff]  ;;  %v211_v8 = vld [vmem:[%s2544_s24 + $0x240] sm:$0xff]  ;;  %v212_v9 = vld [vmem:[%s2544_s24 + $0x248] sm:$0xff] }
  0x42   : > { %1187 = vst [vmem:[%s2553_s25 + $0xc0] sm:$0xff] %v163_v24  ;;  %v213_v10 = vld [vmem:[%s2544_s24 + $0x250] sm:$0xff]  ;;  %v214_v11 = vld [vmem:[%s2544_s24 + $0x258] sm:$0xff]  ;;  %v215_v12 = vld [vmem:[%s2544_s24 + $0x260] sm:$0xff] }
  0x43   : > { %1188 = vst [vmem:[%s2553_s25 + $0xc8] sm:$0xff] %v164_v25  ;;  %v216_v13 = vld [vmem:[%s2544_s24 + $0x268] sm:$0xff]  ;;  %v217_v14 = vld [vmem:[%s2544_s24 + $0x270] sm:$0xff]  ;;  %v218_v15 = vld [vmem:[%s2544_s24 + $0x278] sm:$0xff] }
  0x44   : > { %1189 = vst [vmem:[%s2553_s25 + $0xd0] sm:$0xff] %v165_v26  ;;  %v219_v16 = vld [vmem:[%s2544_s24 + $0x280] sm:$0xff]  ;;  %v220_v17 = vld [vmem:[%s2544_s24 + $0x288] sm:$0xff]  ;;  %v221_v18 = vld [vmem:[%s2544_s24 + $0x290] sm:$0xff] }
  0x45   : > { %1190 = vst [vmem:[%s2553_s25 + $0xd8] sm:$0xff] %v166_v27  ;;  %v222_v19 = vld [vmem:[%s2544_s24 + $0x298] sm:$0xff]  ;;  %v223_v20 = vld [vmem:[%s2544_s24 + $0x2a0] sm:$0xff]  ;;  %v224_v21 = vld [vmem:[%s2544_s24 + $0x2a8] sm:$0xff] }
  0x46   : > { %1191 = vst [vmem:[%s2553_s25 + $0xe0] sm:$0xff] %v167_v28  ;;  %v225_v22 = vld [vmem:[%s2544_s24 + $0x2b0] sm:$0xff]  ;;  %v226_v23 = vld [vmem:[%s2544_s24 + $0x2b8] sm:$0xff]  ;;  %v227_v24 = vld [vmem:[%s2544_s24 + $0x2c0] sm:$0xff] }
  0x47   : > { %1192 = vst [vmem:[%s2553_s25 + $0xe8] sm:$0xff] %v168_v29  ;;  %v228_v25 = vld [vmem:[%s2544_s24 + $0x2c8] sm:$0xff]  ;;  %v229_v26 = vld [vmem:[%s2544_s24 + $0x2d0] sm:$0xff]  ;;  %v230_v27 = vld [vmem:[%s2544_s24 + $0x2d8] sm:$0xff] }
  0x48   : > { %1193 = vst [vmem:[%s2553_s25 + $0xf0] sm:$0xff] %v169_v30  ;;  %v231_v28 = vld [vmem:[%s2544_s24 + $0x2e0] sm:$0xff]  ;;  %v232_v29 = vld [vmem:[%s2544_s24 + $0x2e8] sm:$0xff]  ;;  %v233_v30 = vld [vmem:[%s2544_s24 + $0x2f0] sm:$0xff] }
  0x49   : > { %1194 = vst [vmem:[%s2553_s25 + $0xf8] sm:$0xff] %v170_v31  ;;  %v234_v31 = vld [vmem:[%s2544_s24 + $0x2f8] sm:$0xff] }
  0x4a   : > { %1195 = vst [vmem:[%s2553_s25 + $0x100] sm:$0xff] %v171_v32  ;;  %v235_v32 = vld [vmem:[%s2544_s24 + $0x300] sm:$0xff] }
  0x4b   : > { %1196 = vst [vmem:[%s2553_s25 + $0x108] sm:$0xff] %v172_v33  ;;  %v236_v33 = vld [vmem:[%s2544_s24 + $0x308] sm:$0xff] }
  0x4c   : > { %1197 = vst [vmem:[%s2553_s25 + $0x110] sm:$0xff] %v173_v34  ;;  %v237_v34 = vld [vmem:[%s2544_s24 + $0x310] sm:$0xff] }
  0x4d   : > { %1198 = vst [vmem:[%s2553_s25 + $0x118] sm:$0xff] %v174_v35  ;;  %v238_v35 = vld [vmem:[%s2544_s24 + $0x318] sm:$0xff] }
  0x4e   : > { %1199 = vst [vmem:[%s2553_s25 + $0x120] sm:$0xff] %v175_v36  ;;  %v239_v36 = vld [vmem:[%s2544_s24 + $0x320] sm:$0xff] }
  0x4f   : > { %1200 = vst [vmem:[%s2553_s25 + $0x128] sm:$0xff] %v176_v37  ;;  %v240_v37 = vld [vmem:[%s2544_s24 + $0x328] sm:$0xff] }
  0x50   : > { %1201 = vst [vmem:[%s2553_s25 + $0x130] sm:$0xff] %v177_v38  ;;  %v241_v38 = vld [vmem:[%s2544_s24 + $0x330] sm:$0xff] }
  0x51   : > { %1202 = vst [vmem:[%s2553_s25 + $0x138] sm:$0xff] %v178_v39  ;;  %v242_v39 = vld [vmem:[%s2544_s24 + $0x338] sm:$0xff] }
  0x52   : > { %1203 = vst [vmem:[%s2553_s25 + $0x140] sm:$0xff] %v179_v40  ;;  %v243_v40 = vld [vmem:[%s2544_s24 + $0x340] sm:$0xff] }
  0x53   : > { %1204 = vst [vmem:[%s2553_s25 + $0x148] sm:$0xff] %v180_v41  ;;  %v244_v41 = vld [vmem:[%s2544_s24 + $0x348] sm:$0xff] }
  0x54   : > { %1205 = vst [vmem:[%s2553_s25 + $0x150] sm:$0xff] %v181_v42  ;;  %v245_v42 = vld [vmem:[%s2544_s24 + $0x350] sm:$0xff] }
  0x55   : > { %1206 = vst [vmem:[%s2553_s25 + $0x158] sm:$0xff] %v182_v43  ;;  %v246_v43 = vld [vmem:[%s2544_s24 + $0x358] sm:$0xff] }
  0x56   : > { %1207 = vst [vmem:[%s2553_s25 + $0x160] sm:$0xff] %v183_v44  ;;  %v247_v44 = vld [vmem:[%s2544_s24 + $0x360] sm:$0xff] }
  0x57   : > { %1208 = vst [vmem:[%s2553_s25 + $0x168] sm:$0xff] %v184_v45  ;;  %v248_v45 = vld [vmem:[%s2544_s24 + $0x368] sm:$0xff] }
  0x58   : > { %1209 = vst [vmem:[%s2553_s25 + $0x170] sm:$0xff] %v185_v46  ;;  %v249_v46 = vld [vmem:[%s2544_s24 + $0x370] sm:$0xff] }
  0x59   : > { %1210 = vst [vmem:[%s2553_s25 + $0x178] sm:$0xff] %v186_v47  ;;  %v250_v47 = vld [vmem:[%s2544_s24 + $0x378] sm:$0xff] }
  0x5a   : > { %1211 = vst [vmem:[%s2553_s25 + $0x180] sm:$0xff] %v187_v48  ;;  %v251_v48 = vld [vmem:[%s2544_s24 + $0x380] sm:$0xff] }
  0x5b   : > { %1212 = vst [vmem:[%s2553_s25 + $0x188] sm:$0xff] %v188_v49  ;;  %v252_v49 = vld [vmem:[%s2544_s24 + $0x388] sm:$0xff] }
  0x5c   : > { %1213 = vst [vmem:[%s2553_s25 + $0x190] sm:$0xff] %v189_v50  ;;  %v253_v50 = vld [vmem:[%s2544_s24 + $0x390] sm:$0xff] }
  0x5d   : > { %1214 = vst [vmem:[%s2553_s25 + $0x198] sm:$0xff] %v190_v51  ;;  %v254_v51 = vld [vmem:[%s2544_s24 + $0x398] sm:$0xff] }
  0x5e   : > { %1215 = vst [vmem:[%s2553_s25 + $0x1a0] sm:$0xff] %v191_v52  ;;  %v255_v52 = vld [vmem:[%s2544_s24 + $0x3a0] sm:$0xff] }
  0x5f   : > { %1216 = vst [vmem:[%s2553_s25 + $0x1a8] sm:$0xff] %v192_v53  ;;  %v256_v53 = vld [vmem:[%s2544_s24 + $0x3a8] sm:$0xff] }
  0x60   : > { %1217 = vst [vmem:[%s2553_s25 + $0x1b0] sm:$0xff] %v193_v54  ;;  %v257_v54 = vld [vmem:[%s2544_s24 + $0x3b0] sm:$0xff] }
  0x61   : > { %1218 = vst [vmem:[%s2553_s25 + $0x1b8] sm:$0xff] %v194_v55  ;;  %v258_v55 = vld [vmem:[%s2544_s24 + $0x3b8] sm:$0xff] }
  0x62   : > { %1219 = vst [vmem:[%s2553_s25 + $0x1c0] sm:$0xff] %v195_v56  ;;  %v259_v56 = vld [vmem:[%s2544_s24 + $0x3c0] sm:$0xff] }
  0x63   : > { %1220 = vst [vmem:[%s2553_s25 + $0x1c8] sm:$0xff] %v196_v57  ;;  %v260_v57 = vld [vmem:[%s2544_s24 + $0x3c8] sm:$0xff] }
  0x64   : > { %1221 = vst [vmem:[%s2553_s25 + $0x1d0] sm:$0xff] %v197_v58  ;;  %v261_v58 = vld [vmem:[%s2544_s24 + $0x3d0] sm:$0xff] }
  0x65   : > { %1222 = vst [vmem:[%s2553_s25 + $0x1d8] sm:$0xff] %v198_v59  ;;  %v262_v59 = vld [vmem:[%s2544_s24 + $0x3d8] sm:$0xff] }
  0x66   : > { %1223 = vst [vmem:[%s2553_s25 + $0x1e0] sm:$0xff] %v199_v60  ;;  %v263_v60 = vld [vmem:[%s2544_s24 + $0x3e0] sm:$0xff] }
  0x67   : > { %1224 = vst [vmem:[%s2553_s25 + $0x1e8] sm:$0xff] %v200_v61  ;;  %v264_v61 = vld [vmem:[%s2544_s24 + $0x3e8] sm:$0xff] }
  0x68   : > { %1225 = vst [vmem:[%s2553_s25 + $0x1f0] sm:$0xff] %v201_v62  ;;  %v265_v62 = vld [vmem:[%s2544_s24 + $0x3f0] sm:$0xff] }
  0x69   : > { %1226 = vst [vmem:[%s2553_s25 + $0x1f8] sm:$0xff] %v202_v63  ;;  %v266_v63 = vld [vmem:[%s2544_s24 + $0x3f8] sm:$0xff] }
  0x6a   : > { %1227 = vst [vmem:[%s2553_s25 + $0x200] sm:$0xff] %v203_v0  ;;  %v267_v0 = vld [vmem:[%s2544_s24 + $0x400] sm:$0xff] }
  0x6b   : > { %1228 = vst [vmem:[%s2553_s25 + $0x208] sm:$0xff] %v204_v1  ;;  %v268_v1 = vld [vmem:[%s2544_s24 + $0x408] sm:$0xff] }
  0x6c   : > { %1229 = vst [vmem:[%s2553_s25 + $0x210] sm:$0xff] %v205_v2  ;;  %v269_v2 = vld [vmem:[%s2544_s24 + $0x410] sm:$0xff] }
  0x6d   : > { %1230 = vst [vmem:[%s2553_s25 + $0x218] sm:$0xff] %v206_v3  ;;  %v270_v3 = vld [vmem:[%s2544_s24 + $0x418] sm:$0xff] }
  0x6e   : > { %1231 = vst [vmem:[%s2553_s25 + $0x220] sm:$0xff] %v207_v4  ;;  %v271_v4 = vld [vmem:[%s2544_s24 + $0x420] sm:$0xff] }
  0x6f   : > { %1232 = vst [vmem:[%s2553_s25 + $0x228] sm:$0xff] %v208_v5  ;;  %v272_v5 = vld [vmem:[%s2544_s24 + $0x428] sm:$0xff] }
  0x70   : > { %1233 = vst [vmem:[%s2553_s25 + $0x230] sm:$0xff] %v209_v6  ;;  %v273_v6 = vld [vmem:[%s2544_s24 + $0x430] sm:$0xff] }
  0x71   : > { %1234 = vst [vmem:[%s2553_s25 + $0x238] sm:$0xff] %v210_v7  ;;  %v274_v7 = vld [vmem:[%s2544_s24 + $0x438] sm:$0xff] }
  0x72   : > { %1235 = vst [vmem:[%s2553_s25 + $0x240] sm:$0xff] %v211_v8  ;;  %v275_v8 = vld [vmem:[%s2544_s24 + $0x440] sm:$0xff] }
  0x73   : > { %1236 = vst [vmem:[%s2553_s25 + $0x248] sm:$0xff] %v212_v9  ;;  %v276_v9 = vld [vmem:[%s2544_s24 + $0x448] sm:$0xff] }
  0x74   : > { %1237 = vst [vmem:[%s2553_s25 + $0x250] sm:$0xff] %v213_v10  ;;  %v277_v10 = vld [vmem:[%s2544_s24 + $0x450] sm:$0xff] }
  0x75   : > { %1238 = vst [vmem:[%s2553_s25 + $0x258] sm:$0xff] %v214_v11  ;;  %v278_v11 = vld [vmem:[%s2544_s24 + $0x458] sm:$0xff] }
  0x76   : > { %1239 = vst [vmem:[%s2553_s25 + $0x260] sm:$0xff] %v215_v12  ;;  %v279_v12 = vld [vmem:[%s2544_s24 + $0x460] sm:$0xff] }
  0x77   : > { %1240 = vst [vmem:[%s2553_s25 + $0x268] sm:$0xff] %v216_v13  ;;  %v280_v13 = vld [vmem:[%s2544_s24 + $0x468] sm:$0xff] }
  0x78   : > { %1241 = vst [vmem:[%s2553_s25 + $0x270] sm:$0xff] %v217_v14  ;;  %v281_v14 = vld [vmem:[%s2544_s24 + $0x470] sm:$0xff] }
  0x79   : > { %1242 = vst [vmem:[%s2553_s25 + $0x278] sm:$0xff] %v218_v15  ;;  %v282_v15 = vld [vmem:[%s2544_s24 + $0x478] sm:$0xff] }
  0x7a   : > { %1243 = vst [vmem:[%s2553_s25 + $0x280] sm:$0xff] %v219_v16  ;;  %v283_v16 = vld [vmem:[%s2544_s24 + $0x480] sm:$0xff] }
  0x7b   : > { %1244 = vst [vmem:[%s2553_s25 + $0x288] sm:$0xff] %v220_v17  ;;  %v284_v17 = vld [vmem:[%s2544_s24 + $0x488] sm:$0xff] }
  0x7c   : > { %1245 = vst [vmem:[%s2553_s25 + $0x290] sm:$0xff] %v221_v18  ;;  %v285_v18 = vld [vmem:[%s2544_s24 + $0x490] sm:$0xff] }
  0x7d   : > { %1246 = vst [vmem:[%s2553_s25 + $0x298] sm:$0xff] %v222_v19  ;;  %v286_v19 = vld [vmem:[%s2544_s24 + $0x498] sm:$0xff] }
  0x7e   : > { %1247 = vst [vmem:[%s2553_s25 + $0x2a0] sm:$0xff] %v223_v20  ;;  %v287_v20 = vld [vmem:[%s2544_s24 + $0x4a0] sm:$0xff] }
  0x7f   : > { %1248 = vst [vmem:[%s2553_s25 + $0x2a8] sm:$0xff] %v224_v21  ;;  %v288_v21 = vld [vmem:[%s2544_s24 + $0x4a8] sm:$0xff] }
  0x80   : > { %1249 = vst [vmem:[%s2553_s25 + $0x2b0] sm:$0xff] %v225_v22  ;;  %v289_v22 = vld [vmem:[%s2544_s24 + $0x4b0] sm:$0xff] }
  0x81   : > { %1250 = vst [vmem:[%s2553_s25 + $0x2b8] sm:$0xff] %v226_v23  ;;  %v290_v23 = vld [vmem:[%s2544_s24 + $0x4b8] sm:$0xff] }
  0x82   : > { %1251 = vst [vmem:[%s2553_s25 + $0x2c0] sm:$0xff] %v227_v24  ;;  %v291_v24 = vld [vmem:[%s2544_s24 + $0x4c0] sm:$0xff] }
  0x83   : > { %1252 = vst [vmem:[%s2553_s25 + $0x2c8] sm:$0xff] %v228_v25  ;;  %v292_v25 = vld [vmem:[%s2544_s24 + $0x4c8] sm:$0xff] }
  0x84   : > { %1253 = vst [vmem:[%s2553_s25 + $0x2d0] sm:$0xff] %v229_v26  ;;  %v293_v26 = vld [vmem:[%s2544_s24 + $0x4d0] sm:$0xff] }
  0x85   : > { %1254 = vst [vmem:[%s2553_s25 + $0x2d8] sm:$0xff] %v230_v27  ;;  %v294_v27 = vld [vmem:[%s2544_s24 + $0x4d8] sm:$0xff] }
  0x86   : > { %1255 = vst [vmem:[%s2553_s25 + $0x2e0] sm:$0xff] %v231_v28  ;;  %v295_v28 = vld [vmem:[%s2544_s24 + $0x4e0] sm:$0xff] }
  0x87   : > { %1256 = vst [vmem:[%s2553_s25 + $0x2e8] sm:$0xff] %v232_v29  ;;  %v296_v29 = vld [vmem:[%s2544_s24 + $0x4e8] sm:$0xff] }
  0x88   : > { %1257 = vst [vmem:[%s2553_s25 + $0x2f0] sm:$0xff] %v233_v30  ;;  %v297_v30 = vld [vmem:[%s2544_s24 + $0x4f0] sm:$0xff] }
  0x89   : > { %1258 = vst [vmem:[%s2553_s25 + $0x2f8] sm:$0xff] %v234_v31  ;;  %v298_v31 = vld [vmem:[%s2544_s24 + $0x4f8] sm:$0xff] }
  0x8a   : > { %1259 = vst [vmem:[%s2553_s25 + $0x300] sm:$0xff] %v235_v32  ;;  %v299_v32 = vld [vmem:[%s2544_s24 + $0x500] sm:$0xff] }
  0x8b   : > { %1260 = vst [vmem:[%s2553_s25 + $0x308] sm:$0xff] %v236_v33  ;;  %v300_v33 = vld [vmem:[%s2544_s24 + $0x508] sm:$0xff] }
  0x8c   : > { %1261 = vst [vmem:[%s2553_s25 + $0x310] sm:$0xff] %v237_v34  ;;  %v301_v34 = vld [vmem:[%s2544_s24 + $0x510] sm:$0xff] }
  0x8d   : > { %1262 = vst [vmem:[%s2553_s25 + $0x318] sm:$0xff] %v238_v35  ;;  %v302_v35 = vld [vmem:[%s2544_s24 + $0x518] sm:$0xff] }
  0x8e   : > { %1263 = vst [vmem:[%s2553_s25 + $0x320] sm:$0xff] %v239_v36  ;;  %v303_v36 = vld [vmem:[%s2544_s24 + $0x520] sm:$0xff] }
  0x8f   : > { %1264 = vst [vmem:[%s2553_s25 + $0x328] sm:$0xff] %v240_v37  ;;  %v304_v37 = vld [vmem:[%s2544_s24 + $0x528] sm:$0xff] }
  0x90   : > { %1265 = vst [vmem:[%s2553_s25 + $0x330] sm:$0xff] %v241_v38  ;;  %v305_v38 = vld [vmem:[%s2544_s24 + $0x530] sm:$0xff] }
  0x91   : > { %1266 = vst [vmem:[%s2553_s25 + $0x338] sm:$0xff] %v242_v39  ;;  %v306_v39 = vld [vmem:[%s2544_s24 + $0x538] sm:$0xff] }
  0x92   : > { %1267 = vst [vmem:[%s2553_s25 + $0x340] sm:$0xff] %v243_v40  ;;  %v307_v40 = vld [vmem:[%s2544_s24 + $0x540] sm:$0xff] }
  0x93   : > { %1268 = vst [vmem:[%s2553_s25 + $0x348] sm:$0xff] %v244_v41  ;;  %v308_v41 = vld [vmem:[%s2544_s24 + $0x548] sm:$0xff] }
  0x94   : > { %1269 = vst [vmem:[%s2553_s25 + $0x350] sm:$0xff] %v245_v42  ;;  %v309_v42 = vld [vmem:[%s2544_s24 + $0x550] sm:$0xff] }
  0x95   : > { %1270 = vst [vmem:[%s2553_s25 + $0x358] sm:$0xff] %v246_v43  ;;  %v310_v43 = vld [vmem:[%s2544_s24 + $0x558] sm:$0xff] }
  0x96   : > { %1271 = vst [vmem:[%s2553_s25 + $0x360] sm:$0xff] %v247_v44  ;;  %v311_v44 = vld [vmem:[%s2544_s24 + $0x560] sm:$0xff] }
  0x97   : > { %1272 = vst [vmem:[%s2553_s25 + $0x368] sm:$0xff] %v248_v45  ;;  %v312_v45 = vld [vmem:[%s2544_s24 + $0x568] sm:$0xff] }
  0x98   : > { %1273 = vst [vmem:[%s2553_s25 + $0x370] sm:$0xff] %v249_v46  ;;  %v313_v46 = vld [vmem:[%s2544_s24 + $0x570] sm:$0xff] }
  0x99   : > { %1274 = vst [vmem:[%s2553_s25 + $0x378] sm:$0xff] %v250_v47  ;;  %v314_v47 = vld [vmem:[%s2544_s24 + $0x578] sm:$0xff] }
  0x9a   : > { %1275 = vst [vmem:[%s2553_s25 + $0x380] sm:$0xff] %v251_v48  ;;  %v315_v48 = vld [vmem:[%s2544_s24 + $0x580] sm:$0xff] }
  0x9b   : > { %1276 = vst [vmem:[%s2553_s25 + $0x388] sm:$0xff] %v252_v49  ;;  %v316_v49 = vld [vmem:[%s2544_s24 + $0x588] sm:$0xff] }
  0x9c   : > { %1277 = vst [vmem:[%s2553_s25 + $0x390] sm:$0xff] %v253_v50  ;;  %v317_v50 = vld [vmem:[%s2544_s24 + $0x590] sm:$0xff] }
  0x9d   : > { %1278 = vst [vmem:[%s2553_s25 + $0x398] sm:$0xff] %v254_v51  ;;  %v318_v51 = vld [vmem:[%s2544_s24 + $0x598] sm:$0xff] }
  0x9e   : > { %1279 = vst [vmem:[%s2553_s25 + $0x3a0] sm:$0xff] %v255_v52  ;;  %v319_v52 = vld [vmem:[%s2544_s24 + $0x5a0] sm:$0xff] }
  0x9f   : > { %1280 = vst [vmem:[%s2553_s25 + $0x3a8] sm:$0xff] %v256_v53  ;;  %v320_v53 = vld [vmem:[%s2544_s24 + $0x5a8] sm:$0xff] }
  0xa0   : > { %1281 = vst [vmem:[%s2553_s25 + $0x3b0] sm:$0xff] %v257_v54  ;;  %v321_v54 = vld [vmem:[%s2544_s24 + $0x5b0] sm:$0xff] }
  0xa1   : > { %1282 = vst [vmem:[%s2553_s25 + $0x3b8] sm:$0xff] %v258_v55  ;;  %v322_v55 = vld [vmem:[%s2544_s24 + $0x5b8] sm:$0xff] }
  0xa2   : > { %1283 = vst [vmem:[%s2553_s25 + $0x3c0] sm:$0xff] %v259_v56  ;;  %v323_v56 = vld [vmem:[%s2544_s24 + $0x5c0] sm:$0xff] }
  0xa3   : > { %1284 = vst [vmem:[%s2553_s25 + $0x3c8] sm:$0xff] %v260_v57  ;;  %v324_v57 = vld [vmem:[%s2544_s24 + $0x5c8] sm:$0xff] }
  0xa4   : > { %1285 = vst [vmem:[%s2553_s25 + $0x3d0] sm:$0xff] %v261_v58  ;;  %v325_v58 = vld [vmem:[%s2544_s24 + $0x5d0] sm:$0xff] }
  0xa5   : > { %1286 = vst [vmem:[%s2553_s25 + $0x3d8] sm:$0xff] %v262_v59  ;;  %v326_v59 = vld [vmem:[%s2544_s24 + $0x5d8] sm:$0xff] }
  0xa6   : > { %1287 = vst [vmem:[%s2553_s25 + $0x3e0] sm:$0xff] %v263_v60  ;;  %v327_v60 = vld [vmem:[%s2544_s24 + $0x5e0] sm:$0xff] }
  0xa7   : > { %1288 = vst [vmem:[%s2553_s25 + $0x3e8] sm:$0xff] %v264_v61  ;;  %v328_v61 = vld [vmem:[%s2544_s24 + $0x5e8] sm:$0xff] }
  0xa8   : > { %1289 = vst [vmem:[%s2553_s25 + $0x3f0] sm:$0xff] %v265_v62  ;;  %v329_v62 = vld [vmem:[%s2544_s24 + $0x5f0] sm:$0xff] }
  0xa9   : > { %1290 = vst [vmem:[%s2553_s25 + $0x3f8] sm:$0xff] %v266_v63  ;;  %v330_v63 = vld [vmem:[%s2544_s24 + $0x5f8] sm:$0xff] }
  0xaa   : > { %1291 = vst [vmem:[%s2553_s25 + $0x400] sm:$0xff] %v267_v0  ;;  %v331_v0 = vld [vmem:[%s2544_s24 + $0x600] sm:$0xff] }
  0xab   : > { %1292 = vst [vmem:[%s2553_s25 + $0x408] sm:$0xff] %v268_v1  ;;  %v332_v1 = vld [vmem:[%s2544_s24 + $0x608] sm:$0xff] }
  0xac   : > { %1293 = vst [vmem:[%s2553_s25 + $0x410] sm:$0xff] %v269_v2  ;;  %v333_v2 = vld [vmem:[%s2544_s24 + $0x610] sm:$0xff] }
  0xad   : > { %1294 = vst [vmem:[%s2553_s25 + $0x418] sm:$0xff] %v270_v3  ;;  %v334_v3 = vld [vmem:[%s2544_s24 + $0x618] sm:$0xff] }
  0xae   : > { %1295 = vst [vmem:[%s2553_s25 + $0x420] sm:$0xff] %v271_v4  ;;  %v335_v4 = vld [vmem:[%s2544_s24 + $0x620] sm:$0xff] }
  0xaf   : > { %1296 = vst [vmem:[%s2553_s25 + $0x428] sm:$0xff] %v272_v5  ;;  %v336_v5 = vld [vmem:[%s2544_s24 + $0x628] sm:$0xff] }
  0xb0   : > { %1297 = vst [vmem:[%s2553_s25 + $0x430] sm:$0xff] %v273_v6  ;;  %v337_v6 = vld [vmem:[%s2544_s24 + $0x630] sm:$0xff] }
  0xb1   : > { %1298 = vst [vmem:[%s2553_s25 + $0x438] sm:$0xff] %v274_v7  ;;  %v338_v7 = vld [vmem:[%s2544_s24 + $0x638] sm:$0xff] }
  0xb2   : > { %1299 = vst [vmem:[%s2553_s25 + $0x440] sm:$0xff] %v275_v8  ;;  %v339_v8 = vld [vmem:[%s2544_s24 + $0x640] sm:$0xff] }
  0xb3   : > { %1300 = vst [vmem:[%s2553_s25 + $0x448] sm:$0xff] %v276_v9  ;;  %v340_v9 = vld [vmem:[%s2544_s24 + $0x648] sm:$0xff] }
  0xb4   : > { %1301 = vst [vmem:[%s2553_s25 + $0x450] sm:$0xff] %v277_v10  ;;  %v341_v10 = vld [vmem:[%s2544_s24 + $0x650] sm:$0xff] }
  0xb5   : > { %1302 = vst [vmem:[%s2553_s25 + $0x458] sm:$0xff] %v278_v11  ;;  %v342_v11 = vld [vmem:[%s2544_s24 + $0x658] sm:$0xff] }
  0xb6   : > { %1303 = vst [vmem:[%s2553_s25 + $0x460] sm:$0xff] %v279_v12  ;;  %v343_v12 = vld [vmem:[%s2544_s24 + $0x660] sm:$0xff] }
  0xb7   : > { %1304 = vst [vmem:[%s2553_s25 + $0x468] sm:$0xff] %v280_v13  ;;  %v344_v13 = vld [vmem:[%s2544_s24 + $0x668] sm:$0xff] }
  0xb8   : > { %1305 = vst [vmem:[%s2553_s25 + $0x470] sm:$0xff] %v281_v14  ;;  %v345_v14 = vld [vmem:[%s2544_s24 + $0x670] sm:$0xff] }
  0xb9   : > { %1306 = vst [vmem:[%s2553_s25 + $0x478] sm:$0xff] %v282_v15  ;;  %v346_v15 = vld [vmem:[%s2544_s24 + $0x678] sm:$0xff] }
  0xba   : > { %1307 = vst [vmem:[%s2553_s25 + $0x480] sm:$0xff] %v283_v16  ;;  %v347_v16 = vld [vmem:[%s2544_s24 + $0x680] sm:$0xff] }
  0xbb   : > { %1308 = vst [vmem:[%s2553_s25 + $0x488] sm:$0xff] %v284_v17  ;;  %v348_v17 = vld [vmem:[%s2544_s24 + $0x688] sm:$0xff] }
  0xbc   : > { %1309 = vst [vmem:[%s2553_s25 + $0x490] sm:$0xff] %v285_v18  ;;  %v349_v18 = vld [vmem:[%s2544_s24 + $0x690] sm:$0xff] }
  0xbd   : > { %1310 = vst [vmem:[%s2553_s25 + $0x498] sm:$0xff] %v286_v19  ;;  %v350_v19 = vld [vmem:[%s2544_s24 + $0x698] sm:$0xff] }
  0xbe   : > { %1311 = vst [vmem:[%s2553_s25 + $0x4a0] sm:$0xff] %v287_v20  ;;  %v351_v20 = vld [vmem:[%s2544_s24 + $0x6a0] sm:$0xff] }
  0xbf   : > { %1312 = vst [vmem:[%s2553_s25 + $0x4a8] sm:$0xff] %v288_v21  ;;  %v352_v21 = vld [vmem:[%s2544_s24 + $0x6a8] sm:$0xff] }
  0xc0   : > { %1313 = vst [vmem:[%s2553_s25 + $0x4b0] sm:$0xff] %v289_v22  ;;  %v353_v22 = vld [vmem:[%s2544_s24 + $0x6b0] sm:$0xff] }
  0xc1   : > { %1314 = vst [vmem:[%s2553_s25 + $0x4b8] sm:$0xff] %v290_v23  ;;  %v354_v23 = vld [vmem:[%s2544_s24 + $0x6b8] sm:$0xff] }
  0xc2   : > { %1315 = vst [vmem:[%s2553_s25 + $0x4c0] sm:$0xff] %v291_v24  ;;  %v355_v24 = vld [vmem:[%s2544_s24 + $0x6c0] sm:$0xff] }
  0xc3   : > { %1316 = vst [vmem:[%s2553_s25 + $0x4c8] sm:$0xff] %v292_v25  ;;  %v356_v25 = vld [vmem:[%s2544_s24 + $0x6c8] sm:$0xff] }
  0xc4   : > { %1317 = vst [vmem:[%s2553_s25 + $0x4d0] sm:$0xff] %v293_v26  ;;  %v357_v26 = vld [vmem:[%s2544_s24 + $0x6d0] sm:$0xff] }
  0xc5   : > { %1318 = vst [vmem:[%s2553_s25 + $0x4d8] sm:$0xff] %v294_v27  ;;  %v358_v27 = vld [vmem:[%s2544_s24 + $0x6d8] sm:$0xff] }
  0xc6   : > { %1319 = vst [vmem:[%s2553_s25 + $0x4e0] sm:$0xff] %v295_v28  ;;  %v359_v28 = vld [vmem:[%s2544_s24 + $0x6e0] sm:$0xff] }
  0xc7   : > { %1320 = vst [vmem:[%s2553_s25 + $0x4e8] sm:$0xff] %v296_v29  ;;  %v360_v29 = vld [vmem:[%s2544_s24 + $0x6e8] sm:$0xff] }
  0xc8   : > { %1321 = vst [vmem:[%s2553_s25 + $0x4f0] sm:$0xff] %v297_v30  ;;  %v361_v30 = vld [vmem:[%s2544_s24 + $0x6f0] sm:$0xff] }
  0xc9   : > { %1322 = vst [vmem:[%s2553_s25 + $0x4f8] sm:$0xff] %v298_v31  ;;  %v362_v31 = vld [vmem:[%s2544_s24 + $0x6f8] sm:$0xff] }
  0xca   : > { %1323 = vst [vmem:[%s2553_s25 + $0x500] sm:$0xff] %v299_v32  ;;  %v363_v32 = vld [vmem:[%s2544_s24 + $0x700] sm:$0xff] }
  0xcb   : > { %1324 = vst [vmem:[%s2553_s25 + $0x508] sm:$0xff] %v300_v33  ;;  %v364_v33 = vld [vmem:[%s2544_s24 + $0x708] sm:$0xff] }
  0xcc   : > { %1325 = vst [vmem:[%s2553_s25 + $0x510] sm:$0xff] %v301_v34  ;;  %v365_v34 = vld [vmem:[%s2544_s24 + $0x710] sm:$0xff] }
  0xcd   : > { %1326 = vst [vmem:[%s2553_s25 + $0x518] sm:$0xff] %v302_v35  ;;  %v366_v35 = vld [vmem:[%s2544_s24 + $0x718] sm:$0xff] }
  0xce   : > { %1327 = vst [vmem:[%s2553_s25 + $0x520] sm:$0xff] %v303_v36  ;;  %v367_v36 = vld [vmem:[%s2544_s24 + $0x720] sm:$0xff] }
  0xcf   : > { %1328 = vst [vmem:[%s2553_s25 + $0x528] sm:$0xff] %v304_v37  ;;  %v368_v37 = vld [vmem:[%s2544_s24 + $0x728] sm:$0xff] }
  0xd0   : > { %1329 = vst [vmem:[%s2553_s25 + $0x530] sm:$0xff] %v305_v38  ;;  %v369_v38 = vld [vmem:[%s2544_s24 + $0x730] sm:$0xff] }
  0xd1   : > { %1330 = vst [vmem:[%s2553_s25 + $0x538] sm:$0xff] %v306_v39  ;;  %v370_v39 = vld [vmem:[%s2544_s24 + $0x738] sm:$0xff] }
  0xd2   : > { %1331 = vst [vmem:[%s2553_s25 + $0x540] sm:$0xff] %v307_v40  ;;  %v371_v40 = vld [vmem:[%s2544_s24 + $0x740] sm:$0xff] }
  0xd3   : > { %1332 = vst [vmem:[%s2553_s25 + $0x548] sm:$0xff] %v308_v41  ;;  %v372_v41 = vld [vmem:[%s2544_s24 + $0x748] sm:$0xff] }
  0xd4   : > { %1333 = vst [vmem:[%s2553_s25 + $0x550] sm:$0xff] %v309_v42  ;;  %v373_v42 = vld [vmem:[%s2544_s24 + $0x750] sm:$0xff] }
  0xd5   : > { %1334 = vst [vmem:[%s2553_s25 + $0x558] sm:$0xff] %v310_v43  ;;  %v374_v43 = vld [vmem:[%s2544_s24 + $0x758] sm:$0xff] }
  0xd6   : > { %1335 = vst [vmem:[%s2553_s25 + $0x560] sm:$0xff] %v311_v44  ;;  %v375_v44 = vld [vmem:[%s2544_s24 + $0x760] sm:$0xff] }
  0xd7   : > { %1336 = vst [vmem:[%s2553_s25 + $0x568] sm:$0xff] %v312_v45  ;;  %v376_v45 = vld [vmem:[%s2544_s24 + $0x768] sm:$0xff] }
  0xd8   : > { %1337 = vst [vmem:[%s2553_s25 + $0x570] sm:$0xff] %v313_v46  ;;  %v377_v46 = vld [vmem:[%s2544_s24 + $0x770] sm:$0xff] }
  0xd9   : > { %1338 = vst [vmem:[%s2553_s25 + $0x578] sm:$0xff] %v314_v47  ;;  %v378_v47 = vld [vmem:[%s2544_s24 + $0x778] sm:$0xff] }
  0xda   : > { %1339 = vst [vmem:[%s2553_s25 + $0x580] sm:$0xff] %v315_v48  ;;  %v379_v48 = vld [vmem:[%s2544_s24 + $0x780] sm:$0xff] }
  0xdb   : > { %1340 = vst [vmem:[%s2553_s25 + $0x588] sm:$0xff] %v316_v49  ;;  %v380_v49 = vld [vmem:[%s2544_s24 + $0x788] sm:$0xff] }
  0xdc   : > { %1341 = vst [vmem:[%s2553_s25 + $0x590] sm:$0xff] %v317_v50  ;;  %v381_v50 = vld [vmem:[%s2544_s24 + $0x790] sm:$0xff] }
  0xdd   : > { %1342 = vst [vmem:[%s2553_s25 + $0x598] sm:$0xff] %v318_v51  ;;  %v382_v51 = vld [vmem:[%s2544_s24 + $0x798] sm:$0xff] }
  0xde   : > { %1343 = vst [vmem:[%s2553_s25 + $0x5a0] sm:$0xff] %v319_v52  ;;  %v383_v52 = vld [vmem:[%s2544_s24 + $0x7a0] sm:$0xff] }
  0xdf   : > { %1344 = vst [vmem:[%s2553_s25 + $0x5a8] sm:$0xff] %v320_v53  ;;  %v384_v53 = vld [vmem:[%s2544_s24 + $0x7a8] sm:$0xff] }
  0xe0   : > { %1345 = vst [vmem:[%s2553_s25 + $0x5b0] sm:$0xff] %v321_v54  ;;  %v385_v54 = vld [vmem:[%s2544_s24 + $0x7b0] sm:$0xff] }
  0xe1   : > { %1346 = vst [vmem:[%s2553_s25 + $0x5b8] sm:$0xff] %v322_v55  ;;  %v386_v55 = vld [vmem:[%s2544_s24 + $0x7b8] sm:$0xff] }
  0xe2   : > { %1347 = vst [vmem:[%s2553_s25 + $0x5c0] sm:$0xff] %v323_v56  ;;  %v387_v56 = vld [vmem:[%s2544_s24 + $0x7c0] sm:$0xff] }
  0xe3   : > { %1348 = vst [vmem:[%s2553_s25 + $0x5c8] sm:$0xff] %v324_v57  ;;  %v388_v57 = vld [vmem:[%s2544_s24 + $0x7c8] sm:$0xff] }
  0xe4   : > { %1349 = vst [vmem:[%s2553_s25 + $0x5d0] sm:$0xff] %v325_v58  ;;  %v389_v58 = vld [vmem:[%s2544_s24 + $0x7d0] sm:$0xff] }
  0xe5   : > { %1350 = vst [vmem:[%s2553_s25 + $0x5d8] sm:$0xff] %v326_v59  ;;  %v390_v59 = vld [vmem:[%s2544_s24 + $0x7d8] sm:$0xff] }
  0xe6   : > { %1351 = vst [vmem:[%s2553_s25 + $0x5e0] sm:$0xff] %v327_v60  ;;  %v391_v60 = vld [vmem:[%s2544_s24 + $0x7e0] sm:$0xff] }
  0xe7   : > { %1352 = vst [vmem:[%s2553_s25 + $0x5e8] sm:$0xff] %v328_v61  ;;  %v392_v61 = vld [vmem:[%s2544_s24 + $0x7e8] sm:$0xff] }
  0xe8   : > { %1353 = vst [vmem:[%s2553_s25 + $0x5f0] sm:$0xff] %v329_v62  ;;  %v393_v62 = vld [vmem:[%s2544_s24 + $0x7f0] sm:$0xff] }
  0xe9   : > { %1354 = vst [vmem:[%s2553_s25 + $0x5f8] sm:$0xff] %v330_v63  ;;  %v394_v63 = vld [vmem:[%s2544_s24 + $0x7f8] sm:$0xff] }
  0xea   : > { %1355 = vst [vmem:[%s2553_s25 + $0x600] sm:$0xff] %v331_v0  ;;  %v395_v0 = vld [vmem:[%s2544_s24 + $0x800] sm:$0xff] }
  0xeb   : > { %1356 = vst [vmem:[%s2553_s25 + $0x608] sm:$0xff] %v332_v1  ;;  %v396_v1 = vld [vmem:[%s2544_s24 + $0x808] sm:$0xff] }
  0xec   : > { %1357 = vst [vmem:[%s2553_s25 + $0x610] sm:$0xff] %v333_v2  ;;  %v397_v2 = vld [vmem:[%s2544_s24 + $0x810] sm:$0xff] }
  0xed   : > { %1358 = vst [vmem:[%s2553_s25 + $0x618] sm:$0xff] %v334_v3  ;;  %v398_v3 = vld [vmem:[%s2544_s24 + $0x818] sm:$0xff] }
  0xee   : > { %1359 = vst [vmem:[%s2553_s25 + $0x620] sm:$0xff] %v335_v4  ;;  %v399_v4 = vld [vmem:[%s2544_s24 + $0x820] sm:$0xff] }
  0xef   : > { %1360 = vst [vmem:[%s2553_s25 + $0x628] sm:$0xff] %v336_v5  ;;  %v400_v5 = vld [vmem:[%s2544_s24 + $0x828] sm:$0xff] }
  0xf0   : > { %1361 = vst [vmem:[%s2553_s25 + $0x630] sm:$0xff] %v337_v6  ;;  %v401_v6 = vld [vmem:[%s2544_s24 + $0x830] sm:$0xff] }
  0xf1   : > { %1362 = vst [vmem:[%s2553_s25 + $0x638] sm:$0xff] %v338_v7  ;;  %v402_v7 = vld [vmem:[%s2544_s24 + $0x838] sm:$0xff] }
  0xf2   : > { %1363 = vst [vmem:[%s2553_s25 + $0x640] sm:$0xff] %v339_v8  ;;  %v403_v8 = vld [vmem:[%s2544_s24 + $0x840] sm:$0xff] }
  0xf3   : > { %1364 = vst [vmem:[%s2553_s25 + $0x648] sm:$0xff] %v340_v9  ;;  %v404_v9 = vld [vmem:[%s2544_s24 + $0x848] sm:$0xff] }
  0xf4   : > { %1365 = vst [vmem:[%s2553_s25 + $0x650] sm:$0xff] %v341_v10  ;;  %v405_v10 = vld [vmem:[%s2544_s24 + $0x850] sm:$0xff] }
  0xf5   : > { %1366 = vst [vmem:[%s2553_s25 + $0x658] sm:$0xff] %v342_v11  ;;  %v406_v11 = vld [vmem:[%s2544_s24 + $0x858] sm:$0xff] }
  0xf6   : > { %1367 = vst [vmem:[%s2553_s25 + $0x660] sm:$0xff] %v343_v12  ;;  %v407_v12 = vld [vmem:[%s2544_s24 + $0x860] sm:$0xff] }
  0xf7   : > { %1368 = vst [vmem:[%s2553_s25 + $0x668] sm:$0xff] %v344_v13  ;;  %v408_v13 = vld [vmem:[%s2544_s24 + $0x868] sm:$0xff] }
  0xf8   : > { %1369 = vst [vmem:[%s2553_s25 + $0x670] sm:$0xff] %v345_v14  ;;  %v409_v14 = vld [vmem:[%s2544_s24 + $0x870] sm:$0xff] }
  0xf9   : > { %1370 = vst [vmem:[%s2553_s25 + $0x678] sm:$0xff] %v346_v15  ;;  %v410_v15 = vld [vmem:[%s2544_s24 + $0x878] sm:$0xff] }
  0xfa   : > { %1371 = vst [vmem:[%s2553_s25 + $0x680] sm:$0xff] %v347_v16  ;;  %v411_v16 = vld [vmem:[%s2544_s24 + $0x880] sm:$0xff] }
  0xfb   : > { %1372 = vst [vmem:[%s2553_s25 + $0x688] sm:$0xff] %v348_v17  ;;  %v412_v17 = vld [vmem:[%s2544_s24 + $0x888] sm:$0xff] }
  0xfc   : > { %1373 = vst [vmem:[%s2553_s25 + $0x690] sm:$0xff] %v349_v18  ;;  %v413_v18 = vld [vmem:[%s2544_s24 + $0x890] sm:$0xff] }
  0xfd   : > { %1374 = vst [vmem:[%s2553_s25 + $0x698] sm:$0xff] %v350_v19  ;;  %v414_v19 = vld [vmem:[%s2544_s24 + $0x898] sm:$0xff] }
  0xfe   : > { %1375 = vst [vmem:[%s2553_s25 + $0x6a0] sm:$0xff] %v351_v20  ;;  %v415_v20 = vld [vmem:[%s2544_s24 + $0x8a0] sm:$0xff] }
  0xff   : > { %1376 = vst [vmem:[%s2553_s25 + $0x6a8] sm:$0xff] %v352_v21  ;;  %v416_v21 = vld [vmem:[%s2544_s24 + $0x8a8] sm:$0xff] }
 0x100   : > { %1377 = vst [vmem:[%s2553_s25 + $0x6b0] sm:$0xff] %v353_v22  ;;  %v417_v22 = vld [vmem:[%s2544_s24 + $0x8b0] sm:$0xff] }
 0x101   : > { %1378 = vst [vmem:[%s2553_s25 + $0x6b8] sm:$0xff] %v354_v23  ;;  %v418_v23 = vld [vmem:[%s2544_s24 + $0x8b8] sm:$0xff] }
 0x102   : > { %1379 = vst [vmem:[%s2553_s25 + $0x6c0] sm:$0xff] %v355_v24  ;;  %v419_v24 = vld [vmem:[%s2544_s24 + $0x8c0] sm:$0xff] }
 0x103   : > { %1380 = vst [vmem:[%s2553_s25 + $0x6c8] sm:$0xff] %v356_v25  ;;  %v420_v25 = vld [vmem:[%s2544_s24 + $0x8c8] sm:$0xff] }
 0x104   : > { %1381 = vst [vmem:[%s2553_s25 + $0x6d0] sm:$0xff] %v357_v26  ;;  %v421_v26 = vld [vmem:[%s2544_s24 + $0x8d0] sm:$0xff] }
 0x105   : > { %1382 = vst [vmem:[%s2553_s25 + $0x6d8] sm:$0xff] %v358_v27  ;;  %v422_v27 = vld [vmem:[%s2544_s24 + $0x8d8] sm:$0xff] }
 0x106   : > { %1383 = vst [vmem:[%s2553_s25 + $0x6e0] sm:$0xff] %v359_v28  ;;  %v423_v28 = vld [vmem:[%s2544_s24 + $0x8e0] sm:$0xff] }
 0x107   : > { %1384 = vst [vmem:[%s2553_s25 + $0x6e8] sm:$0xff] %v360_v29  ;;  %v424_v29 = vld [vmem:[%s2544_s24 + $0x8e8] sm:$0xff] }
 0x108   : > { %1385 = vst [vmem:[%s2553_s25 + $0x6f0] sm:$0xff] %v361_v30  ;;  %v425_v30 = vld [vmem:[%s2544_s24 + $0x8f0] sm:$0xff] }
 0x109   : > { %1386 = vst [vmem:[%s2553_s25 + $0x6f8] sm:$0xff] %v362_v31  ;;  %v426_v31 = vld [vmem:[%s2544_s24 + $0x8f8] sm:$0xff] }
 0x10a   : > { %1387 = vst [vmem:[%s2553_s25 + $0x700] sm:$0xff] %v363_v32  ;;  %v427_v32 = vld [vmem:[%s2544_s24 + $0x900] sm:$0xff] }
 0x10b   : > { %1388 = vst [vmem:[%s2553_s25 + $0x708] sm:$0xff] %v364_v33  ;;  %v428_v33 = vld [vmem:[%s2544_s24 + $0x908] sm:$0xff] }
 0x10c   : > { %1389 = vst [vmem:[%s2553_s25 + $0x710] sm:$0xff] %v365_v34  ;;  %v429_v34 = vld [vmem:[%s2544_s24 + $0x910] sm:$0xff] }
 0x10d   : > { %1390 = vst [vmem:[%s2553_s25 + $0x718] sm:$0xff] %v366_v35  ;;  %v430_v35 = vld [vmem:[%s2544_s24 + $0x918] sm:$0xff] }
 0x10e   : > { %1391 = vst [vmem:[%s2553_s25 + $0x720] sm:$0xff] %v367_v36  ;;  %v431_v36 = vld [vmem:[%s2544_s24 + $0x920] sm:$0xff] }
 0x10f   : > { %1392 = vst [vmem:[%s2553_s25 + $0x728] sm:$0xff] %v368_v37  ;;  %v432_v37 = vld [vmem:[%s2544_s24 + $0x928] sm:$0xff] }
 0x110   : > { %1393 = vst [vmem:[%s2553_s25 + $0x730] sm:$0xff] %v369_v38  ;;  %v433_v38 = vld [vmem:[%s2544_s24 + $0x930] sm:$0xff] }
 0x111   : > { %1394 = vst [vmem:[%s2553_s25 + $0x738] sm:$0xff] %v370_v39  ;;  %v434_v39 = vld [vmem:[%s2544_s24 + $0x938] sm:$0xff] }
 0x112   : > { %1395 = vst [vmem:[%s2553_s25 + $0x740] sm:$0xff] %v371_v40  ;;  %v435_v40 = vld [vmem:[%s2544_s24 + $0x940] sm:$0xff] }
 0x113   : > { %1396 = vst [vmem:[%s2553_s25 + $0x748] sm:$0xff] %v372_v41  ;;  %v436_v41 = vld [vmem:[%s2544_s24 + $0x948] sm:$0xff] }
 0x114   : > { %1397 = vst [vmem:[%s2553_s25 + $0x750] sm:$0xff] %v373_v42  ;;  %v437_v42 = vld [vmem:[%s2544_s24 + $0x950] sm:$0xff] }
 0x115   : > { %1398 = vst [vmem:[%s2553_s25 + $0x758] sm:$0xff] %v374_v43  ;;  %v438_v43 = vld [vmem:[%s2544_s24 + $0x958] sm:$0xff] }
 0x116   : > { %1399 = vst [vmem:[%s2553_s25 + $0x760] sm:$0xff] %v375_v44  ;;  %v439_v44 = vld [vmem:[%s2544_s24 + $0x960] sm:$0xff] }
 0x117   : > { %1400 = vst [vmem:[%s2553_s25 + $0x768] sm:$0xff] %v376_v45  ;;  %v440_v45 = vld [vmem:[%s2544_s24 + $0x968] sm:$0xff] }
 0x118   : > { %1401 = vst [vmem:[%s2553_s25 + $0x770] sm:$0xff] %v377_v46  ;;  %v441_v46 = vld [vmem:[%s2544_s24 + $0x970] sm:$0xff] }
 0x119   : > { %1402 = vst [vmem:[%s2553_s25 + $0x778] sm:$0xff] %v378_v47  ;;  %v442_v47 = vld [vmem:[%s2544_s24 + $0x978] sm:$0xff] }
 0x11a   : > { %1403 = vst [vmem:[%s2553_s25 + $0x780] sm:$0xff] %v379_v48  ;;  %v443_v48 = vld [vmem:[%s2544_s24 + $0x980] sm:$0xff] }
 0x11b   : > { %1404 = vst [vmem:[%s2553_s25 + $0x788] sm:$0xff] %v380_v49  ;;  %v444_v49 = vld [vmem:[%s2544_s24 + $0x988] sm:$0xff] }
 0x11c   : > { %1405 = vst [vmem:[%s2553_s25 + $0x790] sm:$0xff] %v381_v50  ;;  %v445_v50 = vld [vmem:[%s2544_s24 + $0x990] sm:$0xff] }
 0x11d   : > { %1406 = vst [vmem:[%s2553_s25 + $0x798] sm:$0xff] %v382_v51  ;;  %v446_v51 = vld [vmem:[%s2544_s24 + $0x998] sm:$0xff] }
 0x11e   : > { %1407 = vst [vmem:[%s2553_s25 + $0x7a0] sm:$0xff] %v383_v52  ;;  %v447_v52 = vld [vmem:[%s2544_s24 + $0x9a0] sm:$0xff] }
 0x11f   : > { %1408 = vst [vmem:[%s2553_s25 + $0x7a8] sm:$0xff] %v384_v53  ;;  %v448_v53 = vld [vmem:[%s2544_s24 + $0x9a8] sm:$0xff] }
 0x120   : > { %1409 = vst [vmem:[%s2553_s25 + $0x7b0] sm:$0xff] %v385_v54  ;;  %v449_v54 = vld [vmem:[%s2544_s24 + $0x9b0] sm:$0xff] }
 0x121   : > { %1410 = vst [vmem:[%s2553_s25 + $0x7b8] sm:$0xff] %v386_v55  ;;  %v450_v55 = vld [vmem:[%s2544_s24 + $0x9b8] sm:$0xff] }
 0x122   : > { %1411 = vst [vmem:[%s2553_s25 + $0x7c0] sm:$0xff] %v387_v56  ;;  %v451_v56 = vld [vmem:[%s2544_s24 + $0x9c0] sm:$0xff] }
 0x123   : > { %1412 = vst [vmem:[%s2553_s25 + $0x7c8] sm:$0xff] %v388_v57  ;;  %v452_v57 = vld [vmem:[%s2544_s24 + $0x9c8] sm:$0xff] }
 0x124   : > { %1413 = vst [vmem:[%s2553_s25 + $0x7d0] sm:$0xff] %v389_v58  ;;  %v453_v58 = vld [vmem:[%s2544_s24 + $0x9d0] sm:$0xff] }
 0x125   : > { %1414 = vst [vmem:[%s2553_s25 + $0x7d8] sm:$0xff] %v390_v59  ;;  %v454_v59 = vld [vmem:[%s2544_s24 + $0x9d8] sm:$0xff] }
 0x126   : > { %1415 = vst [vmem:[%s2553_s25 + $0x7e0] sm:$0xff] %v391_v60  ;;  %v455_v60 = vld [vmem:[%s2544_s24 + $0x9e0] sm:$0xff] }
 0x127   : > { %1416 = vst [vmem:[%s2553_s25 + $0x7e8] sm:$0xff] %v392_v61  ;;  %v456_v61 = vld [vmem:[%s2544_s24 + $0x9e8] sm:$0xff] }
 0x128   : > { %1417 = vst [vmem:[%s2553_s25 + $0x7f0] sm:$0xff] %v393_v62  ;;  %v457_v62 = vld [vmem:[%s2544_s24 + $0x9f0] sm:$0xff] }
 0x129   : > { %1418 = vst [vmem:[%s2553_s25 + $0x7f8] sm:$0xff] %v394_v63  ;;  %v458_v63 = vld [vmem:[%s2544_s24 + $0x9f8] sm:$0xff] }
 0x12a   : > { %1419 = vst [vmem:[%s2553_s25 + $0x800] sm:$0xff] %v395_v0  ;;  %v459_v0 = vld [vmem:[%s2544_s24 + $0xa00] sm:$0xff] }
 0x12b   : > { %1420 = vst [vmem:[%s2553_s25 + $0x808] sm:$0xff] %v396_v1  ;;  %v460_v1 = vld [vmem:[%s2544_s24 + $0xa08] sm:$0xff] }
 0x12c   : > { %1421 = vst [vmem:[%s2553_s25 + $0x810] sm:$0xff] %v397_v2  ;;  %v461_v2 = vld [vmem:[%s2544_s24 + $0xa10] sm:$0xff] }
 0x12d   : > { %1422 = vst [vmem:[%s2553_s25 + $0x818] sm:$0xff] %v398_v3  ;;  %v462_v3 = vld [vmem:[%s2544_s24 + $0xa18] sm:$0xff] }
 0x12e   : > { %1423 = vst [vmem:[%s2553_s25 + $0x820] sm:$0xff] %v399_v4  ;;  %v463_v4 = vld [vmem:[%s2544_s24 + $0xa20] sm:$0xff] }
 0x12f   : > { %1424 = vst [vmem:[%s2553_s25 + $0x828] sm:$0xff] %v400_v5  ;;  %v464_v5 = vld [vmem:[%s2544_s24 + $0xa28] sm:$0xff] }
 0x130   : > { %1425 = vst [vmem:[%s2553_s25 + $0x830] sm:$0xff] %v401_v6  ;;  %v465_v6 = vld [vmem:[%s2544_s24 + $0xa30] sm:$0xff] }
 0x131   : > { %1426 = vst [vmem:[%s2553_s25 + $0x838] sm:$0xff] %v402_v7  ;;  %v466_v7 = vld [vmem:[%s2544_s24 + $0xa38] sm:$0xff] }
 0x132   : > { %1427 = vst [vmem:[%s2553_s25 + $0x840] sm:$0xff] %v403_v8  ;;  %v467_v8 = vld [vmem:[%s2544_s24 + $0xa40] sm:$0xff] }
 0x133   : > { %1428 = vst [vmem:[%s2553_s25 + $0x848] sm:$0xff] %v404_v9  ;;  %v468_v9 = vld [vmem:[%s2544_s24 + $0xa48] sm:$0xff] }
 0x134   : > { %1429 = vst [vmem:[%s2553_s25 + $0x850] sm:$0xff] %v405_v10  ;;  %v469_v10 = vld [vmem:[%s2544_s24 + $0xa50] sm:$0xff] }
 0x135   : > { %1430 = vst [vmem:[%s2553_s25 + $0x858] sm:$0xff] %v406_v11  ;;  %v470_v11 = vld [vmem:[%s2544_s24 + $0xa58] sm:$0xff] }
 0x136   : > { %1431 = vst [vmem:[%s2553_s25 + $0x860] sm:$0xff] %v407_v12  ;;  %v471_v12 = vld [vmem:[%s2544_s24 + $0xa60] sm:$0xff] }
 0x137   : > { %1432 = vst [vmem:[%s2553_s25 + $0x868] sm:$0xff] %v408_v13  ;;  %v472_v13 = vld [vmem:[%s2544_s24 + $0xa68] sm:$0xff] }
 0x138   : > { %1433 = vst [vmem:[%s2553_s25 + $0x870] sm:$0xff] %v409_v14  ;;  %v473_v14 = vld [vmem:[%s2544_s24 + $0xa70] sm:$0xff] }
 0x139   : > { %1434 = vst [vmem:[%s2553_s25 + $0x878] sm:$0xff] %v410_v15  ;;  %v474_v15 = vld [vmem:[%s2544_s24 + $0xa78] sm:$0xff] }
 0x13a   : > { %1435 = vst [vmem:[%s2553_s25 + $0x880] sm:$0xff] %v411_v16  ;;  %v475_v16 = vld [vmem:[%s2544_s24 + $0xa80] sm:$0xff] }
 0x13b   : > { %1436 = vst [vmem:[%s2553_s25 + $0x888] sm:$0xff] %v412_v17  ;;  %v476_v17 = vld [vmem:[%s2544_s24 + $0xa88] sm:$0xff] }
 0x13c   : > { %1437 = vst [vmem:[%s2553_s25 + $0x890] sm:$0xff] %v413_v18  ;;  %v477_v18 = vld [vmem:[%s2544_s24 + $0xa90] sm:$0xff] }
 0x13d   : > { %1438 = vst [vmem:[%s2553_s25 + $0x898] sm:$0xff] %v414_v19  ;;  %v478_v19 = vld [vmem:[%s2544_s24 + $0xa98] sm:$0xff] }
 0x13e   : > { %1439 = vst [vmem:[%s2553_s25 + $0x8a0] sm:$0xff] %v415_v20  ;;  %v479_v20 = vld [vmem:[%s2544_s24 + $0xaa0] sm:$0xff] }
 0x13f   : > { %1440 = vst [vmem:[%s2553_s25 + $0x8a8] sm:$0xff] %v416_v21  ;;  %v480_v21 = vld [vmem:[%s2544_s24 + $0xaa8] sm:$0xff] }
 0x140   : > { %1441 = vst [vmem:[%s2553_s25 + $0x8b0] sm:$0xff] %v417_v22  ;;  %v481_v22 = vld [vmem:[%s2544_s24 + $0xab0] sm:$0xff] }
 0x141   : > { %1442 = vst [vmem:[%s2553_s25 + $0x8b8] sm:$0xff] %v418_v23  ;;  %v482_v23 = vld [vmem:[%s2544_s24 + $0xab8] sm:$0xff] }
 0x142   : > { %1443 = vst [vmem:[%s2553_s25 + $0x8c0] sm:$0xff] %v419_v24  ;;  %v483_v24 = vld [vmem:[%s2544_s24 + $0xac0] sm:$0xff] }
 0x143   : > { %1444 = vst [vmem:[%s2553_s25 + $0x8c8] sm:$0xff] %v420_v25  ;;  %v484_v25 = vld [vmem:[%s2544_s24 + $0xac8] sm:$0xff] }
 0x144   : > { %1445 = vst [vmem:[%s2553_s25 + $0x8d0] sm:$0xff] %v421_v26  ;;  %v485_v26 = vld [vmem:[%s2544_s24 + $0xad0] sm:$0xff] }
 0x145   : > { %1446 = vst [vmem:[%s2553_s25 + $0x8d8] sm:$0xff] %v422_v27  ;;  %v486_v27 = vld [vmem:[%s2544_s24 + $0xad8] sm:$0xff] }
 0x146   : > { %1447 = vst [vmem:[%s2553_s25 + $0x8e0] sm:$0xff] %v423_v28  ;;  %v487_v28 = vld [vmem:[%s2544_s24 + $0xae0] sm:$0xff] }
 0x147   : > { %1448 = vst [vmem:[%s2553_s25 + $0x8e8] sm:$0xff] %v424_v29  ;;  %v488_v29 = vld [vmem:[%s2544_s24 + $0xae8] sm:$0xff] }
 0x148   : > { %1449 = vst [vmem:[%s2553_s25 + $0x8f0] sm:$0xff] %v425_v30  ;;  %v489_v30 = vld [vmem:[%s2544_s24 + $0xaf0] sm:$0xff] }
 0x149   : > { %1450 = vst [vmem:[%s2553_s25 + $0x8f8] sm:$0xff] %v426_v31  ;;  %v490_v31 = vld [vmem:[%s2544_s24 + $0xaf8] sm:$0xff] }
 0x14a   : > { %1451 = vst [vmem:[%s2553_s25 + $0x900] sm:$0xff] %v427_v32  ;;  %v491_v32 = vld [vmem:[%s2544_s24 + $0xb00] sm:$0xff] }
 0x14b   : > { %1452 = vst [vmem:[%s2553_s25 + $0x908] sm:$0xff] %v428_v33  ;;  %v492_v33 = vld [vmem:[%s2544_s24 + $0xb08] sm:$0xff] }
 0x14c   : > { %1453 = vst [vmem:[%s2553_s25 + $0x910] sm:$0xff] %v429_v34  ;;  %v493_v34 = vld [vmem:[%s2544_s24 + $0xb10] sm:$0xff] }
 0x14d   : > { %1454 = vst [vmem:[%s2553_s25 + $0x918] sm:$0xff] %v430_v35  ;;  %v494_v35 = vld [vmem:[%s2544_s24 + $0xb18] sm:$0xff] }
 0x14e   : > { %1455 = vst [vmem:[%s2553_s25 + $0x920] sm:$0xff] %v431_v36  ;;  %v495_v36 = vld [vmem:[%s2544_s24 + $0xb20] sm:$0xff] }
 0x14f   : > { %1456 = vst [vmem:[%s2553_s25 + $0x928] sm:$0xff] %v432_v37  ;;  %v496_v37 = vld [vmem:[%s2544_s24 + $0xb28] sm:$0xff] }
 0x150   : > { %1457 = vst [vmem:[%s2553_s25 + $0x930] sm:$0xff] %v433_v38  ;;  %v497_v38 = vld [vmem:[%s2544_s24 + $0xb30] sm:$0xff] }
 0x151   : > { %1458 = vst [vmem:[%s2553_s25 + $0x938] sm:$0xff] %v434_v39  ;;  %v498_v39 = vld [vmem:[%s2544_s24 + $0xb38] sm:$0xff] }
 0x152   : > { %1459 = vst [vmem:[%s2553_s25 + $0x940] sm:$0xff] %v435_v40  ;;  %v499_v40 = vld [vmem:[%s2544_s24 + $0xb40] sm:$0xff] }
 0x153   : > { %1460 = vst [vmem:[%s2553_s25 + $0x948] sm:$0xff] %v436_v41  ;;  %v500_v41 = vld [vmem:[%s2544_s24 + $0xb48] sm:$0xff] }
 0x154   : > { %1461 = vst [vmem:[%s2553_s25 + $0x950] sm:$0xff] %v437_v42  ;;  %v501_v42 = vld [vmem:[%s2544_s24 + $0xb50] sm:$0xff] }
 0x155   : > { %1462 = vst [vmem:[%s2553_s25 + $0x958] sm:$0xff] %v438_v43  ;;  %v502_v43 = vld [vmem:[%s2544_s24 + $0xb58] sm:$0xff] }
 0x156   : > { %1463 = vst [vmem:[%s2553_s25 + $0x960] sm:$0xff] %v439_v44  ;;  %v503_v44 = vld [vmem:[%s2544_s24 + $0xb60] sm:$0xff] }
 0x157   : > { %1464 = vst [vmem:[%s2553_s25 + $0x968] sm:$0xff] %v440_v45  ;;  %v504_v45 = vld [vmem:[%s2544_s24 + $0xb68] sm:$0xff] }
 0x158   : > { %1465 = vst [vmem:[%s2553_s25 + $0x970] sm:$0xff] %v441_v46  ;;  %v505_v46 = vld [vmem:[%s2544_s24 + $0xb70] sm:$0xff] }
 0x159   : > { %1466 = vst [vmem:[%s2553_s25 + $0x978] sm:$0xff] %v442_v47  ;;  %v506_v47 = vld [vmem:[%s2544_s24 + $0xb78] sm:$0xff] }
 0x15a   : > { %1467 = vst [vmem:[%s2553_s25 + $0x980] sm:$0xff] %v443_v48  ;;  %v507_v48 = vld [vmem:[%s2544_s24 + $0xb80] sm:$0xff] }
 0x15b   : > { %1468 = vst [vmem:[%s2553_s25 + $0x988] sm:$0xff] %v444_v49  ;;  %v508_v49 = vld [vmem:[%s2544_s24 + $0xb88] sm:$0xff] }
 0x15c   : > { %1469 = vst [vmem:[%s2553_s25 + $0x990] sm:$0xff] %v445_v50  ;;  %v509_v50 = vld [vmem:[%s2544_s24 + $0xb90] sm:$0xff] }
 0x15d   : > { %1470 = vst [vmem:[%s2553_s25 + $0x998] sm:$0xff] %v446_v51  ;;  %v510_v51 = vld [vmem:[%s2544_s24 + $0xb98] sm:$0xff] }
 0x15e   : > { %1471 = vst [vmem:[%s2553_s25 + $0x9a0] sm:$0xff] %v447_v52  ;;  %v511_v52 = vld [vmem:[%s2544_s24 + $0xba0] sm:$0xff] }
 0x15f   : > { %1472 = vst [vmem:[%s2553_s25 + $0x9a8] sm:$0xff] %v448_v53  ;;  %v512_v53 = vld [vmem:[%s2544_s24 + $0xba8] sm:$0xff] }
 0x160   : > { %1473 = vst [vmem:[%s2553_s25 + $0x9b0] sm:$0xff] %v449_v54  ;;  %v513_v54 = vld [vmem:[%s2544_s24 + $0xbb0] sm:$0xff] }
 0x161   : > { %1474 = vst [vmem:[%s2553_s25 + $0x9b8] sm:$0xff] %v450_v55  ;;  %v514_v55 = vld [vmem:[%s2544_s24 + $0xbb8] sm:$0xff] }
 0x162   : > { %1475 = vst [vmem:[%s2553_s25 + $0x9c0] sm:$0xff] %v451_v56  ;;  %v515_v56 = vld [vmem:[%s2544_s24 + $0xbc0] sm:$0xff] }
 0x163   : > { %1476 = vst [vmem:[%s2553_s25 + $0x9c8] sm:$0xff] %v452_v57  ;;  %v516_v57 = vld [vmem:[%s2544_s24 + $0xbc8] sm:$0xff] }
 0x164   : > { %1477 = vst [vmem:[%s2553_s25 + $0x9d0] sm:$0xff] %v453_v58  ;;  %v517_v58 = vld [vmem:[%s2544_s24 + $0xbd0] sm:$0xff] }
 0x165   : > { %1478 = vst [vmem:[%s2553_s25 + $0x9d8] sm:$0xff] %v454_v59  ;;  %v518_v59 = vld [vmem:[%s2544_s24 + $0xbd8] sm:$0xff] }
 0x166   : > { %1479 = vst [vmem:[%s2553_s25 + $0x9e0] sm:$0xff] %v455_v60  ;;  %v519_v60 = vld [vmem:[%s2544_s24 + $0xbe0] sm:$0xff] }
 0x167   : > { %1480 = vst [vmem:[%s2553_s25 + $0x9e8] sm:$0xff] %v456_v61  ;;  %v520_v61 = vld [vmem:[%s2544_s24 + $0xbe8] sm:$0xff] }
 0x168   : > { %1481 = vst [vmem:[%s2553_s25 + $0x9f0] sm:$0xff] %v457_v62  ;;  %v521_v62 = vld [vmem:[%s2544_s24 + $0xbf0] sm:$0xff] }
 0x169   : > { %1482 = vst [vmem:[%s2553_s25 + $0x9f8] sm:$0xff] %v458_v63  ;;  %v522_v63 = vld [vmem:[%s2544_s24 + $0xbf8] sm:$0xff] }
 0x16a   : > { %1483 = vst [vmem:[%s2553_s25 + $0xa00] sm:$0xff] %v459_v0  ;;  %v523_v0 = vld [vmem:[%s2544_s24 + $0xc00] sm:$0xff] }
 0x16b   : > { %1484 = vst [vmem:[%s2553_s25 + $0xa08] sm:$0xff] %v460_v1  ;;  %v524_v1 = vld [vmem:[%s2544_s24 + $0xc08] sm:$0xff] }
 0x16c   : > { %1485 = vst [vmem:[%s2553_s25 + $0xa10] sm:$0xff] %v461_v2  ;;  %v525_v2 = vld [vmem:[%s2544_s24 + $0xc10] sm:$0xff] }
 0x16d   : > { %1486 = vst [vmem:[%s2553_s25 + $0xa18] sm:$0xff] %v462_v3  ;;  %v526_v3 = vld [vmem:[%s2544_s24 + $0xc18] sm:$0xff] }
 0x16e   : > { %1487 = vst [vmem:[%s2553_s25 + $0xa20] sm:$0xff] %v463_v4  ;;  %v527_v4 = vld [vmem:[%s2544_s24 + $0xc20] sm:$0xff] }
 0x16f   : > { %1488 = vst [vmem:[%s2553_s25 + $0xa28] sm:$0xff] %v464_v5  ;;  %v528_v5 = vld [vmem:[%s2544_s24 + $0xc28] sm:$0xff] }
 0x170   : > { %1489 = vst [vmem:[%s2553_s25 + $0xa30] sm:$0xff] %v465_v6  ;;  %v529_v6 = vld [vmem:[%s2544_s24 + $0xc30] sm:$0xff] }
 0x171   : > { %1490 = vst [vmem:[%s2553_s25 + $0xa38] sm:$0xff] %v466_v7  ;;  %v530_v7 = vld [vmem:[%s2544_s24 + $0xc38] sm:$0xff] }
 0x172   : > { %1491 = vst [vmem:[%s2553_s25 + $0xa40] sm:$0xff] %v467_v8  ;;  %v531_v8 = vld [vmem:[%s2544_s24 + $0xc40] sm:$0xff] }
 0x173   : > { %1492 = vst [vmem:[%s2553_s25 + $0xa48] sm:$0xff] %v468_v9  ;;  %v532_v9 = vld [vmem:[%s2544_s24 + $0xc48] sm:$0xff] }
 0x174   : > { %1493 = vst [vmem:[%s2553_s25 + $0xa50] sm:$0xff] %v469_v10  ;;  %v533_v10 = vld [vmem:[%s2544_s24 + $0xc50] sm:$0xff] }
 0x175   : > { %1494 = vst [vmem:[%s2553_s25 + $0xa58] sm:$0xff] %v470_v11  ;;  %v534_v11 = vld [vmem:[%s2544_s24 + $0xc58] sm:$0xff] }
 0x176   : > { %1495 = vst [vmem:[%s2553_s25 + $0xa60] sm:$0xff] %v471_v12  ;;  %v535_v12 = vld [vmem:[%s2544_s24 + $0xc60] sm:$0xff] }
 0x177   : > { %1496 = vst [vmem:[%s2553_s25 + $0xa68] sm:$0xff] %v472_v13  ;;  %v536_v13 = vld [vmem:[%s2544_s24 + $0xc68] sm:$0xff] }
 0x178   : > { %1497 = vst [vmem:[%s2553_s25 + $0xa70] sm:$0xff] %v473_v14  ;;  %v537_v14 = vld [vmem:[%s2544_s24 + $0xc70] sm:$0xff] }
 0x179   : > { %1498 = vst [vmem:[%s2553_s25 + $0xa78] sm:$0xff] %v474_v15  ;;  %v538_v15 = vld [vmem:[%s2544_s24 + $0xc78] sm:$0xff] }
 0x17a   : > { %1499 = vst [vmem:[%s2553_s25 + $0xa80] sm:$0xff] %v475_v16  ;;  %v539_v16 = vld [vmem:[%s2544_s24 + $0xc80] sm:$0xff] }
 0x17b   : > { %1500 = vst [vmem:[%s2553_s25 + $0xa88] sm:$0xff] %v476_v17  ;;  %v540_v17 = vld [vmem:[%s2544_s24 + $0xc88] sm:$0xff] }
 0x17c   : > { %1501 = vst [vmem:[%s2553_s25 + $0xa90] sm:$0xff] %v477_v18  ;;  %v541_v18 = vld [vmem:[%s2544_s24 + $0xc90] sm:$0xff] }
 0x17d   : > { %1502 = vst [vmem:[%s2553_s25 + $0xa98] sm:$0xff] %v478_v19  ;;  %v542_v19 = vld [vmem:[%s2544_s24 + $0xc98] sm:$0xff] }
 0x17e   : > { %1503 = vst [vmem:[%s2553_s25 + $0xaa0] sm:$0xff] %v479_v20  ;;  %v543_v20 = vld [vmem:[%s2544_s24 + $0xca0] sm:$0xff] }
 0x17f   : > { %1504 = vst [vmem:[%s2553_s25 + $0xaa8] sm:$0xff] %v480_v21  ;;  %v544_v21 = vld [vmem:[%s2544_s24 + $0xca8] sm:$0xff] }
 0x180   : > { %1505 = vst [vmem:[%s2553_s25 + $0xab0] sm:$0xff] %v481_v22  ;;  %v545_v22 = vld [vmem:[%s2544_s24 + $0xcb0] sm:$0xff] }
 0x181   : > { %1506 = vst [vmem:[%s2553_s25 + $0xab8] sm:$0xff] %v482_v23  ;;  %v546_v23 = vld [vmem:[%s2544_s24 + $0xcb8] sm:$0xff] }
 0x182   : > { %1507 = vst [vmem:[%s2553_s25 + $0xac0] sm:$0xff] %v483_v24  ;;  %v547_v24 = vld [vmem:[%s2544_s24 + $0xcc0] sm:$0xff] }
 0x183   : > { %1508 = vst [vmem:[%s2553_s25 + $0xac8] sm:$0xff] %v484_v25  ;;  %v548_v25 = vld [vmem:[%s2544_s24 + $0xcc8] sm:$0xff] }
 0x184   : > { %1509 = vst [vmem:[%s2553_s25 + $0xad0] sm:$0xff] %v485_v26  ;;  %v549_v26 = vld [vmem:[%s2544_s24 + $0xcd0] sm:$0xff] }
 0x185   : > { %1510 = vst [vmem:[%s2553_s25 + $0xad8] sm:$0xff] %v486_v27  ;;  %v550_v27 = vld [vmem:[%s2544_s24 + $0xcd8] sm:$0xff] }
 0x186   : > { %1511 = vst [vmem:[%s2553_s25 + $0xae0] sm:$0xff] %v487_v28  ;;  %v551_v28 = vld [vmem:[%s2544_s24 + $0xce0] sm:$0xff] }
 0x187   : > { %1512 = vst [vmem:[%s2553_s25 + $0xae8] sm:$0xff] %v488_v29  ;;  %v552_v29 = vld [vmem:[%s2544_s24 + $0xce8] sm:$0xff] }
 0x188   : > { %1513 = vst [vmem:[%s2553_s25 + $0xaf0] sm:$0xff] %v489_v30  ;;  %v553_v30 = vld [vmem:[%s2544_s24 + $0xcf0] sm:$0xff] }
 0x189   : > { %1514 = vst [vmem:[%s2553_s25 + $0xaf8] sm:$0xff] %v490_v31  ;;  %v554_v31 = vld [vmem:[%s2544_s24 + $0xcf8] sm:$0xff] }
 0x18a   : > { %1515 = vst [vmem:[%s2553_s25 + $0xb00] sm:$0xff] %v491_v32  ;;  %v555_v32 = vld [vmem:[%s2544_s24 + $0xd00] sm:$0xff] }
 0x18b   : > { %1516 = vst [vmem:[%s2553_s25 + $0xb08] sm:$0xff] %v492_v33  ;;  %v556_v33 = vld [vmem:[%s2544_s24 + $0xd08] sm:$0xff] }
 0x18c   : > { %1517 = vst [vmem:[%s2553_s25 + $0xb10] sm:$0xff] %v493_v34  ;;  %v557_v34 = vld [vmem:[%s2544_s24 + $0xd10] sm:$0xff] }
 0x18d   : > { %1518 = vst [vmem:[%s2553_s25 + $0xb18] sm:$0xff] %v494_v35  ;;  %v558_v35 = vld [vmem:[%s2544_s24 + $0xd18] sm:$0xff] }
 0x18e   : > { %1519 = vst [vmem:[%s2553_s25 + $0xb20] sm:$0xff] %v495_v36  ;;  %v559_v36 = vld [vmem:[%s2544_s24 + $0xd20] sm:$0xff] }
 0x18f   : > { %1520 = vst [vmem:[%s2553_s25 + $0xb28] sm:$0xff] %v496_v37  ;;  %v560_v37 = vld [vmem:[%s2544_s24 + $0xd28] sm:$0xff] }
 0x190   : > { %1521 = vst [vmem:[%s2553_s25 + $0xb30] sm:$0xff] %v497_v38  ;;  %v561_v38 = vld [vmem:[%s2544_s24 + $0xd30] sm:$0xff] }
 0x191   : > { %1522 = vst [vmem:[%s2553_s25 + $0xb38] sm:$0xff] %v498_v39  ;;  %v562_v39 = vld [vmem:[%s2544_s24 + $0xd38] sm:$0xff] }
 0x192   : > { %1523 = vst [vmem:[%s2553_s25 + $0xb40] sm:$0xff] %v499_v40  ;;  %v563_v40 = vld [vmem:[%s2544_s24 + $0xd40] sm:$0xff] }
 0x193   : > { %1524 = vst [vmem:[%s2553_s25 + $0xb48] sm:$0xff] %v500_v41  ;;  %v564_v41 = vld [vmem:[%s2544_s24 + $0xd48] sm:$0xff] }
 0x194   : > { %1525 = vst [vmem:[%s2553_s25 + $0xb50] sm:$0xff] %v501_v42  ;;  %v565_v42 = vld [vmem:[%s2544_s24 + $0xd50] sm:$0xff] }
 0x195   : > { %1526 = vst [vmem:[%s2553_s25 + $0xb58] sm:$0xff] %v502_v43  ;;  %v566_v43 = vld [vmem:[%s2544_s24 + $0xd58] sm:$0xff] }
 0x196   : > { %1527 = vst [vmem:[%s2553_s25 + $0xb60] sm:$0xff] %v503_v44  ;;  %v567_v44 = vld [vmem:[%s2544_s24 + $0xd60] sm:$0xff] }
 0x197   : > { %1528 = vst [vmem:[%s2553_s25 + $0xb68] sm:$0xff] %v504_v45  ;;  %v568_v45 = vld [vmem:[%s2544_s24 + $0xd68] sm:$0xff] }
 0x198   : > { %1529 = vst [vmem:[%s2553_s25 + $0xb70] sm:$0xff] %v505_v46  ;;  %v569_v46 = vld [vmem:[%s2544_s24 + $0xd70] sm:$0xff] }
 0x199   : > { %1530 = vst [vmem:[%s2553_s25 + $0xb78] sm:$0xff] %v506_v47  ;;  %v570_v47 = vld [vmem:[%s2544_s24 + $0xd78] sm:$0xff] }
 0x19a   : > { %1531 = vst [vmem:[%s2553_s25 + $0xb80] sm:$0xff] %v507_v48  ;;  %v571_v48 = vld [vmem:[%s2544_s24 + $0xd80] sm:$0xff] }
 0x19b   : > { %1532 = vst [vmem:[%s2553_s25 + $0xb88] sm:$0xff] %v508_v49  ;;  %v572_v49 = vld [vmem:[%s2544_s24 + $0xd88] sm:$0xff] }
 0x19c   : > { %1533 = vst [vmem:[%s2553_s25 + $0xb90] sm:$0xff] %v509_v50  ;;  %v573_v50 = vld [vmem:[%s2544_s24 + $0xd90] sm:$0xff] }
 0x19d   : > { %1534 = vst [vmem:[%s2553_s25 + $0xb98] sm:$0xff] %v510_v51  ;;  %v574_v51 = vld [vmem:[%s2544_s24 + $0xd98] sm:$0xff] }
 0x19e   : > { %1535 = vst [vmem:[%s2553_s25 + $0xba0] sm:$0xff] %v511_v52  ;;  %v575_v52 = vld [vmem:[%s2544_s24 + $0xda0] sm:$0xff] }
 0x19f   : > { %1536 = vst [vmem:[%s2553_s25 + $0xba8] sm:$0xff] %v512_v53  ;;  %v576_v53 = vld [vmem:[%s2544_s24 + $0xda8] sm:$0xff] }
 0x1a0   : > { %1537 = vst [vmem:[%s2553_s25 + $0xbb0] sm:$0xff] %v513_v54  ;;  %v577_v54 = vld [vmem:[%s2544_s24 + $0xdb0] sm:$0xff] }
 0x1a1   : > { %1538 = vst [vmem:[%s2553_s25 + $0xbb8] sm:$0xff] %v514_v55  ;;  %v578_v55 = vld [vmem:[%s2544_s24 + $0xdb8] sm:$0xff] }
 0x1a2   : > { %1539 = vst [vmem:[%s2553_s25 + $0xbc0] sm:$0xff] %v515_v56  ;;  %v579_v56 = vld [vmem:[%s2544_s24 + $0xdc0] sm:$0xff] }
 0x1a3   : > { %1540 = vst [vmem:[%s2553_s25 + $0xbc8] sm:$0xff] %v516_v57  ;;  %v580_v57 = vld [vmem:[%s2544_s24 + $0xdc8] sm:$0xff] }
 0x1a4   : > { %1541 = vst [vmem:[%s2553_s25 + $0xbd0] sm:$0xff] %v517_v58  ;;  %v581_v58 = vld [vmem:[%s2544_s24 + $0xdd0] sm:$0xff] }
 0x1a5   : > { %1542 = vst [vmem:[%s2553_s25 + $0xbd8] sm:$0xff] %v518_v59  ;;  %v582_v59 = vld [vmem:[%s2544_s24 + $0xdd8] sm:$0xff] }
 0x1a6   : > { %1543 = vst [vmem:[%s2553_s25 + $0xbe0] sm:$0xff] %v519_v60  ;;  %v583_v60 = vld [vmem:[%s2544_s24 + $0xde0] sm:$0xff] }
 0x1a7   : > { %1544 = vst [vmem:[%s2553_s25 + $0xbe8] sm:$0xff] %v520_v61  ;;  %v584_v61 = vld [vmem:[%s2544_s24 + $0xde8] sm:$0xff] }
 0x1a8   : > { %1545 = vst [vmem:[%s2553_s25 + $0xbf0] sm:$0xff] %v521_v62  ;;  %v585_v62 = vld [vmem:[%s2544_s24 + $0xdf0] sm:$0xff] }
 0x1a9   : > { %1546 = vst [vmem:[%s2553_s25 + $0xbf8] sm:$0xff] %v522_v63  ;;  %v586_v63 = vld [vmem:[%s2544_s24 + $0xdf8] sm:$0xff] }
 0x1aa   : > { %1547 = vst [vmem:[%s2553_s25 + $0xc00] sm:$0xff] %v523_v0  ;;  %v587_v0 = vld [vmem:[%s2544_s24 + $0xe00] sm:$0xff] }
 0x1ab   : > { %1548 = vst [vmem:[%s2553_s25 + $0xc08] sm:$0xff] %v524_v1  ;;  %v588_v1 = vld [vmem:[%s2544_s24 + $0xe08] sm:$0xff] }
 0x1ac   : > { %1549 = vst [vmem:[%s2553_s25 + $0xc10] sm:$0xff] %v525_v2  ;;  %v589_v2 = vld [vmem:[%s2544_s24 + $0xe10] sm:$0xff] }
 0x1ad   : > { %1550 = vst [vmem:[%s2553_s25 + $0xc18] sm:$0xff] %v526_v3  ;;  %v590_v3 = vld [vmem:[%s2544_s24 + $0xe18] sm:$0xff] }
 0x1ae   : > { %1551 = vst [vmem:[%s2553_s25 + $0xc20] sm:$0xff] %v527_v4  ;;  %v591_v4 = vld [vmem:[%s2544_s24 + $0xe20] sm:$0xff] }
 0x1af   : > { %1552 = vst [vmem:[%s2553_s25 + $0xc28] sm:$0xff] %v528_v5  ;;  %v592_v5 = vld [vmem:[%s2544_s24 + $0xe28] sm:$0xff] }
 0x1b0   : > { %1553 = vst [vmem:[%s2553_s25 + $0xc30] sm:$0xff] %v529_v6  ;;  %v593_v6 = vld [vmem:[%s2544_s24 + $0xe30] sm:$0xff] }
 0x1b1   : > { %1554 = vst [vmem:[%s2553_s25 + $0xc38] sm:$0xff] %v530_v7  ;;  %v594_v7 = vld [vmem:[%s2544_s24 + $0xe38] sm:$0xff] }
 0x1b2   : > { %1555 = vst [vmem:[%s2553_s25 + $0xc40] sm:$0xff] %v531_v8  ;;  %v595_v8 = vld [vmem:[%s2544_s24 + $0xe40] sm:$0xff] }
 0x1b3   : > { %1556 = vst [vmem:[%s2553_s25 + $0xc48] sm:$0xff] %v532_v9  ;;  %v596_v9 = vld [vmem:[%s2544_s24 + $0xe48] sm:$0xff] }
 0x1b4   : > { %1557 = vst [vmem:[%s2553_s25 + $0xc50] sm:$0xff] %v533_v10  ;;  %v597_v10 = vld [vmem:[%s2544_s24 + $0xe50] sm:$0xff] }
 0x1b5   : > { %1558 = vst [vmem:[%s2553_s25 + $0xc58] sm:$0xff] %v534_v11  ;;  %v598_v11 = vld [vmem:[%s2544_s24 + $0xe58] sm:$0xff] }
 0x1b6   : > { %1559 = vst [vmem:[%s2553_s25 + $0xc60] sm:$0xff] %v535_v12  ;;  %v599_v12 = vld [vmem:[%s2544_s24 + $0xe60] sm:$0xff] }
 0x1b7   : > { %1560 = vst [vmem:[%s2553_s25 + $0xc68] sm:$0xff] %v536_v13  ;;  %v600_v13 = vld [vmem:[%s2544_s24 + $0xe68] sm:$0xff] }
 0x1b8   : > { %1561 = vst [vmem:[%s2553_s25 + $0xc70] sm:$0xff] %v537_v14  ;;  %v601_v14 = vld [vmem:[%s2544_s24 + $0xe70] sm:$0xff] }
 0x1b9   : > { %1562 = vst [vmem:[%s2553_s25 + $0xc78] sm:$0xff] %v538_v15  ;;  %v602_v15 = vld [vmem:[%s2544_s24 + $0xe78] sm:$0xff] }
 0x1ba   : > { %1563 = vst [vmem:[%s2553_s25 + $0xc80] sm:$0xff] %v539_v16  ;;  %v603_v16 = vld [vmem:[%s2544_s24 + $0xe80] sm:$0xff] }
 0x1bb   : > { %1564 = vst [vmem:[%s2553_s25 + $0xc88] sm:$0xff] %v540_v17  ;;  %v604_v17 = vld [vmem:[%s2544_s24 + $0xe88] sm:$0xff] }
 0x1bc   : > { %1565 = vst [vmem:[%s2553_s25 + $0xc90] sm:$0xff] %v541_v18  ;;  %v605_v18 = vld [vmem:[%s2544_s24 + $0xe90] sm:$0xff] }
 0x1bd   : > { %1566 = vst [vmem:[%s2553_s25 + $0xc98] sm:$0xff] %v542_v19  ;;  %v606_v19 = vld [vmem:[%s2544_s24 + $0xe98] sm:$0xff] }
 0x1be   : > { %1567 = vst [vmem:[%s2553_s25 + $0xca0] sm:$0xff] %v543_v20  ;;  %v607_v20 = vld [vmem:[%s2544_s24 + $0xea0] sm:$0xff] }
 0x1bf   : > { %1568 = vst [vmem:[%s2553_s25 + $0xca8] sm:$0xff] %v544_v21  ;;  %v608_v21 = vld [vmem:[%s2544_s24 + $0xea8] sm:$0xff] }
 0x1c0   : > { %1569 = vst [vmem:[%s2553_s25 + $0xcb0] sm:$0xff] %v545_v22  ;;  %v609_v22 = vld [vmem:[%s2544_s24 + $0xeb0] sm:$0xff] }
 0x1c1   : > { %1570 = vst [vmem:[%s2553_s25 + $0xcb8] sm:$0xff] %v546_v23  ;;  %v610_v23 = vld [vmem:[%s2544_s24 + $0xeb8] sm:$0xff] }
 0x1c2   : > { %1571 = vst [vmem:[%s2553_s25 + $0xcc0] sm:$0xff] %v547_v24  ;;  %v611_v24 = vld [vmem:[%s2544_s24 + $0xec0] sm:$0xff] }
 0x1c3   : > { %1572 = vst [vmem:[%s2553_s25 + $0xcc8] sm:$0xff] %v548_v25  ;;  %v612_v25 = vld [vmem:[%s2544_s24 + $0xec8] sm:$0xff] }
 0x1c4   : > { %1573 = vst [vmem:[%s2553_s25 + $0xcd0] sm:$0xff] %v549_v26  ;;  %v613_v26 = vld [vmem:[%s2544_s24 + $0xed0] sm:$0xff] }
 0x1c5   : > { %1574 = vst [vmem:[%s2553_s25 + $0xcd8] sm:$0xff] %v550_v27  ;;  %v614_v27 = vld [vmem:[%s2544_s24 + $0xed8] sm:$0xff] }
 0x1c6   : > { %1575 = vst [vmem:[%s2553_s25 + $0xce0] sm:$0xff] %v551_v28  ;;  %v615_v28 = vld [vmem:[%s2544_s24 + $0xee0] sm:$0xff] }
 0x1c7   : > { %1576 = vst [vmem:[%s2553_s25 + $0xce8] sm:$0xff] %v552_v29  ;;  %v616_v29 = vld [vmem:[%s2544_s24 + $0xee8] sm:$0xff] }
 0x1c8   : > { %1577 = vst [vmem:[%s2553_s25 + $0xcf0] sm:$0xff] %v553_v30  ;;  %v617_v30 = vld [vmem:[%s2544_s24 + $0xef0] sm:$0xff] }
 0x1c9   : > { %1578 = vst [vmem:[%s2553_s25 + $0xcf8] sm:$0xff] %v554_v31  ;;  %v618_v31 = vld [vmem:[%s2544_s24 + $0xef8] sm:$0xff] }
 0x1ca   : > { %1579 = vst [vmem:[%s2553_s25 + $0xd00] sm:$0xff] %v555_v32  ;;  %v619_v32 = vld [vmem:[%s2544_s24 + $0xf00] sm:$0xff] }
 0x1cb   : > { %1580 = vst [vmem:[%s2553_s25 + $0xd08] sm:$0xff] %v556_v33  ;;  %v620_v33 = vld [vmem:[%s2544_s24 + $0xf08] sm:$0xff] }
 0x1cc   : > { %1581 = vst [vmem:[%s2553_s25 + $0xd10] sm:$0xff] %v557_v34  ;;  %v621_v34 = vld [vmem:[%s2544_s24 + $0xf10] sm:$0xff] }
 0x1cd   : > { %1582 = vst [vmem:[%s2553_s25 + $0xd18] sm:$0xff] %v558_v35  ;;  %v622_v35 = vld [vmem:[%s2544_s24 + $0xf18] sm:$0xff] }
 0x1ce   : > { %1583 = vst [vmem:[%s2553_s25 + $0xd20] sm:$0xff] %v559_v36  ;;  %v623_v36 = vld [vmem:[%s2544_s24 + $0xf20] sm:$0xff] }
 0x1cf   : > { %1584 = vst [vmem:[%s2553_s25 + $0xd28] sm:$0xff] %v560_v37  ;;  %v624_v37 = vld [vmem:[%s2544_s24 + $0xf28] sm:$0xff] }
 0x1d0   : > { %1585 = vst [vmem:[%s2553_s25 + $0xd30] sm:$0xff] %v561_v38  ;;  %v625_v38 = vld [vmem:[%s2544_s24 + $0xf30] sm:$0xff] }
 0x1d1   : > { %1586 = vst [vmem:[%s2553_s25 + $0xd38] sm:$0xff] %v562_v39  ;;  %v626_v39 = vld [vmem:[%s2544_s24 + $0xf38] sm:$0xff] }
 0x1d2   : > { %1587 = vst [vmem:[%s2553_s25 + $0xd40] sm:$0xff] %v563_v40  ;;  %v627_v40 = vld [vmem:[%s2544_s24 + $0xf40] sm:$0xff] }
 0x1d3   : > { %1588 = vst [vmem:[%s2553_s25 + $0xd48] sm:$0xff] %v564_v41  ;;  %v628_v41 = vld [vmem:[%s2544_s24 + $0xf48] sm:$0xff] }
 0x1d4   : > { %1589 = vst [vmem:[%s2553_s25 + $0xd50] sm:$0xff] %v565_v42  ;;  %v629_v42 = vld [vmem:[%s2544_s24 + $0xf50] sm:$0xff] }
 0x1d5   : > { %1590 = vst [vmem:[%s2553_s25 + $0xd58] sm:$0xff] %v566_v43  ;;  %v630_v43 = vld [vmem:[%s2544_s24 + $0xf58] sm:$0xff] }
 0x1d6   : > { %1591 = vst [vmem:[%s2553_s25 + $0xd60] sm:$0xff] %v567_v44  ;;  %v631_v44 = vld [vmem:[%s2544_s24 + $0xf60] sm:$0xff] }
 0x1d7   : > { %1592 = vst [vmem:[%s2553_s25 + $0xd68] sm:$0xff] %v568_v45  ;;  %v632_v45 = vld [vmem:[%s2544_s24 + $0xf68] sm:$0xff] }
 0x1d8   : > { %1593 = vst [vmem:[%s2553_s25 + $0xd70] sm:$0xff] %v569_v46  ;;  %v633_v46 = vld [vmem:[%s2544_s24 + $0xf70] sm:$0xff] }
 0x1d9   : > { %1594 = vst [vmem:[%s2553_s25 + $0xd78] sm:$0xff] %v570_v47  ;;  %v634_v47 = vld [vmem:[%s2544_s24 + $0xf78] sm:$0xff] }
 0x1da   : > { %1595 = vst [vmem:[%s2553_s25 + $0xd80] sm:$0xff] %v571_v48  ;;  %v635_v48 = vld [vmem:[%s2544_s24 + $0xf80] sm:$0xff] }
 0x1db   : > { %1596 = vst [vmem:[%s2553_s25 + $0xd88] sm:$0xff] %v572_v49  ;;  %v636_v49 = vld [vmem:[%s2544_s24 + $0xf88] sm:$0xff] }
 0x1dc   : > { %1597 = vst [vmem:[%s2553_s25 + $0xd90] sm:$0xff] %v573_v50  ;;  %v637_v50 = vld [vmem:[%s2544_s24 + $0xf90] sm:$0xff] }
 0x1dd   : > { %1598 = vst [vmem:[%s2553_s25 + $0xd98] sm:$0xff] %v574_v51  ;;  %v638_v51 = vld [vmem:[%s2544_s24 + $0xf98] sm:$0xff] }
 0x1de   : > { %1599 = vst [vmem:[%s2553_s25 + $0xda0] sm:$0xff] %v575_v52  ;;  %v639_v52 = vld [vmem:[%s2544_s24 + $0xfa0] sm:$0xff] }
 0x1df   : > { %1600 = vst [vmem:[%s2553_s25 + $0xda8] sm:$0xff] %v576_v53  ;;  %v640_v53 = vld [vmem:[%s2544_s24 + $0xfa8] sm:$0xff] }
 0x1e0   : > { %1601 = vst [vmem:[%s2553_s25 + $0xdb0] sm:$0xff] %v577_v54  ;;  %v641_v54 = vld [vmem:[%s2544_s24 + $0xfb0] sm:$0xff] }
 0x1e1   : > { %1602 = vst [vmem:[%s2553_s25 + $0xdb8] sm:$0xff] %v578_v55  ;;  %v642_v55 = vld [vmem:[%s2544_s24 + $0xfb8] sm:$0xff] }
 0x1e2   : > { %1603 = vst [vmem:[%s2553_s25 + $0xdc0] sm:$0xff] %v579_v56  ;;  %v643_v56 = vld [vmem:[%s2544_s24 + $0xfc0] sm:$0xff] }
 0x1e3   : > { %1604 = vst [vmem:[%s2553_s25 + $0xdc8] sm:$0xff] %v580_v57  ;;  %v644_v57 = vld [vmem:[%s2544_s24 + $0xfc8] sm:$0xff] }
 0x1e4   : > { %1605 = vst [vmem:[%s2553_s25 + $0xdd0] sm:$0xff] %v581_v58  ;;  %v645_v58 = vld [vmem:[%s2544_s24 + $0xfd0] sm:$0xff] }
 0x1e5   : > { %1606 = vst [vmem:[%s2553_s25 + $0xdd8] sm:$0xff] %v582_v59  ;;  %v646_v59 = vld [vmem:[%s2544_s24 + $0xfd8] sm:$0xff] }
 0x1e6   : > { %1607 = vst [vmem:[%s2553_s25 + $0xde0] sm:$0xff] %v583_v60  ;;  %v647_v60 = vld [vmem:[%s2544_s24 + $0xfe0] sm:$0xff] }
 0x1e7   : > { %1608 = vst [vmem:[%s2553_s25 + $0xde8] sm:$0xff] %v584_v61  ;;  %v648_v61 = vld [vmem:[%s2544_s24 + $0xfe8] sm:$0xff] }
 0x1e8   : > { %1609 = vst [vmem:[%s2553_s25 + $0xdf0] sm:$0xff] %v585_v62  ;;  %v649_v62 = vld [vmem:[%s2544_s24 + $0xff0] sm:$0xff] }
 0x1e9   : > { %1610 = vst [vmem:[%s2553_s25 + $0xdf8] sm:$0xff] %v586_v63  ;;  %v650_v63 = vld [vmem:[%s2544_s24 + $0xff8] sm:$0xff] }
 0x1ea   : > { %1611 = vst [vmem:[%s2553_s25 + $0xe00] sm:$0xff] %v587_v0  ;;  %v651_v0 = vld [vmem:[%s2544_s24 + $0x1000] sm:$0xff] }
 0x1eb   : > { %1612 = vst [vmem:[%s2553_s25 + $0xe08] sm:$0xff] %v588_v1  ;;  %v652_v1 = vld [vmem:[%s2544_s24 + $0x1008] sm:$0xff] }
 0x1ec   : > { %1613 = vst [vmem:[%s2553_s25 + $0xe10] sm:$0xff] %v589_v2  ;;  %v653_v2 = vld [vmem:[%s2544_s24 + $0x1010] sm:$0xff] }
 0x1ed   : > { %1614 = vst [vmem:[%s2553_s25 + $0xe18] sm:$0xff] %v590_v3  ;;  %v654_v3 = vld [vmem:[%s2544_s24 + $0x1018] sm:$0xff] }
 0x1ee   : > { %1615 = vst [vmem:[%s2553_s25 + $0xe20] sm:$0xff] %v591_v4  ;;  %v655_v4 = vld [vmem:[%s2544_s24 + $0x1020] sm:$0xff] }
 0x1ef   : > { %1616 = vst [vmem:[%s2553_s25 + $0xe28] sm:$0xff] %v592_v5  ;;  %v656_v5 = vld [vmem:[%s2544_s24 + $0x1028] sm:$0xff] }
 0x1f0   : > { %1617 = vst [vmem:[%s2553_s25 + $0xe30] sm:$0xff] %v593_v6  ;;  %v657_v6 = vld [vmem:[%s2544_s24 + $0x1030] sm:$0xff] }
 0x1f1   : > { %1618 = vst [vmem:[%s2553_s25 + $0xe38] sm:$0xff] %v594_v7  ;;  %v658_v7 = vld [vmem:[%s2544_s24 + $0x1038] sm:$0xff] }
 0x1f2   : > { %1619 = vst [vmem:[%s2553_s25 + $0xe40] sm:$0xff] %v595_v8  ;;  %v659_v8 = vld [vmem:[%s2544_s24 + $0x1040] sm:$0xff] }
 0x1f3   : > { %1620 = vst [vmem:[%s2553_s25 + $0xe48] sm:$0xff] %v596_v9  ;;  %v660_v9 = vld [vmem:[%s2544_s24 + $0x1048] sm:$0xff] }
 0x1f4   : > { %1621 = vst [vmem:[%s2553_s25 + $0xe50] sm:$0xff] %v597_v10  ;;  %v661_v10 = vld [vmem:[%s2544_s24 + $0x1050] sm:$0xff] }
 0x1f5   : > { %1622 = vst [vmem:[%s2553_s25 + $0xe58] sm:$0xff] %v598_v11  ;;  %v662_v11 = vld [vmem:[%s2544_s24 + $0x1058] sm:$0xff] }
 0x1f6   : > { %1623 = vst [vmem:[%s2553_s25 + $0xe60] sm:$0xff] %v599_v12  ;;  %v663_v12 = vld [vmem:[%s2544_s24 + $0x1060] sm:$0xff] }
 0x1f7   : > { %1624 = vst [vmem:[%s2553_s25 + $0xe68] sm:$0xff] %v600_v13  ;;  %v664_v13 = vld [vmem:[%s2544_s24 + $0x1068] sm:$0xff] }
 0x1f8   : > { %1625 = vst [vmem:[%s2553_s25 + $0xe70] sm:$0xff] %v601_v14  ;;  %v665_v14 = vld [vmem:[%s2544_s24 + $0x1070] sm:$0xff] }
 0x1f9   : > { %1626 = vst [vmem:[%s2553_s25 + $0xe78] sm:$0xff] %v602_v15  ;;  %v666_v15 = vld [vmem:[%s2544_s24 + $0x1078] sm:$0xff] }
 0x1fa   : > { %1627 = vst [vmem:[%s2553_s25 + $0xe80] sm:$0xff] %v603_v16  ;;  %v667_v16 = vld [vmem:[%s2544_s24 + $0x1080] sm:$0xff] }
 0x1fb   : > { %1628 = vst [vmem:[%s2553_s25 + $0xe88] sm:$0xff] %v604_v17  ;;  %v668_v17 = vld [vmem:[%s2544_s24 + $0x1088] sm:$0xff] }
 0x1fc   : > { %1629 = vst [vmem:[%s2553_s25 + $0xe90] sm:$0xff] %v605_v18  ;;  %v669_v18 = vld [vmem:[%s2544_s24 + $0x1090] sm:$0xff] }
 0x1fd   : > { %1630 = vst [vmem:[%s2553_s25 + $0xe98] sm:$0xff] %v606_v19  ;;  %v670_v19 = vld [vmem:[%s2544_s24 + $0x1098] sm:$0xff] }
 0x1fe   : > { %1631 = vst [vmem:[%s2553_s25 + $0xea0] sm:$0xff] %v607_v20  ;;  %v671_v20 = vld [vmem:[%s2544_s24 + $0x10a0] sm:$0xff] }
 0x1ff   : > { %1632 = vst [vmem:[%s2553_s25 + $0xea8] sm:$0xff] %v608_v21  ;;  %v672_v21 = vld [vmem:[%s2544_s24 + $0x10a8] sm:$0xff] }
 0x200   : > { %1633 = vst [vmem:[%s2553_s25 + $0xeb0] sm:$0xff] %v609_v22  ;;  %v673_v22 = vld [vmem:[%s2544_s24 + $0x10b0] sm:$0xff] }
 0x201   : > { %1634 = vst [vmem:[%s2553_s25 + $0xeb8] sm:$0xff] %v610_v23  ;;  %v674_v23 = vld [vmem:[%s2544_s24 + $0x10b8] sm:$0xff] }
 0x202   : > { %1635 = vst [vmem:[%s2553_s25 + $0xec0] sm:$0xff] %v611_v24  ;;  %v675_v24 = vld [vmem:[%s2544_s24 + $0x10c0] sm:$0xff] }
 0x203   : > { %1636 = vst [vmem:[%s2553_s25 + $0xec8] sm:$0xff] %v612_v25  ;;  %v676_v25 = vld [vmem:[%s2544_s24 + $0x10c8] sm:$0xff] }
 0x204   : > { %1637 = vst [vmem:[%s2553_s25 + $0xed0] sm:$0xff] %v613_v26  ;;  %v677_v26 = vld [vmem:[%s2544_s24 + $0x10d0] sm:$0xff] }
 0x205   : > { %1638 = vst [vmem:[%s2553_s25 + $0xed8] sm:$0xff] %v614_v27  ;;  %v678_v27 = vld [vmem:[%s2544_s24 + $0x10d8] sm:$0xff] }
 0x206   : > { %1639 = vst [vmem:[%s2553_s25 + $0xee0] sm:$0xff] %v615_v28  ;;  %v679_v28 = vld [vmem:[%s2544_s24 + $0x10e0] sm:$0xff] }
 0x207   : > { %1640 = vst [vmem:[%s2553_s25 + $0xee8] sm:$0xff] %v616_v29  ;;  %v680_v29 = vld [vmem:[%s2544_s24 + $0x10e8] sm:$0xff] }
 0x208   : > { %1641 = vst [vmem:[%s2553_s25 + $0xef0] sm:$0xff] %v617_v30  ;;  %v681_v30 = vld [vmem:[%s2544_s24 + $0x10f0] sm:$0xff] }
 0x209   : > { %1642 = vst [vmem:[%s2553_s25 + $0xef8] sm:$0xff] %v618_v31  ;;  %v682_v31 = vld [vmem:[%s2544_s24 + $0x10f8] sm:$0xff] }
 0x20a   : > { %1643 = vst [vmem:[%s2553_s25 + $0xf00] sm:$0xff] %v619_v32  ;;  %v683_v32 = vld [vmem:[%s2544_s24 + $0x1100] sm:$0xff] }
 0x20b   : > { %1644 = vst [vmem:[%s2553_s25 + $0xf08] sm:$0xff] %v620_v33  ;;  %v684_v33 = vld [vmem:[%s2544_s24 + $0x1108] sm:$0xff] }
 0x20c   : > { %1645 = vst [vmem:[%s2553_s25 + $0xf10] sm:$0xff] %v621_v34  ;;  %v685_v34 = vld [vmem:[%s2544_s24 + $0x1110] sm:$0xff] }
 0x20d   : > { %1646 = vst [vmem:[%s2553_s25 + $0xf18] sm:$0xff] %v622_v35  ;;  %v686_v35 = vld [vmem:[%s2544_s24 + $0x1118] sm:$0xff] }
 0x20e   : > { %1647 = vst [vmem:[%s2553_s25 + $0xf20] sm:$0xff] %v623_v36  ;;  %v687_v36 = vld [vmem:[%s2544_s24 + $0x1120] sm:$0xff] }
 0x20f   : > { %1648 = vst [vmem:[%s2553_s25 + $0xf28] sm:$0xff] %v624_v37  ;;  %v688_v37 = vld [vmem:[%s2544_s24 + $0x1128] sm:$0xff] }
 0x210   : > { %1649 = vst [vmem:[%s2553_s25 + $0xf30] sm:$0xff] %v625_v38  ;;  %v689_v38 = vld [vmem:[%s2544_s24 + $0x1130] sm:$0xff] }
 0x211   : > { %1650 = vst [vmem:[%s2553_s25 + $0xf38] sm:$0xff] %v626_v39  ;;  %v690_v39 = vld [vmem:[%s2544_s24 + $0x1138] sm:$0xff] }
 0x212   : > { %1651 = vst [vmem:[%s2553_s25 + $0xf40] sm:$0xff] %v627_v40  ;;  %v691_v40 = vld [vmem:[%s2544_s24 + $0x1140] sm:$0xff] }
 0x213   : > { %1652 = vst [vmem:[%s2553_s25 + $0xf48] sm:$0xff] %v628_v41  ;;  %v692_v41 = vld [vmem:[%s2544_s24 + $0x1148] sm:$0xff] }
 0x214   : > { %1653 = vst [vmem:[%s2553_s25 + $0xf50] sm:$0xff] %v629_v42  ;;  %v693_v42 = vld [vmem:[%s2544_s24 + $0x1150] sm:$0xff] }
 0x215   : > { %1654 = vst [vmem:[%s2553_s25 + $0xf58] sm:$0xff] %v630_v43  ;;  %v694_v43 = vld [vmem:[%s2544_s24 + $0x1158] sm:$0xff] }
 0x216   : > { %1655 = vst [vmem:[%s2553_s25 + $0xf60] sm:$0xff] %v631_v44  ;;  %v695_v44 = vld [vmem:[%s2544_s24 + $0x1160] sm:$0xff] }
 0x217   : > { %1656 = vst [vmem:[%s2553_s25 + $0xf68] sm:$0xff] %v632_v45  ;;  %v696_v45 = vld [vmem:[%s2544_s24 + $0x1168] sm:$0xff] }
 0x218   : > { %1657 = vst [vmem:[%s2553_s25 + $0xf70] sm:$0xff] %v633_v46  ;;  %v697_v46 = vld [vmem:[%s2544_s24 + $0x1170] sm:$0xff] }
 0x219   : > { %1658 = vst [vmem:[%s2553_s25 + $0xf78] sm:$0xff] %v634_v47  ;;  %v698_v47 = vld [vmem:[%s2544_s24 + $0x1178] sm:$0xff] }
 0x21a   : > { %1659 = vst [vmem:[%s2553_s25 + $0xf80] sm:$0xff] %v635_v48  ;;  %v699_v48 = vld [vmem:[%s2544_s24 + $0x1180] sm:$0xff] }
 0x21b   : > { %1660 = vst [vmem:[%s2553_s25 + $0xf88] sm:$0xff] %v636_v49  ;;  %v700_v49 = vld [vmem:[%s2544_s24 + $0x1188] sm:$0xff] }
 0x21c   : > { %1661 = vst [vmem:[%s2553_s25 + $0xf90] sm:$0xff] %v637_v50  ;;  %v701_v50 = vld [vmem:[%s2544_s24 + $0x1190] sm:$0xff] }
 0x21d   : > { %1662 = vst [vmem:[%s2553_s25 + $0xf98] sm:$0xff] %v638_v51  ;;  %v702_v51 = vld [vmem:[%s2544_s24 + $0x1198] sm:$0xff] }
 0x21e   : > { %1663 = vst [vmem:[%s2553_s25 + $0xfa0] sm:$0xff] %v639_v52  ;;  %v703_v52 = vld [vmem:[%s2544_s24 + $0x11a0] sm:$0xff] }
 0x21f   : > { %1664 = vst [vmem:[%s2553_s25 + $0xfa8] sm:$0xff] %v640_v53  ;;  %v704_v53 = vld [vmem:[%s2544_s24 + $0x11a8] sm:$0xff] }
 0x220   : > { %1665 = vst [vmem:[%s2553_s25 + $0xfb0] sm:$0xff] %v641_v54  ;;  %v705_v54 = vld [vmem:[%s2544_s24 + $0x11b0] sm:$0xff] }
 0x221   : > { %1666 = vst [vmem:[%s2553_s25 + $0xfb8] sm:$0xff] %v642_v55  ;;  %v706_v55 = vld [vmem:[%s2544_s24 + $0x11b8] sm:$0xff] }
 0x222   : > { %1667 = vst [vmem:[%s2553_s25 + $0xfc0] sm:$0xff] %v643_v56  ;;  %v707_v56 = vld [vmem:[%s2544_s24 + $0x11c0] sm:$0xff] }
 0x223   : > { %1668 = vst [vmem:[%s2553_s25 + $0xfc8] sm:$0xff] %v644_v57  ;;  %v708_v57 = vld [vmem:[%s2544_s24 + $0x11c8] sm:$0xff] }
 0x224   : > { %1669 = vst [vmem:[%s2553_s25 + $0xfd0] sm:$0xff] %v645_v58  ;;  %v709_v58 = vld [vmem:[%s2544_s24 + $0x11d0] sm:$0xff] }
 0x225   : > { %1670 = vst [vmem:[%s2553_s25 + $0xfd8] sm:$0xff] %v646_v59  ;;  %v710_v59 = vld [vmem:[%s2544_s24 + $0x11d8] sm:$0xff] }
 0x226   : > { %1671 = vst [vmem:[%s2553_s25 + $0xfe0] sm:$0xff] %v647_v60  ;;  %v711_v60 = vld [vmem:[%s2544_s24 + $0x11e0] sm:$0xff] }
 0x227   : > { %1672 = vst [vmem:[%s2553_s25 + $0xfe8] sm:$0xff] %v648_v61  ;;  %v712_v61 = vld [vmem:[%s2544_s24 + $0x11e8] sm:$0xff] }
 0x228   : > { %1673 = vst [vmem:[%s2553_s25 + $0xff0] sm:$0xff] %v649_v62  ;;  %v713_v62 = vld [vmem:[%s2544_s24 + $0x11f0] sm:$0xff] }
 0x229   : > { %1674 = vst [vmem:[%s2553_s25 + $0xff8] sm:$0xff] %v650_v63  ;;  %v714_v63 = vld [vmem:[%s2544_s24 + $0x11f8] sm:$0xff] }
 0x22a   : > { %1675 = vst [vmem:[%s2553_s25 + $0x1000] sm:$0xff] %v651_v0  ;;  %v715_v0 = vld [vmem:[%s2544_s24 + $0x1200] sm:$0xff] }
 0x22b   : > { %1676 = vst [vmem:[%s2553_s25 + $0x1008] sm:$0xff] %v652_v1  ;;  %v716_v1 = vld [vmem:[%s2544_s24 + $0x1208] sm:$0xff] }
 0x22c   : > { %1677 = vst [vmem:[%s2553_s25 + $0x1010] sm:$0xff] %v653_v2  ;;  %v717_v2 = vld [vmem:[%s2544_s24 + $0x1210] sm:$0xff] }
 0x22d   : > { %1678 = vst [vmem:[%s2553_s25 + $0x1018] sm:$0xff] %v654_v3  ;;  %v718_v3 = vld [vmem:[%s2544_s24 + $0x1218] sm:$0xff] }
 0x22e   : > { %1679 = vst [vmem:[%s2553_s25 + $0x1020] sm:$0xff] %v655_v4  ;;  %v719_v4 = vld [vmem:[%s2544_s24 + $0x1220] sm:$0xff] }
 0x22f   : > { %1680 = vst [vmem:[%s2553_s25 + $0x1028] sm:$0xff] %v656_v5  ;;  %v720_v5 = vld [vmem:[%s2544_s24 + $0x1228] sm:$0xff] }
 0x230   : > { %1681 = vst [vmem:[%s2553_s25 + $0x1030] sm:$0xff] %v657_v6  ;;  %v721_v6 = vld [vmem:[%s2544_s24 + $0x1230] sm:$0xff] }
 0x231   : > { %1682 = vst [vmem:[%s2553_s25 + $0x1038] sm:$0xff] %v658_v7  ;;  %v722_v7 = vld [vmem:[%s2544_s24 + $0x1238] sm:$0xff] }
 0x232   : > { %1683 = vst [vmem:[%s2553_s25 + $0x1040] sm:$0xff] %v659_v8  ;;  %v723_v8 = vld [vmem:[%s2544_s24 + $0x1240] sm:$0xff] }
 0x233   : > { %1684 = vst [vmem:[%s2553_s25 + $0x1048] sm:$0xff] %v660_v9  ;;  %v724_v9 = vld [vmem:[%s2544_s24 + $0x1248] sm:$0xff] }
 0x234   : > { %1685 = vst [vmem:[%s2553_s25 + $0x1050] sm:$0xff] %v661_v10  ;;  %v725_v10 = vld [vmem:[%s2544_s24 + $0x1250] sm:$0xff] }
 0x235   : > { %1686 = vst [vmem:[%s2553_s25 + $0x1058] sm:$0xff] %v662_v11  ;;  %v726_v11 = vld [vmem:[%s2544_s24 + $0x1258] sm:$0xff] }
 0x236   : > { %1687 = vst [vmem:[%s2553_s25 + $0x1060] sm:$0xff] %v663_v12  ;;  %v727_v12 = vld [vmem:[%s2544_s24 + $0x1260] sm:$0xff] }
 0x237   : > { %1688 = vst [vmem:[%s2553_s25 + $0x1068] sm:$0xff] %v664_v13  ;;  %v728_v13 = vld [vmem:[%s2544_s24 + $0x1268] sm:$0xff] }
 0x238   : > { %1689 = vst [vmem:[%s2553_s25 + $0x1070] sm:$0xff] %v665_v14  ;;  %v729_v14 = vld [vmem:[%s2544_s24 + $0x1270] sm:$0xff] }
 0x239   : > { %1690 = vst [vmem:[%s2553_s25 + $0x1078] sm:$0xff] %v666_v15  ;;  %v730_v15 = vld [vmem:[%s2544_s24 + $0x1278] sm:$0xff] }
 0x23a   : > { %1691 = vst [vmem:[%s2553_s25 + $0x1080] sm:$0xff] %v667_v16  ;;  %v731_v16 = vld [vmem:[%s2544_s24 + $0x1280] sm:$0xff] }
 0x23b   : > { %1692 = vst [vmem:[%s2553_s25 + $0x1088] sm:$0xff] %v668_v17  ;;  %v732_v17 = vld [vmem:[%s2544_s24 + $0x1288] sm:$0xff] }
 0x23c   : > { %1693 = vst [vmem:[%s2553_s25 + $0x1090] sm:$0xff] %v669_v18  ;;  %v733_v18 = vld [vmem:[%s2544_s24 + $0x1290] sm:$0xff] }
 0x23d   : > { %1694 = vst [vmem:[%s2553_s25 + $0x1098] sm:$0xff] %v670_v19  ;;  %v734_v19 = vld [vmem:[%s2544_s24 + $0x1298] sm:$0xff] }
 0x23e   : > { %1695 = vst [vmem:[%s2553_s25 + $0x10a0] sm:$0xff] %v671_v20  ;;  %v735_v20 = vld [vmem:[%s2544_s24 + $0x12a0] sm:$0xff] }
 0x23f   : > { %1696 = vst [vmem:[%s2553_s25 + $0x10a8] sm:$0xff] %v672_v21  ;;  %v736_v21 = vld [vmem:[%s2544_s24 + $0x12a8] sm:$0xff] }
 0x240   : > { %1697 = vst [vmem:[%s2553_s25 + $0x10b0] sm:$0xff] %v673_v22  ;;  %v737_v22 = vld [vmem:[%s2544_s24 + $0x12b0] sm:$0xff] }
 0x241   : > { %1698 = vst [vmem:[%s2553_s25 + $0x10b8] sm:$0xff] %v674_v23  ;;  %v738_v23 = vld [vmem:[%s2544_s24 + $0x12b8] sm:$0xff] }
 0x242   : > { %1699 = vst [vmem:[%s2553_s25 + $0x10c0] sm:$0xff] %v675_v24  ;;  %v739_v24 = vld [vmem:[%s2544_s24 + $0x12c0] sm:$0xff] }
 0x243   : > { %1700 = vst [vmem:[%s2553_s25 + $0x10c8] sm:$0xff] %v676_v25  ;;  %v740_v25 = vld [vmem:[%s2544_s24 + $0x12c8] sm:$0xff] }
 0x244   : > { %1701 = vst [vmem:[%s2553_s25 + $0x10d0] sm:$0xff] %v677_v26  ;;  %v741_v26 = vld [vmem:[%s2544_s24 + $0x12d0] sm:$0xff] }
 0x245   : > { %1702 = vst [vmem:[%s2553_s25 + $0x10d8] sm:$0xff] %v678_v27  ;;  %v742_v27 = vld [vmem:[%s2544_s24 + $0x12d8] sm:$0xff] }
 0x246   : > { %1703 = vst [vmem:[%s2553_s25 + $0x10e0] sm:$0xff] %v679_v28  ;;  %v743_v28 = vld [vmem:[%s2544_s24 + $0x12e0] sm:$0xff] }
 0x247   : > { %1704 = vst [vmem:[%s2553_s25 + $0x10e8] sm:$0xff] %v680_v29  ;;  %v744_v29 = vld [vmem:[%s2544_s24 + $0x12e8] sm:$0xff] }
 0x248   : > { %1705 = vst [vmem:[%s2553_s25 + $0x10f0] sm:$0xff] %v681_v30  ;;  %v745_v30 = vld [vmem:[%s2544_s24 + $0x12f0] sm:$0xff] }
 0x249   : > { %1706 = vst [vmem:[%s2553_s25 + $0x10f8] sm:$0xff] %v682_v31  ;;  %v746_v31 = vld [vmem:[%s2544_s24 + $0x12f8] sm:$0xff] }
 0x24a   : > { %1707 = vst [vmem:[%s2553_s25 + $0x1100] sm:$0xff] %v683_v32  ;;  %v747_v32 = vld [vmem:[%s2544_s24 + $0x1300] sm:$0xff] }
 0x24b   : > { %1708 = vst [vmem:[%s2553_s25 + $0x1108] sm:$0xff] %v684_v33  ;;  %v748_v33 = vld [vmem:[%s2544_s24 + $0x1308] sm:$0xff] }
 0x24c   : > { %1709 = vst [vmem:[%s2553_s25 + $0x1110] sm:$0xff] %v685_v34  ;;  %v749_v34 = vld [vmem:[%s2544_s24 + $0x1310] sm:$0xff] }
 0x24d   : > { %1710 = vst [vmem:[%s2553_s25 + $0x1118] sm:$0xff] %v686_v35  ;;  %v750_v35 = vld [vmem:[%s2544_s24 + $0x1318] sm:$0xff] }
 0x24e   : > { %1711 = vst [vmem:[%s2553_s25 + $0x1120] sm:$0xff] %v687_v36  ;;  %v751_v36 = vld [vmem:[%s2544_s24 + $0x1320] sm:$0xff] }
 0x24f   : > { %1712 = vst [vmem:[%s2553_s25 + $0x1128] sm:$0xff] %v688_v37  ;;  %v752_v37 = vld [vmem:[%s2544_s24 + $0x1328] sm:$0xff] }
 0x250   : > { %1713 = vst [vmem:[%s2553_s25 + $0x1130] sm:$0xff] %v689_v38  ;;  %v753_v38 = vld [vmem:[%s2544_s24 + $0x1330] sm:$0xff] }
 0x251   : > { %1714 = vst [vmem:[%s2553_s25 + $0x1138] sm:$0xff] %v690_v39  ;;  %v754_v39 = vld [vmem:[%s2544_s24 + $0x1338] sm:$0xff] }
 0x252   : > { %1715 = vst [vmem:[%s2553_s25 + $0x1140] sm:$0xff] %v691_v40  ;;  %v755_v40 = vld [vmem:[%s2544_s24 + $0x1340] sm:$0xff] }
 0x253   : > { %1716 = vst [vmem:[%s2553_s25 + $0x1148] sm:$0xff] %v692_v41  ;;  %v756_v41 = vld [vmem:[%s2544_s24 + $0x1348] sm:$0xff] }
 0x254   : > { %1717 = vst [vmem:[%s2553_s25 + $0x1150] sm:$0xff] %v693_v42  ;;  %v757_v42 = vld [vmem:[%s2544_s24 + $0x1350] sm:$0xff] }
 0x255   : > { %1718 = vst [vmem:[%s2553_s25 + $0x1158] sm:$0xff] %v694_v43  ;;  %v758_v43 = vld [vmem:[%s2544_s24 + $0x1358] sm:$0xff] }
 0x256   : > { %1719 = vst [vmem:[%s2553_s25 + $0x1160] sm:$0xff] %v695_v44  ;;  %v759_v44 = vld [vmem:[%s2544_s24 + $0x1360] sm:$0xff] }
 0x257   : > { %1720 = vst [vmem:[%s2553_s25 + $0x1168] sm:$0xff] %v696_v45  ;;  %v760_v45 = vld [vmem:[%s2544_s24 + $0x1368] sm:$0xff] }
 0x258   : > { %1721 = vst [vmem:[%s2553_s25 + $0x1170] sm:$0xff] %v697_v46  ;;  %v761_v46 = vld [vmem:[%s2544_s24 + $0x1370] sm:$0xff] }
 0x259   : > { %1722 = vst [vmem:[%s2553_s25 + $0x1178] sm:$0xff] %v698_v47  ;;  %v762_v47 = vld [vmem:[%s2544_s24 + $0x1378] sm:$0xff] }
 0x25a   : > { %1723 = vst [vmem:[%s2553_s25 + $0x1180] sm:$0xff] %v699_v48  ;;  %v763_v48 = vld [vmem:[%s2544_s24 + $0x1380] sm:$0xff] }
 0x25b   : > { %1724 = vst [vmem:[%s2553_s25 + $0x1188] sm:$0xff] %v700_v49  ;;  %v764_v49 = vld [vmem:[%s2544_s24 + $0x1388] sm:$0xff] }
 0x25c   : > { %1725 = vst [vmem:[%s2553_s25 + $0x1190] sm:$0xff] %v701_v50  ;;  %v765_v50 = vld [vmem:[%s2544_s24 + $0x1390] sm:$0xff] }
 0x25d   : > { %1726 = vst [vmem:[%s2553_s25 + $0x1198] sm:$0xff] %v702_v51  ;;  %v766_v51 = vld [vmem:[%s2544_s24 + $0x1398] sm:$0xff] }
 0x25e   : > { %1727 = vst [vmem:[%s2553_s25 + $0x11a0] sm:$0xff] %v703_v52  ;;  %v767_v52 = vld [vmem:[%s2544_s24 + $0x13a0] sm:$0xff] }
 0x25f   : > { %1728 = vst [vmem:[%s2553_s25 + $0x11a8] sm:$0xff] %v704_v53  ;;  %v768_v53 = vld [vmem:[%s2544_s24 + $0x13a8] sm:$0xff] }
 0x260   : > { %1729 = vst [vmem:[%s2553_s25 + $0x11b0] sm:$0xff] %v705_v54  ;;  %v769_v54 = vld [vmem:[%s2544_s24 + $0x13b0] sm:$0xff] }
 0x261   : > { %1730 = vst [vmem:[%s2553_s25 + $0x11b8] sm:$0xff] %v706_v55  ;;  %v770_v55 = vld [vmem:[%s2544_s24 + $0x13b8] sm:$0xff] }
 0x262   : > { %1731 = vst [vmem:[%s2553_s25 + $0x11c0] sm:$0xff] %v707_v56  ;;  %v771_v56 = vld [vmem:[%s2544_s24 + $0x13c0] sm:$0xff] }
 0x263   : > { %1732 = vst [vmem:[%s2553_s25 + $0x11c8] sm:$0xff] %v708_v57  ;;  %v772_v57 = vld [vmem:[%s2544_s24 + $0x13c8] sm:$0xff] }
 0x264   : > { %1733 = vst [vmem:[%s2553_s25 + $0x11d0] sm:$0xff] %v709_v58  ;;  %v773_v58 = vld [vmem:[%s2544_s24 + $0x13d0] sm:$0xff] }
 0x265   : > { %1734 = vst [vmem:[%s2553_s25 + $0x11d8] sm:$0xff] %v710_v59  ;;  %v774_v59 = vld [vmem:[%s2544_s24 + $0x13d8] sm:$0xff] }
 0x266   : > { %1735 = vst [vmem:[%s2553_s25 + $0x11e0] sm:$0xff] %v711_v60  ;;  %v775_v60 = vld [vmem:[%s2544_s24 + $0x13e0] sm:$0xff] }
 0x267   : > { %1736 = vst [vmem:[%s2553_s25 + $0x11e8] sm:$0xff] %v712_v61  ;;  %v776_v61 = vld [vmem:[%s2544_s24 + $0x13e8] sm:$0xff] }
 0x268   : > { %1737 = vst [vmem:[%s2553_s25 + $0x11f0] sm:$0xff] %v713_v62  ;;  %v777_v62 = vld [vmem:[%s2544_s24 + $0x13f0] sm:$0xff] }
 0x269   : > { %1738 = vst [vmem:[%s2553_s25 + $0x11f8] sm:$0xff] %v714_v63  ;;  %v778_v63 = vld [vmem:[%s2544_s24 + $0x13f8] sm:$0xff] }
 0x26a   : > { %1739 = vst [vmem:[%s2553_s25 + $0x1200] sm:$0xff] %v715_v0  ;;  %v779_v0 = vld [vmem:[%s2544_s24 + $0x1400] sm:$0xff] }
 0x26b   : > { %1740 = vst [vmem:[%s2553_s25 + $0x1208] sm:$0xff] %v716_v1  ;;  %v780_v1 = vld [vmem:[%s2544_s24 + $0x1408] sm:$0xff] }
 0x26c   : > { %1741 = vst [vmem:[%s2553_s25 + $0x1210] sm:$0xff] %v717_v2  ;;  %v781_v2 = vld [vmem:[%s2544_s24 + $0x1410] sm:$0xff] }
 0x26d   : > { %1742 = vst [vmem:[%s2553_s25 + $0x1218] sm:$0xff] %v718_v3  ;;  %v782_v3 = vld [vmem:[%s2544_s24 + $0x1418] sm:$0xff] }
 0x26e   : > { %1743 = vst [vmem:[%s2553_s25 + $0x1220] sm:$0xff] %v719_v4  ;;  %v783_v4 = vld [vmem:[%s2544_s24 + $0x1420] sm:$0xff] }
 0x26f   : > { %1744 = vst [vmem:[%s2553_s25 + $0x1228] sm:$0xff] %v720_v5  ;;  %v784_v5 = vld [vmem:[%s2544_s24 + $0x1428] sm:$0xff] }
 0x270   : > { %1745 = vst [vmem:[%s2553_s25 + $0x1230] sm:$0xff] %v721_v6  ;;  %v785_v6 = vld [vmem:[%s2544_s24 + $0x1430] sm:$0xff] }
 0x271   : > { %1746 = vst [vmem:[%s2553_s25 + $0x1238] sm:$0xff] %v722_v7  ;;  %v786_v7 = vld [vmem:[%s2544_s24 + $0x1438] sm:$0xff] }
 0x272   : > { %1747 = vst [vmem:[%s2553_s25 + $0x1240] sm:$0xff] %v723_v8  ;;  %v787_v8 = vld [vmem:[%s2544_s24 + $0x1440] sm:$0xff] }
 0x273   : > { %1748 = vst [vmem:[%s2553_s25 + $0x1248] sm:$0xff] %v724_v9  ;;  %v788_v9 = vld [vmem:[%s2544_s24 + $0x1448] sm:$0xff] }
 0x274   : > { %1749 = vst [vmem:[%s2553_s25 + $0x1250] sm:$0xff] %v725_v10  ;;  %v789_v10 = vld [vmem:[%s2544_s24 + $0x1450] sm:$0xff] }
 0x275   : > { %1750 = vst [vmem:[%s2553_s25 + $0x1258] sm:$0xff] %v726_v11  ;;  %v790_v11 = vld [vmem:[%s2544_s24 + $0x1458] sm:$0xff] }
 0x276   : > { %1751 = vst [vmem:[%s2553_s25 + $0x1260] sm:$0xff] %v727_v12  ;;  %v791_v12 = vld [vmem:[%s2544_s24 + $0x1460] sm:$0xff] }
 0x277   : > { %1752 = vst [vmem:[%s2553_s25 + $0x1268] sm:$0xff] %v728_v13  ;;  %v792_v13 = vld [vmem:[%s2544_s24 + $0x1468] sm:$0xff] }
 0x278   : > { %1753 = vst [vmem:[%s2553_s25 + $0x1270] sm:$0xff] %v729_v14  ;;  %v793_v14 = vld [vmem:[%s2544_s24 + $0x1470] sm:$0xff] }
 0x279   : > { %1754 = vst [vmem:[%s2553_s25 + $0x1278] sm:$0xff] %v730_v15  ;;  %v794_v15 = vld [vmem:[%s2544_s24 + $0x1478] sm:$0xff] }
 0x27a   : > { %1755 = vst [vmem:[%s2553_s25 + $0x1280] sm:$0xff] %v731_v16  ;;  %v795_v16 = vld [vmem:[%s2544_s24 + $0x1480] sm:$0xff] }
 0x27b   : > { %1756 = vst [vmem:[%s2553_s25 + $0x1288] sm:$0xff] %v732_v17  ;;  %v796_v17 = vld [vmem:[%s2544_s24 + $0x1488] sm:$0xff] }
 0x27c   : > { %1757 = vst [vmem:[%s2553_s25 + $0x1290] sm:$0xff] %v733_v18  ;;  %v797_v18 = vld [vmem:[%s2544_s24 + $0x1490] sm:$0xff] }
 0x27d   : > { %1758 = vst [vmem:[%s2553_s25 + $0x1298] sm:$0xff] %v734_v19  ;;  %v798_v19 = vld [vmem:[%s2544_s24 + $0x1498] sm:$0xff] }
 0x27e   : > { %1759 = vst [vmem:[%s2553_s25 + $0x12a0] sm:$0xff] %v735_v20  ;;  %v799_v20 = vld [vmem:[%s2544_s24 + $0x14a0] sm:$0xff] }
 0x27f   : > { %1760 = vst [vmem:[%s2553_s25 + $0x12a8] sm:$0xff] %v736_v21  ;;  %v800_v21 = vld [vmem:[%s2544_s24 + $0x14a8] sm:$0xff] }
 0x280   : > { %1761 = vst [vmem:[%s2553_s25 + $0x12b0] sm:$0xff] %v737_v22  ;;  %v801_v22 = vld [vmem:[%s2544_s24 + $0x14b0] sm:$0xff] }
 0x281   : > { %1762 = vst [vmem:[%s2553_s25 + $0x12b8] sm:$0xff] %v738_v23  ;;  %v802_v23 = vld [vmem:[%s2544_s24 + $0x14b8] sm:$0xff] }
 0x282   : > { %1763 = vst [vmem:[%s2553_s25 + $0x12c0] sm:$0xff] %v739_v24  ;;  %v803_v24 = vld [vmem:[%s2544_s24 + $0x14c0] sm:$0xff] }
 0x283   : > { %1764 = vst [vmem:[%s2553_s25 + $0x12c8] sm:$0xff] %v740_v25  ;;  %v804_v25 = vld [vmem:[%s2544_s24 + $0x14c8] sm:$0xff] }
 0x284   : > { %1765 = vst [vmem:[%s2553_s25 + $0x12d0] sm:$0xff] %v741_v26  ;;  %v805_v26 = vld [vmem:[%s2544_s24 + $0x14d0] sm:$0xff] }
 0x285   : > { %1766 = vst [vmem:[%s2553_s25 + $0x12d8] sm:$0xff] %v742_v27  ;;  %v806_v27 = vld [vmem:[%s2544_s24 + $0x14d8] sm:$0xff] }
 0x286   : > { %1767 = vst [vmem:[%s2553_s25 + $0x12e0] sm:$0xff] %v743_v28  ;;  %v807_v28 = vld [vmem:[%s2544_s24 + $0x14e0] sm:$0xff] }
 0x287   : > { %1768 = vst [vmem:[%s2553_s25 + $0x12e8] sm:$0xff] %v744_v29  ;;  %v808_v29 = vld [vmem:[%s2544_s24 + $0x14e8] sm:$0xff] }
 0x288   : > { %1769 = vst [vmem:[%s2553_s25 + $0x12f0] sm:$0xff] %v745_v30  ;;  %v809_v30 = vld [vmem:[%s2544_s24 + $0x14f0] sm:$0xff] }
 0x289   : > { %1770 = vst [vmem:[%s2553_s25 + $0x12f8] sm:$0xff] %v746_v31  ;;  %v810_v31 = vld [vmem:[%s2544_s24 + $0x14f8] sm:$0xff] }
 0x28a   : > { %1771 = vst [vmem:[%s2553_s25 + $0x1300] sm:$0xff] %v747_v32  ;;  %v811_v32 = vld [vmem:[%s2544_s24 + $0x1500] sm:$0xff] }
 0x28b   : > { %1772 = vst [vmem:[%s2553_s25 + $0x1308] sm:$0xff] %v748_v33  ;;  %v812_v33 = vld [vmem:[%s2544_s24 + $0x1508] sm:$0xff] }
 0x28c   : > { %1773 = vst [vmem:[%s2553_s25 + $0x1310] sm:$0xff] %v749_v34  ;;  %v813_v34 = vld [vmem:[%s2544_s24 + $0x1510] sm:$0xff] }
 0x28d   : > { %1774 = vst [vmem:[%s2553_s25 + $0x1318] sm:$0xff] %v750_v35  ;;  %v814_v35 = vld [vmem:[%s2544_s24 + $0x1518] sm:$0xff] }
 0x28e   : > { %1775 = vst [vmem:[%s2553_s25 + $0x1320] sm:$0xff] %v751_v36  ;;  %v815_v36 = vld [vmem:[%s2544_s24 + $0x1520] sm:$0xff] }
 0x28f   : > { %1776 = vst [vmem:[%s2553_s25 + $0x1328] sm:$0xff] %v752_v37  ;;  %v816_v37 = vld [vmem:[%s2544_s24 + $0x1528] sm:$0xff] }
 0x290   : > { %1777 = vst [vmem:[%s2553_s25 + $0x1330] sm:$0xff] %v753_v38  ;;  %v817_v38 = vld [vmem:[%s2544_s24 + $0x1530] sm:$0xff] }
 0x291   : > { %1778 = vst [vmem:[%s2553_s25 + $0x1338] sm:$0xff] %v754_v39  ;;  %v818_v39 = vld [vmem:[%s2544_s24 + $0x1538] sm:$0xff] }
 0x292   : > { %1779 = vst [vmem:[%s2553_s25 + $0x1340] sm:$0xff] %v755_v40  ;;  %v819_v40 = vld [vmem:[%s2544_s24 + $0x1540] sm:$0xff] }
 0x293   : > { %1780 = vst [vmem:[%s2553_s25 + $0x1348] sm:$0xff] %v756_v41  ;;  %v820_v41 = vld [vmem:[%s2544_s24 + $0x1548] sm:$0xff] }
 0x294   : > { %1781 = vst [vmem:[%s2553_s25 + $0x1350] sm:$0xff] %v757_v42  ;;  %v821_v42 = vld [vmem:[%s2544_s24 + $0x1550] sm:$0xff] }
 0x295   : > { %1782 = vst [vmem:[%s2553_s25 + $0x1358] sm:$0xff] %v758_v43  ;;  %v822_v43 = vld [vmem:[%s2544_s24 + $0x1558] sm:$0xff] }
 0x296   : > { %1783 = vst [vmem:[%s2553_s25 + $0x1360] sm:$0xff] %v759_v44  ;;  %v823_v44 = vld [vmem:[%s2544_s24 + $0x1560] sm:$0xff] }
 0x297   : > { %1784 = vst [vmem:[%s2553_s25 + $0x1368] sm:$0xff] %v760_v45  ;;  %v824_v45 = vld [vmem:[%s2544_s24 + $0x1568] sm:$0xff] }
 0x298   : > { %1785 = vst [vmem:[%s2553_s25 + $0x1370] sm:$0xff] %v761_v46  ;;  %v825_v46 = vld [vmem:[%s2544_s24 + $0x1570] sm:$0xff] }
 0x299   : > { %1786 = vst [vmem:[%s2553_s25 + $0x1378] sm:$0xff] %v762_v47  ;;  %v826_v47 = vld [vmem:[%s2544_s24 + $0x1578] sm:$0xff] }
 0x29a   : > { %1787 = vst [vmem:[%s2553_s25 + $0x1380] sm:$0xff] %v763_v48  ;;  %v827_v48 = vld [vmem:[%s2544_s24 + $0x1580] sm:$0xff] }
 0x29b   : > { %1788 = vst [vmem:[%s2553_s25 + $0x1388] sm:$0xff] %v764_v49  ;;  %v828_v49 = vld [vmem:[%s2544_s24 + $0x1588] sm:$0xff] }
 0x29c   : > { %1789 = vst [vmem:[%s2553_s25 + $0x1390] sm:$0xff] %v765_v50  ;;  %v829_v50 = vld [vmem:[%s2544_s24 + $0x1590] sm:$0xff] }
 0x29d   : > { %1790 = vst [vmem:[%s2553_s25 + $0x1398] sm:$0xff] %v766_v51  ;;  %v830_v51 = vld [vmem:[%s2544_s24 + $0x1598] sm:$0xff] }
 0x29e   : > { %1791 = vst [vmem:[%s2553_s25 + $0x13a0] sm:$0xff] %v767_v52  ;;  %v831_v52 = vld [vmem:[%s2544_s24 + $0x15a0] sm:$0xff] }
 0x29f   : > { %1792 = vst [vmem:[%s2553_s25 + $0x13a8] sm:$0xff] %v768_v53  ;;  %v832_v53 = vld [vmem:[%s2544_s24 + $0x15a8] sm:$0xff] }
 0x2a0   : > { %1793 = vst [vmem:[%s2553_s25 + $0x13b0] sm:$0xff] %v769_v54  ;;  %v833_v54 = vld [vmem:[%s2544_s24 + $0x15b0] sm:$0xff] }
 0x2a1   : > { %1794 = vst [vmem:[%s2553_s25 + $0x13b8] sm:$0xff] %v770_v55  ;;  %v834_v55 = vld [vmem:[%s2544_s24 + $0x15b8] sm:$0xff] }
 0x2a2   : > { %1795 = vst [vmem:[%s2553_s25 + $0x13c0] sm:$0xff] %v771_v56  ;;  %v835_v56 = vld [vmem:[%s2544_s24 + $0x15c0] sm:$0xff] }
 0x2a3   : > { %1796 = vst [vmem:[%s2553_s25 + $0x13c8] sm:$0xff] %v772_v57  ;;  %v836_v57 = vld [vmem:[%s2544_s24 + $0x15c8] sm:$0xff] }
 0x2a4   : > { %1797 = vst [vmem:[%s2553_s25 + $0x13d0] sm:$0xff] %v773_v58  ;;  %v837_v58 = vld [vmem:[%s2544_s24 + $0x15d0] sm:$0xff] }
 0x2a5   : > { %1798 = vst [vmem:[%s2553_s25 + $0x13d8] sm:$0xff] %v774_v59  ;;  %v838_v59 = vld [vmem:[%s2544_s24 + $0x15d8] sm:$0xff] }
 0x2a6   : > { %1799 = vst [vmem:[%s2553_s25 + $0x13e0] sm:$0xff] %v775_v60  ;;  %v839_v60 = vld [vmem:[%s2544_s24 + $0x15e0] sm:$0xff] }
 0x2a7   : > { %1800 = vst [vmem:[%s2553_s25 + $0x13e8] sm:$0xff] %v776_v61  ;;  %v840_v61 = vld [vmem:[%s2544_s24 + $0x15e8] sm:$0xff] }
 0x2a8   : > { %1801 = vst [vmem:[%s2553_s25 + $0x13f0] sm:$0xff] %v777_v62  ;;  %v841_v62 = vld [vmem:[%s2544_s24 + $0x15f0] sm:$0xff] }
 0x2a9   : > { %1802 = vst [vmem:[%s2553_s25 + $0x13f8] sm:$0xff] %v778_v63  ;;  %v842_v63 = vld [vmem:[%s2544_s24 + $0x15f8] sm:$0xff] }
 0x2aa   : > { %1803 = vst [vmem:[%s2553_s25 + $0x1400] sm:$0xff] %v779_v0  ;;  %v843_v0 = vld [vmem:[%s2544_s24 + $0x1600] sm:$0xff] }
 0x2ab   : > { %1804 = vst [vmem:[%s2553_s25 + $0x1408] sm:$0xff] %v780_v1  ;;  %v844_v1 = vld [vmem:[%s2544_s24 + $0x1608] sm:$0xff] }
 0x2ac   : > { %1805 = vst [vmem:[%s2553_s25 + $0x1410] sm:$0xff] %v781_v2  ;;  %v845_v2 = vld [vmem:[%s2544_s24 + $0x1610] sm:$0xff] }
 0x2ad   : > { %1806 = vst [vmem:[%s2553_s25 + $0x1418] sm:$0xff] %v782_v3  ;;  %v846_v3 = vld [vmem:[%s2544_s24 + $0x1618] sm:$0xff] }
 0x2ae   : > { %1807 = vst [vmem:[%s2553_s25 + $0x1420] sm:$0xff] %v783_v4  ;;  %v847_v4 = vld [vmem:[%s2544_s24 + $0x1620] sm:$0xff] }
 0x2af   : > { %1808 = vst [vmem:[%s2553_s25 + $0x1428] sm:$0xff] %v784_v5  ;;  %v848_v5 = vld [vmem:[%s2544_s24 + $0x1628] sm:$0xff] }
 0x2b0   : > { %1809 = vst [vmem:[%s2553_s25 + $0x1430] sm:$0xff] %v785_v6  ;;  %v849_v6 = vld [vmem:[%s2544_s24 + $0x1630] sm:$0xff] }
 0x2b1   : > { %1810 = vst [vmem:[%s2553_s25 + $0x1438] sm:$0xff] %v786_v7  ;;  %v850_v7 = vld [vmem:[%s2544_s24 + $0x1638] sm:$0xff] }
 0x2b2   : > { %1811 = vst [vmem:[%s2553_s25 + $0x1440] sm:$0xff] %v787_v8  ;;  %v851_v8 = vld [vmem:[%s2544_s24 + $0x1640] sm:$0xff] }
 0x2b3   : > { %1812 = vst [vmem:[%s2553_s25 + $0x1448] sm:$0xff] %v788_v9  ;;  %v852_v9 = vld [vmem:[%s2544_s24 + $0x1648] sm:$0xff] }
 0x2b4   : > { %1813 = vst [vmem:[%s2553_s25 + $0x1450] sm:$0xff] %v789_v10  ;;  %v853_v10 = vld [vmem:[%s2544_s24 + $0x1650] sm:$0xff] }
 0x2b5   : > { %1814 = vst [vmem:[%s2553_s25 + $0x1458] sm:$0xff] %v790_v11  ;;  %v854_v11 = vld [vmem:[%s2544_s24 + $0x1658] sm:$0xff] }
 0x2b6   : > { %1815 = vst [vmem:[%s2553_s25 + $0x1460] sm:$0xff] %v791_v12  ;;  %v855_v12 = vld [vmem:[%s2544_s24 + $0x1660] sm:$0xff] }
 0x2b7   : > { %1816 = vst [vmem:[%s2553_s25 + $0x1468] sm:$0xff] %v792_v13  ;;  %v856_v13 = vld [vmem:[%s2544_s24 + $0x1668] sm:$0xff] }
 0x2b8   : > { %1817 = vst [vmem:[%s2553_s25 + $0x1470] sm:$0xff] %v793_v14  ;;  %v857_v14 = vld [vmem:[%s2544_s24 + $0x1670] sm:$0xff] }
 0x2b9   : > { %1818 = vst [vmem:[%s2553_s25 + $0x1478] sm:$0xff] %v794_v15  ;;  %v858_v15 = vld [vmem:[%s2544_s24 + $0x1678] sm:$0xff] }
 0x2ba   : > { %1819 = vst [vmem:[%s2553_s25 + $0x1480] sm:$0xff] %v795_v16  ;;  %v859_v16 = vld [vmem:[%s2544_s24 + $0x1680] sm:$0xff] }
 0x2bb   : > { %1820 = vst [vmem:[%s2553_s25 + $0x1488] sm:$0xff] %v796_v17  ;;  %v860_v17 = vld [vmem:[%s2544_s24 + $0x1688] sm:$0xff] }
 0x2bc   : > { %1821 = vst [vmem:[%s2553_s25 + $0x1490] sm:$0xff] %v797_v18  ;;  %v861_v18 = vld [vmem:[%s2544_s24 + $0x1690] sm:$0xff] }
 0x2bd   : > { %1822 = vst [vmem:[%s2553_s25 + $0x1498] sm:$0xff] %v798_v19  ;;  %v862_v19 = vld [vmem:[%s2544_s24 + $0x1698] sm:$0xff] }
 0x2be   : > { %1823 = vst [vmem:[%s2553_s25 + $0x14a0] sm:$0xff] %v799_v20  ;;  %v863_v20 = vld [vmem:[%s2544_s24 + $0x16a0] sm:$0xff] }
 0x2bf   : > { %1824 = vst [vmem:[%s2553_s25 + $0x14a8] sm:$0xff] %v800_v21  ;;  %v864_v21 = vld [vmem:[%s2544_s24 + $0x16a8] sm:$0xff] }
 0x2c0   : > { %1825 = vst [vmem:[%s2553_s25 + $0x14b0] sm:$0xff] %v801_v22  ;;  %v865_v22 = vld [vmem:[%s2544_s24 + $0x16b0] sm:$0xff] }
 0x2c1   : > { %1826 = vst [vmem:[%s2553_s25 + $0x14b8] sm:$0xff] %v802_v23  ;;  %v866_v23 = vld [vmem:[%s2544_s24 + $0x16b8] sm:$0xff] }
 0x2c2   : > { %1827 = vst [vmem:[%s2553_s25 + $0x14c0] sm:$0xff] %v803_v24  ;;  %v867_v24 = vld [vmem:[%s2544_s24 + $0x16c0] sm:$0xff] }
 0x2c3   : > { %1828 = vst [vmem:[%s2553_s25 + $0x14c8] sm:$0xff] %v804_v25  ;;  %v868_v25 = vld [vmem:[%s2544_s24 + $0x16c8] sm:$0xff] }
 0x2c4   : > { %1829 = vst [vmem:[%s2553_s25 + $0x14d0] sm:$0xff] %v805_v26  ;;  %v869_v26 = vld [vmem:[%s2544_s24 + $0x16d0] sm:$0xff] }
 0x2c5   : > { %1830 = vst [vmem:[%s2553_s25 + $0x14d8] sm:$0xff] %v806_v27  ;;  %v870_v27 = vld [vmem:[%s2544_s24 + $0x16d8] sm:$0xff] }
 0x2c6   : > { %1831 = vst [vmem:[%s2553_s25 + $0x14e0] sm:$0xff] %v807_v28  ;;  %v871_v28 = vld [vmem:[%s2544_s24 + $0x16e0] sm:$0xff] }
 0x2c7   : > { %1832 = vst [vmem:[%s2553_s25 + $0x14e8] sm:$0xff] %v808_v29  ;;  %v872_v29 = vld [vmem:[%s2544_s24 + $0x16e8] sm:$0xff] }
 0x2c8   : > { %1833 = vst [vmem:[%s2553_s25 + $0x14f0] sm:$0xff] %v809_v30  ;;  %v873_v30 = vld [vmem:[%s2544_s24 + $0x16f0] sm:$0xff] }
 0x2c9   : > { %1834 = vst [vmem:[%s2553_s25 + $0x14f8] sm:$0xff] %v810_v31  ;;  %v874_v31 = vld [vmem:[%s2544_s24 + $0x16f8] sm:$0xff] }
 0x2ca   : > { %1835 = vst [vmem:[%s2553_s25 + $0x1500] sm:$0xff] %v811_v32  ;;  %v875_v32 = vld [vmem:[%s2544_s24 + $0x1700] sm:$0xff] }
 0x2cb   : > { %1836 = vst [vmem:[%s2553_s25 + $0x1508] sm:$0xff] %v812_v33  ;;  %v876_v33 = vld [vmem:[%s2544_s24 + $0x1708] sm:$0xff] }
 0x2cc   : > { %1837 = vst [vmem:[%s2553_s25 + $0x1510] sm:$0xff] %v813_v34  ;;  %v877_v34 = vld [vmem:[%s2544_s24 + $0x1710] sm:$0xff] }
 0x2cd   : > { %1838 = vst [vmem:[%s2553_s25 + $0x1518] sm:$0xff] %v814_v35  ;;  %v878_v35 = vld [vmem:[%s2544_s24 + $0x1718] sm:$0xff] }
 0x2ce   : > { %1839 = vst [vmem:[%s2553_s25 + $0x1520] sm:$0xff] %v815_v36  ;;  %v879_v36 = vld [vmem:[%s2544_s24 + $0x1720] sm:$0xff] }
 0x2cf   : > { %1840 = vst [vmem:[%s2553_s25 + $0x1528] sm:$0xff] %v816_v37  ;;  %v880_v37 = vld [vmem:[%s2544_s24 + $0x1728] sm:$0xff] }
 0x2d0   : > { %1841 = vst [vmem:[%s2553_s25 + $0x1530] sm:$0xff] %v817_v38  ;;  %v881_v38 = vld [vmem:[%s2544_s24 + $0x1730] sm:$0xff] }
 0x2d1   : > { %1842 = vst [vmem:[%s2553_s25 + $0x1538] sm:$0xff] %v818_v39  ;;  %v882_v39 = vld [vmem:[%s2544_s24 + $0x1738] sm:$0xff] }
 0x2d2   : > { %1843 = vst [vmem:[%s2553_s25 + $0x1540] sm:$0xff] %v819_v40  ;;  %v883_v40 = vld [vmem:[%s2544_s24 + $0x1740] sm:$0xff] }
 0x2d3   : > { %1844 = vst [vmem:[%s2553_s25 + $0x1548] sm:$0xff] %v820_v41  ;;  %v884_v41 = vld [vmem:[%s2544_s24 + $0x1748] sm:$0xff] }
 0x2d4   : > { %1845 = vst [vmem:[%s2553_s25 + $0x1550] sm:$0xff] %v821_v42  ;;  %v885_v42 = vld [vmem:[%s2544_s24 + $0x1750] sm:$0xff] }
 0x2d5   : > { %1846 = vst [vmem:[%s2553_s25 + $0x1558] sm:$0xff] %v822_v43  ;;  %v886_v43 = vld [vmem:[%s2544_s24 + $0x1758] sm:$0xff] }
 0x2d6   : > { %1847 = vst [vmem:[%s2553_s25 + $0x1560] sm:$0xff] %v823_v44  ;;  %v887_v44 = vld [vmem:[%s2544_s24 + $0x1760] sm:$0xff] }
 0x2d7   : > { %1848 = vst [vmem:[%s2553_s25 + $0x1568] sm:$0xff] %v824_v45  ;;  %v888_v45 = vld [vmem:[%s2544_s24 + $0x1768] sm:$0xff] }
 0x2d8   : > { %1849 = vst [vmem:[%s2553_s25 + $0x1570] sm:$0xff] %v825_v46  ;;  %v889_v46 = vld [vmem:[%s2544_s24 + $0x1770] sm:$0xff] }
 0x2d9   : > { %1850 = vst [vmem:[%s2553_s25 + $0x1578] sm:$0xff] %v826_v47  ;;  %v890_v47 = vld [vmem:[%s2544_s24 + $0x1778] sm:$0xff] }
 0x2da   : > { %1851 = vst [vmem:[%s2553_s25 + $0x1580] sm:$0xff] %v827_v48  ;;  %v891_v48 = vld [vmem:[%s2544_s24 + $0x1780] sm:$0xff] }
 0x2db   : > { %1852 = vst [vmem:[%s2553_s25 + $0x1588] sm:$0xff] %v828_v49  ;;  %v892_v49 = vld [vmem:[%s2544_s24 + $0x1788] sm:$0xff] }
 0x2dc   : > { %1853 = vst [vmem:[%s2553_s25 + $0x1590] sm:$0xff] %v829_v50  ;;  %v893_v50 = vld [vmem:[%s2544_s24 + $0x1790] sm:$0xff] }
 0x2dd   : > { %1854 = vst [vmem:[%s2553_s25 + $0x1598] sm:$0xff] %v830_v51  ;;  %v894_v51 = vld [vmem:[%s2544_s24 + $0x1798] sm:$0xff] }
 0x2de   : > { %1855 = vst [vmem:[%s2553_s25 + $0x15a0] sm:$0xff] %v831_v52  ;;  %v895_v52 = vld [vmem:[%s2544_s24 + $0x17a0] sm:$0xff] }
 0x2df   : > { %1856 = vst [vmem:[%s2553_s25 + $0x15a8] sm:$0xff] %v832_v53  ;;  %v896_v53 = vld [vmem:[%s2544_s24 + $0x17a8] sm:$0xff] }
 0x2e0   : > { %1857 = vst [vmem:[%s2553_s25 + $0x15b0] sm:$0xff] %v833_v54  ;;  %v897_v54 = vld [vmem:[%s2544_s24 + $0x17b0] sm:$0xff] }
 0x2e1   : > { %1858 = vst [vmem:[%s2553_s25 + $0x15b8] sm:$0xff] %v834_v55  ;;  %v898_v55 = vld [vmem:[%s2544_s24 + $0x17b8] sm:$0xff] }
 0x2e2   : > { %1859 = vst [vmem:[%s2553_s25 + $0x15c0] sm:$0xff] %v835_v56  ;;  %v899_v56 = vld [vmem:[%s2544_s24 + $0x17c0] sm:$0xff] }
 0x2e3   : > { %1860 = vst [vmem:[%s2553_s25 + $0x15c8] sm:$0xff] %v836_v57  ;;  %v900_v57 = vld [vmem:[%s2544_s24 + $0x17c8] sm:$0xff] }
 0x2e4   : > { %1861 = vst [vmem:[%s2553_s25 + $0x15d0] sm:$0xff] %v837_v58  ;;  %v901_v58 = vld [vmem:[%s2544_s24 + $0x17d0] sm:$0xff] }
 0x2e5   : > { %1862 = vst [vmem:[%s2553_s25 + $0x15d8] sm:$0xff] %v838_v59  ;;  %v902_v59 = vld [vmem:[%s2544_s24 + $0x17d8] sm:$0xff] }
 0x2e6   : > { %1863 = vst [vmem:[%s2553_s25 + $0x15e0] sm:$0xff] %v839_v60  ;;  %v903_v60 = vld [vmem:[%s2544_s24 + $0x17e0] sm:$0xff] }
 0x2e7   : > { %1864 = vst [vmem:[%s2553_s25 + $0x15e8] sm:$0xff] %v840_v61  ;;  %v904_v61 = vld [vmem:[%s2544_s24 + $0x17e8] sm:$0xff] }
 0x2e8   : > { %1865 = vst [vmem:[%s2553_s25 + $0x15f0] sm:$0xff] %v841_v62  ;;  %v905_v62 = vld [vmem:[%s2544_s24 + $0x17f0] sm:$0xff] }
 0x2e9   : > { %1866 = vst [vmem:[%s2553_s25 + $0x15f8] sm:$0xff] %v842_v63  ;;  %v906_v63 = vld [vmem:[%s2544_s24 + $0x17f8] sm:$0xff] }
 0x2ea   : > { %1867 = vst [vmem:[%s2553_s25 + $0x1600] sm:$0xff] %v843_v0  ;;  %v907_v0 = vld [vmem:[%s2544_s24 + $0x1800] sm:$0xff] }
 0x2eb   : > { %1868 = vst [vmem:[%s2553_s25 + $0x1608] sm:$0xff] %v844_v1  ;;  %v908_v1 = vld [vmem:[%s2544_s24 + $0x1808] sm:$0xff] }
 0x2ec   : > { %1869 = vst [vmem:[%s2553_s25 + $0x1610] sm:$0xff] %v845_v2  ;;  %v909_v2 = vld [vmem:[%s2544_s24 + $0x1810] sm:$0xff] }
 0x2ed   : > { %1870 = vst [vmem:[%s2553_s25 + $0x1618] sm:$0xff] %v846_v3  ;;  %v910_v3 = vld [vmem:[%s2544_s24 + $0x1818] sm:$0xff] }
 0x2ee   : > { %1871 = vst [vmem:[%s2553_s25 + $0x1620] sm:$0xff] %v847_v4  ;;  %v911_v4 = vld [vmem:[%s2544_s24 + $0x1820] sm:$0xff] }
 0x2ef   : > { %1872 = vst [vmem:[%s2553_s25 + $0x1628] sm:$0xff] %v848_v5  ;;  %v912_v5 = vld [vmem:[%s2544_s24 + $0x1828] sm:$0xff] }
 0x2f0   : > { %1873 = vst [vmem:[%s2553_s25 + $0x1630] sm:$0xff] %v849_v6  ;;  %v913_v6 = vld [vmem:[%s2544_s24 + $0x1830] sm:$0xff] }
 0x2f1   : > { %1874 = vst [vmem:[%s2553_s25 + $0x1638] sm:$0xff] %v850_v7  ;;  %v914_v7 = vld [vmem:[%s2544_s24 + $0x1838] sm:$0xff] }
 0x2f2   : > { %1875 = vst [vmem:[%s2553_s25 + $0x1640] sm:$0xff] %v851_v8  ;;  %v915_v8 = vld [vmem:[%s2544_s24 + $0x1840] sm:$0xff] }
 0x2f3   : > { %1876 = vst [vmem:[%s2553_s25 + $0x1648] sm:$0xff] %v852_v9  ;;  %v916_v9 = vld [vmem:[%s2544_s24 + $0x1848] sm:$0xff] }
 0x2f4   : > { %1877 = vst [vmem:[%s2553_s25 + $0x1650] sm:$0xff] %v853_v10  ;;  %v917_v10 = vld [vmem:[%s2544_s24 + $0x1850] sm:$0xff] }
 0x2f5   : > { %1878 = vst [vmem:[%s2553_s25 + $0x1658] sm:$0xff] %v854_v11  ;;  %v918_v11 = vld [vmem:[%s2544_s24 + $0x1858] sm:$0xff] }
 0x2f6   : > { %1879 = vst [vmem:[%s2553_s25 + $0x1660] sm:$0xff] %v855_v12  ;;  %v919_v12 = vld [vmem:[%s2544_s24 + $0x1860] sm:$0xff] }
 0x2f7   : > { %1880 = vst [vmem:[%s2553_s25 + $0x1668] sm:$0xff] %v856_v13  ;;  %v920_v13 = vld [vmem:[%s2544_s24 + $0x1868] sm:$0xff] }
 0x2f8   : > { %1881 = vst [vmem:[%s2553_s25 + $0x1670] sm:$0xff] %v857_v14  ;;  %v921_v14 = vld [vmem:[%s2544_s24 + $0x1870] sm:$0xff] }
 0x2f9   : > { %1882 = vst [vmem:[%s2553_s25 + $0x1678] sm:$0xff] %v858_v15  ;;  %v922_v15 = vld [vmem:[%s2544_s24 + $0x1878] sm:$0xff] }
 0x2fa   : > { %1883 = vst [vmem:[%s2553_s25 + $0x1680] sm:$0xff] %v859_v16  ;;  %v923_v16 = vld [vmem:[%s2544_s24 + $0x1880] sm:$0xff] }
 0x2fb   : > { %1884 = vst [vmem:[%s2553_s25 + $0x1688] sm:$0xff] %v860_v17  ;;  %v924_v17 = vld [vmem:[%s2544_s24 + $0x1888] sm:$0xff] }
 0x2fc   : > { %1885 = vst [vmem:[%s2553_s25 + $0x1690] sm:$0xff] %v861_v18  ;;  %v925_v18 = vld [vmem:[%s2544_s24 + $0x1890] sm:$0xff] }
 0x2fd   : > { %1886 = vst [vmem:[%s2553_s25 + $0x1698] sm:$0xff] %v862_v19  ;;  %v926_v19 = vld [vmem:[%s2544_s24 + $0x1898] sm:$0xff] }
 0x2fe   : > { %1887 = vst [vmem:[%s2553_s25 + $0x16a0] sm:$0xff] %v863_v20  ;;  %v927_v20 = vld [vmem:[%s2544_s24 + $0x18a0] sm:$0xff] }
 0x2ff   : > { %1888 = vst [vmem:[%s2553_s25 + $0x16a8] sm:$0xff] %v864_v21  ;;  %v928_v21 = vld [vmem:[%s2544_s24 + $0x18a8] sm:$0xff] }
 0x300   : > { %1889 = vst [vmem:[%s2553_s25 + $0x16b0] sm:$0xff] %v865_v22  ;;  %v929_v22 = vld [vmem:[%s2544_s24 + $0x18b0] sm:$0xff] }
 0x301   : > { %1890 = vst [vmem:[%s2553_s25 + $0x16b8] sm:$0xff] %v866_v23  ;;  %v930_v23 = vld [vmem:[%s2544_s24 + $0x18b8] sm:$0xff] }
 0x302   : > { %1891 = vst [vmem:[%s2553_s25 + $0x16c0] sm:$0xff] %v867_v24  ;;  %v931_v24 = vld [vmem:[%s2544_s24 + $0x18c0] sm:$0xff] }
 0x303   : > { %1892 = vst [vmem:[%s2553_s25 + $0x16c8] sm:$0xff] %v868_v25  ;;  %v932_v25 = vld [vmem:[%s2544_s24 + $0x18c8] sm:$0xff] }
 0x304   : > { %1893 = vst [vmem:[%s2553_s25 + $0x16d0] sm:$0xff] %v869_v26  ;;  %v933_v26 = vld [vmem:[%s2544_s24 + $0x18d0] sm:$0xff] }
 0x305   : > { %1894 = vst [vmem:[%s2553_s25 + $0x16d8] sm:$0xff] %v870_v27  ;;  %v934_v27 = vld [vmem:[%s2544_s24 + $0x18d8] sm:$0xff] }
 0x306   : > { %1895 = vst [vmem:[%s2553_s25 + $0x16e0] sm:$0xff] %v871_v28  ;;  %v935_v28 = vld [vmem:[%s2544_s24 + $0x18e0] sm:$0xff] }
 0x307   : > { %1896 = vst [vmem:[%s2553_s25 + $0x16e8] sm:$0xff] %v872_v29  ;;  %v936_v29 = vld [vmem:[%s2544_s24 + $0x18e8] sm:$0xff] }
 0x308   : > { %1897 = vst [vmem:[%s2553_s25 + $0x16f0] sm:$0xff] %v873_v30  ;;  %v937_v30 = vld [vmem:[%s2544_s24 + $0x18f0] sm:$0xff] }
 0x309   : > { %1898 = vst [vmem:[%s2553_s25 + $0x16f8] sm:$0xff] %v874_v31  ;;  %v938_v31 = vld [vmem:[%s2544_s24 + $0x18f8] sm:$0xff] }
 0x30a   : > { %1899 = vst [vmem:[%s2553_s25 + $0x1700] sm:$0xff] %v875_v32  ;;  %v939_v32 = vld [vmem:[%s2544_s24 + $0x1900] sm:$0xff] }
 0x30b   : > { %1900 = vst [vmem:[%s2553_s25 + $0x1708] sm:$0xff] %v876_v33  ;;  %v940_v33 = vld [vmem:[%s2544_s24 + $0x1908] sm:$0xff] }
 0x30c   : > { %1901 = vst [vmem:[%s2553_s25 + $0x1710] sm:$0xff] %v877_v34  ;;  %v941_v34 = vld [vmem:[%s2544_s24 + $0x1910] sm:$0xff] }
 0x30d   : > { %1902 = vst [vmem:[%s2553_s25 + $0x1718] sm:$0xff] %v878_v35  ;;  %v942_v35 = vld [vmem:[%s2544_s24 + $0x1918] sm:$0xff] }
 0x30e   : > { %1903 = vst [vmem:[%s2553_s25 + $0x1720] sm:$0xff] %v879_v36  ;;  %v943_v36 = vld [vmem:[%s2544_s24 + $0x1920] sm:$0xff] }
 0x30f   : > { %1904 = vst [vmem:[%s2553_s25 + $0x1728] sm:$0xff] %v880_v37  ;;  %v944_v37 = vld [vmem:[%s2544_s24 + $0x1928] sm:$0xff] }
 0x310   : > { %1905 = vst [vmem:[%s2553_s25 + $0x1730] sm:$0xff] %v881_v38  ;;  %v945_v38 = vld [vmem:[%s2544_s24 + $0x1930] sm:$0xff] }
 0x311   : > { %1906 = vst [vmem:[%s2553_s25 + $0x1738] sm:$0xff] %v882_v39  ;;  %v946_v39 = vld [vmem:[%s2544_s24 + $0x1938] sm:$0xff] }
 0x312   : > { %1907 = vst [vmem:[%s2553_s25 + $0x1740] sm:$0xff] %v883_v40  ;;  %v947_v40 = vld [vmem:[%s2544_s24 + $0x1940] sm:$0xff] }
 0x313   : > { %1908 = vst [vmem:[%s2553_s25 + $0x1748] sm:$0xff] %v884_v41  ;;  %v948_v41 = vld [vmem:[%s2544_s24 + $0x1948] sm:$0xff] }
 0x314   : > { %1909 = vst [vmem:[%s2553_s25 + $0x1750] sm:$0xff] %v885_v42  ;;  %v949_v42 = vld [vmem:[%s2544_s24 + $0x1950] sm:$0xff] }
 0x315   : > { %1910 = vst [vmem:[%s2553_s25 + $0x1758] sm:$0xff] %v886_v43  ;;  %v950_v43 = vld [vmem:[%s2544_s24 + $0x1958] sm:$0xff] }
 0x316   : > { %1911 = vst [vmem:[%s2553_s25 + $0x1760] sm:$0xff] %v887_v44  ;;  %v951_v44 = vld [vmem:[%s2544_s24 + $0x1960] sm:$0xff] }
 0x317   : > { %1912 = vst [vmem:[%s2553_s25 + $0x1768] sm:$0xff] %v888_v45  ;;  %v952_v45 = vld [vmem:[%s2544_s24 + $0x1968] sm:$0xff] }
 0x318   : > { %1913 = vst [vmem:[%s2553_s25 + $0x1770] sm:$0xff] %v889_v46  ;;  %v953_v46 = vld [vmem:[%s2544_s24 + $0x1970] sm:$0xff] }
 0x319   : > { %1914 = vst [vmem:[%s2553_s25 + $0x1778] sm:$0xff] %v890_v47  ;;  %v954_v47 = vld [vmem:[%s2544_s24 + $0x1978] sm:$0xff] }
 0x31a   : > { %1915 = vst [vmem:[%s2553_s25 + $0x1780] sm:$0xff] %v891_v48  ;;  %v955_v48 = vld [vmem:[%s2544_s24 + $0x1980] sm:$0xff] }
 0x31b   : > { %1916 = vst [vmem:[%s2553_s25 + $0x1788] sm:$0xff] %v892_v49  ;;  %v956_v49 = vld [vmem:[%s2544_s24 + $0x1988] sm:$0xff] }
 0x31c   : > { %1917 = vst [vmem:[%s2553_s25 + $0x1790] sm:$0xff] %v893_v50  ;;  %v957_v50 = vld [vmem:[%s2544_s24 + $0x1990] sm:$0xff] }
 0x31d   : > { %1918 = vst [vmem:[%s2553_s25 + $0x1798] sm:$0xff] %v894_v51  ;;  %v958_v51 = vld [vmem:[%s2544_s24 + $0x1998] sm:$0xff] }
 0x31e   : > { %1919 = vst [vmem:[%s2553_s25 + $0x17a0] sm:$0xff] %v895_v52  ;;  %v959_v52 = vld [vmem:[%s2544_s24 + $0x19a0] sm:$0xff] }
 0x31f   : > { %1920 = vst [vmem:[%s2553_s25 + $0x17a8] sm:$0xff] %v896_v53  ;;  %v960_v53 = vld [vmem:[%s2544_s24 + $0x19a8] sm:$0xff] }
 0x320   : > { %1921 = vst [vmem:[%s2553_s25 + $0x17b0] sm:$0xff] %v897_v54  ;;  %v961_v54 = vld [vmem:[%s2544_s24 + $0x19b0] sm:$0xff] }
 0x321   : > { %1922 = vst [vmem:[%s2553_s25 + $0x17b8] sm:$0xff] %v898_v55  ;;  %v962_v55 = vld [vmem:[%s2544_s24 + $0x19b8] sm:$0xff] }
 0x322   : > { %1923 = vst [vmem:[%s2553_s25 + $0x17c0] sm:$0xff] %v899_v56  ;;  %v963_v56 = vld [vmem:[%s2544_s24 + $0x19c0] sm:$0xff] }
 0x323   : > { %1924 = vst [vmem:[%s2553_s25 + $0x17c8] sm:$0xff] %v900_v57  ;;  %v964_v57 = vld [vmem:[%s2544_s24 + $0x19c8] sm:$0xff] }
 0x324   : > { %1925 = vst [vmem:[%s2553_s25 + $0x17d0] sm:$0xff] %v901_v58  ;;  %v965_v58 = vld [vmem:[%s2544_s24 + $0x19d0] sm:$0xff] }
 0x325   : > { %1926 = vst [vmem:[%s2553_s25 + $0x17d8] sm:$0xff] %v902_v59  ;;  %v966_v59 = vld [vmem:[%s2544_s24 + $0x19d8] sm:$0xff] }
 0x326   : > { %1927 = vst [vmem:[%s2553_s25 + $0x17e0] sm:$0xff] %v903_v60  ;;  %v967_v60 = vld [vmem:[%s2544_s24 + $0x19e0] sm:$0xff] }
 0x327   : > { %1928 = vst [vmem:[%s2553_s25 + $0x17e8] sm:$0xff] %v904_v61  ;;  %v968_v61 = vld [vmem:[%s2544_s24 + $0x19e8] sm:$0xff] }
 0x328   : > { %1929 = vst [vmem:[%s2553_s25 + $0x17f0] sm:$0xff] %v905_v62  ;;  %v969_v62 = vld [vmem:[%s2544_s24 + $0x19f0] sm:$0xff] }
 0x329   : > { %1930 = vst [vmem:[%s2553_s25 + $0x17f8] sm:$0xff] %v906_v63  ;;  %v970_v63 = vld [vmem:[%s2544_s24 + $0x19f8] sm:$0xff] }
 0x32a   : > { %1931 = vst [vmem:[%s2553_s25 + $0x1800] sm:$0xff] %v907_v0  ;;  %v971_v0 = vld [vmem:[%s2544_s24 + $0x1a00] sm:$0xff] }
 0x32b   : > { %1932 = vst [vmem:[%s2553_s25 + $0x1808] sm:$0xff] %v908_v1  ;;  %v972_v1 = vld [vmem:[%s2544_s24 + $0x1a08] sm:$0xff] }
 0x32c   : > { %1933 = vst [vmem:[%s2553_s25 + $0x1810] sm:$0xff] %v909_v2  ;;  %v973_v2 = vld [vmem:[%s2544_s24 + $0x1a10] sm:$0xff] }
 0x32d   : > { %1934 = vst [vmem:[%s2553_s25 + $0x1818] sm:$0xff] %v910_v3  ;;  %v974_v3 = vld [vmem:[%s2544_s24 + $0x1a18] sm:$0xff] }
 0x32e   : > { %1935 = vst [vmem:[%s2553_s25 + $0x1820] sm:$0xff] %v911_v4  ;;  %v975_v4 = vld [vmem:[%s2544_s24 + $0x1a20] sm:$0xff] }
 0x32f   : > { %1936 = vst [vmem:[%s2553_s25 + $0x1828] sm:$0xff] %v912_v5  ;;  %v976_v5 = vld [vmem:[%s2544_s24 + $0x1a28] sm:$0xff] }
 0x330   : > { %1937 = vst [vmem:[%s2553_s25 + $0x1830] sm:$0xff] %v913_v6  ;;  %v977_v6 = vld [vmem:[%s2544_s24 + $0x1a30] sm:$0xff] }
 0x331   : > { %1938 = vst [vmem:[%s2553_s25 + $0x1838] sm:$0xff] %v914_v7  ;;  %v978_v7 = vld [vmem:[%s2544_s24 + $0x1a38] sm:$0xff] }
 0x332   : > { %1939 = vst [vmem:[%s2553_s25 + $0x1840] sm:$0xff] %v915_v8  ;;  %v979_v8 = vld [vmem:[%s2544_s24 + $0x1a40] sm:$0xff] }
 0x333   : > { %1940 = vst [vmem:[%s2553_s25 + $0x1848] sm:$0xff] %v916_v9  ;;  %v980_v9 = vld [vmem:[%s2544_s24 + $0x1a48] sm:$0xff] }
 0x334   : > { %1941 = vst [vmem:[%s2553_s25 + $0x1850] sm:$0xff] %v917_v10  ;;  %v981_v10 = vld [vmem:[%s2544_s24 + $0x1a50] sm:$0xff] }
 0x335   : > { %1942 = vst [vmem:[%s2553_s25 + $0x1858] sm:$0xff] %v918_v11  ;;  %v982_v11 = vld [vmem:[%s2544_s24 + $0x1a58] sm:$0xff] }
 0x336   : > { %1943 = vst [vmem:[%s2553_s25 + $0x1860] sm:$0xff] %v919_v12  ;;  %v983_v12 = vld [vmem:[%s2544_s24 + $0x1a60] sm:$0xff] }
 0x337   : > { %1944 = vst [vmem:[%s2553_s25 + $0x1868] sm:$0xff] %v920_v13  ;;  %v984_v13 = vld [vmem:[%s2544_s24 + $0x1a68] sm:$0xff] }
 0x338   : > { %1945 = vst [vmem:[%s2553_s25 + $0x1870] sm:$0xff] %v921_v14  ;;  %v985_v14 = vld [vmem:[%s2544_s24 + $0x1a70] sm:$0xff] }
 0x339   : > { %1946 = vst [vmem:[%s2553_s25 + $0x1878] sm:$0xff] %v922_v15  ;;  %v986_v15 = vld [vmem:[%s2544_s24 + $0x1a78] sm:$0xff] }
 0x33a   : > { %1947 = vst [vmem:[%s2553_s25 + $0x1880] sm:$0xff] %v923_v16  ;;  %v987_v16 = vld [vmem:[%s2544_s24 + $0x1a80] sm:$0xff] }
 0x33b   : > { %1948 = vst [vmem:[%s2553_s25 + $0x1888] sm:$0xff] %v924_v17  ;;  %v988_v17 = vld [vmem:[%s2544_s24 + $0x1a88] sm:$0xff] }
 0x33c   : > { %1949 = vst [vmem:[%s2553_s25 + $0x1890] sm:$0xff] %v925_v18  ;;  %v989_v18 = vld [vmem:[%s2544_s24 + $0x1a90] sm:$0xff] }
 0x33d   : > { %1950 = vst [vmem:[%s2553_s25 + $0x1898] sm:$0xff] %v926_v19  ;;  %v990_v19 = vld [vmem:[%s2544_s24 + $0x1a98] sm:$0xff] }
 0x33e   : > { %1951 = vst [vmem:[%s2553_s25 + $0x18a0] sm:$0xff] %v927_v20  ;;  %v991_v20 = vld [vmem:[%s2544_s24 + $0x1aa0] sm:$0xff] }
 0x33f   : > { %1952 = vst [vmem:[%s2553_s25 + $0x18a8] sm:$0xff] %v928_v21  ;;  %v992_v21 = vld [vmem:[%s2544_s24 + $0x1aa8] sm:$0xff] }
 0x340   : > { %1953 = vst [vmem:[%s2553_s25 + $0x18b0] sm:$0xff] %v929_v22  ;;  %v993_v22 = vld [vmem:[%s2544_s24 + $0x1ab0] sm:$0xff] }
 0x341   : > { %1954 = vst [vmem:[%s2553_s25 + $0x18b8] sm:$0xff] %v930_v23  ;;  %v994_v23 = vld [vmem:[%s2544_s24 + $0x1ab8] sm:$0xff] }
 0x342   : > { %1955 = vst [vmem:[%s2553_s25 + $0x18c0] sm:$0xff] %v931_v24  ;;  %v995_v24 = vld [vmem:[%s2544_s24 + $0x1ac0] sm:$0xff] }
 0x343   : > { %1956 = vst [vmem:[%s2553_s25 + $0x18c8] sm:$0xff] %v932_v25  ;;  %v996_v25 = vld [vmem:[%s2544_s24 + $0x1ac8] sm:$0xff] }
 0x344   : > { %1957 = vst [vmem:[%s2553_s25 + $0x18d0] sm:$0xff] %v933_v26  ;;  %v997_v26 = vld [vmem:[%s2544_s24 + $0x1ad0] sm:$0xff] }
 0x345   : > { %1958 = vst [vmem:[%s2553_s25 + $0x18d8] sm:$0xff] %v934_v27  ;;  %v998_v27 = vld [vmem:[%s2544_s24 + $0x1ad8] sm:$0xff] }
 0x346   : > { %1959 = vst [vmem:[%s2553_s25 + $0x18e0] sm:$0xff] %v935_v28  ;;  %v999_v28 = vld [vmem:[%s2544_s24 + $0x1ae0] sm:$0xff] }
 0x347   : > { %1960 = vst [vmem:[%s2553_s25 + $0x18e8] sm:$0xff] %v936_v29  ;;  %v1000_v29 = vld [vmem:[%s2544_s24 + $0x1ae8] sm:$0xff] }
 0x348   : > { %1961 = vst [vmem:[%s2553_s25 + $0x18f0] sm:$0xff] %v937_v30  ;;  %v1001_v30 = vld [vmem:[%s2544_s24 + $0x1af0] sm:$0xff] }
 0x349   : > { %1962 = vst [vmem:[%s2553_s25 + $0x18f8] sm:$0xff] %v938_v31  ;;  %v1002_v31 = vld [vmem:[%s2544_s24 + $0x1af8] sm:$0xff] }
 0x34a   : > { %1963 = vst [vmem:[%s2553_s25 + $0x1900] sm:$0xff] %v939_v32  ;;  %v1003_v32 = vld [vmem:[%s2544_s24 + $0x1b00] sm:$0xff] }
 0x34b   : > { %1964 = vst [vmem:[%s2553_s25 + $0x1908] sm:$0xff] %v940_v33  ;;  %v1004_v33 = vld [vmem:[%s2544_s24 + $0x1b08] sm:$0xff] }
 0x34c   : > { %1965 = vst [vmem:[%s2553_s25 + $0x1910] sm:$0xff] %v941_v34  ;;  %v1005_v34 = vld [vmem:[%s2544_s24 + $0x1b10] sm:$0xff] }
 0x34d   : > { %1966 = vst [vmem:[%s2553_s25 + $0x1918] sm:$0xff] %v942_v35  ;;  %v1006_v35 = vld [vmem:[%s2544_s24 + $0x1b18] sm:$0xff] }
 0x34e   : > { %1967 = vst [vmem:[%s2553_s25 + $0x1920] sm:$0xff] %v943_v36  ;;  %v1007_v36 = vld [vmem:[%s2544_s24 + $0x1b20] sm:$0xff] }
 0x34f   : > { %1968 = vst [vmem:[%s2553_s25 + $0x1928] sm:$0xff] %v944_v37  ;;  %v1008_v37 = vld [vmem:[%s2544_s24 + $0x1b28] sm:$0xff] }
 0x350   : > { %1969 = vst [vmem:[%s2553_s25 + $0x1930] sm:$0xff] %v945_v38  ;;  %v1009_v38 = vld [vmem:[%s2544_s24 + $0x1b30] sm:$0xff] }
 0x351   : > { %1970 = vst [vmem:[%s2553_s25 + $0x1938] sm:$0xff] %v946_v39  ;;  %v1010_v39 = vld [vmem:[%s2544_s24 + $0x1b38] sm:$0xff] }
 0x352   : > { %1971 = vst [vmem:[%s2553_s25 + $0x1940] sm:$0xff] %v947_v40  ;;  %v1011_v40 = vld [vmem:[%s2544_s24 + $0x1b40] sm:$0xff] }
 0x353   : > { %1972 = vst [vmem:[%s2553_s25 + $0x1948] sm:$0xff] %v948_v41  ;;  %v1012_v41 = vld [vmem:[%s2544_s24 + $0x1b48] sm:$0xff] }
 0x354   : > { %1973 = vst [vmem:[%s2553_s25 + $0x1950] sm:$0xff] %v949_v42  ;;  %v1013_v42 = vld [vmem:[%s2544_s24 + $0x1b50] sm:$0xff] }
 0x355   : > { %1974 = vst [vmem:[%s2553_s25 + $0x1958] sm:$0xff] %v950_v43  ;;  %v1014_v43 = vld [vmem:[%s2544_s24 + $0x1b58] sm:$0xff] }
 0x356   : > { %1975 = vst [vmem:[%s2553_s25 + $0x1960] sm:$0xff] %v951_v44  ;;  %v1015_v44 = vld [vmem:[%s2544_s24 + $0x1b60] sm:$0xff] }
 0x357   : > { %1976 = vst [vmem:[%s2553_s25 + $0x1968] sm:$0xff] %v952_v45  ;;  %v1016_v45 = vld [vmem:[%s2544_s24 + $0x1b68] sm:$0xff] }
 0x358   : > { %1977 = vst [vmem:[%s2553_s25 + $0x1970] sm:$0xff] %v953_v46  ;;  %v1017_v46 = vld [vmem:[%s2544_s24 + $0x1b70] sm:$0xff] }
 0x359   : > { %1978 = vst [vmem:[%s2553_s25 + $0x1978] sm:$0xff] %v954_v47  ;;  %v1018_v47 = vld [vmem:[%s2544_s24 + $0x1b78] sm:$0xff] }
 0x35a   : > { %1979 = vst [vmem:[%s2553_s25 + $0x1980] sm:$0xff] %v955_v48  ;;  %v1019_v48 = vld [vmem:[%s2544_s24 + $0x1b80] sm:$0xff] }
 0x35b   : > { %1980 = vst [vmem:[%s2553_s25 + $0x1988] sm:$0xff] %v956_v49  ;;  %v1020_v49 = vld [vmem:[%s2544_s24 + $0x1b88] sm:$0xff] }
 0x35c   : > { %1981 = vst [vmem:[%s2553_s25 + $0x1990] sm:$0xff] %v957_v50  ;;  %v1021_v50 = vld [vmem:[%s2544_s24 + $0x1b90] sm:$0xff] }
 0x35d   : > { %1982 = vst [vmem:[%s2553_s25 + $0x1998] sm:$0xff] %v958_v51  ;;  %v1022_v51 = vld [vmem:[%s2544_s24 + $0x1b98] sm:$0xff] }
 0x35e   : > { %1983 = vst [vmem:[%s2553_s25 + $0x19a0] sm:$0xff] %v959_v52  ;;  %v1023_v52 = vld [vmem:[%s2544_s24 + $0x1ba0] sm:$0xff] }
 0x35f   : > { %1984 = vst [vmem:[%s2553_s25 + $0x19a8] sm:$0xff] %v960_v53  ;;  %v1024_v53 = vld [vmem:[%s2544_s24 + $0x1ba8] sm:$0xff] }
 0x360   : > { %1985 = vst [vmem:[%s2553_s25 + $0x19b0] sm:$0xff] %v961_v54  ;;  %v1025_v54 = vld [vmem:[%s2544_s24 + $0x1bb0] sm:$0xff] }
 0x361   : > { %1986 = vst [vmem:[%s2553_s25 + $0x19b8] sm:$0xff] %v962_v55  ;;  %v1026_v55 = vld [vmem:[%s2544_s24 + $0x1bb8] sm:$0xff] }
 0x362   : > { %1987 = vst [vmem:[%s2553_s25 + $0x19c0] sm:$0xff] %v963_v56  ;;  %v1027_v56 = vld [vmem:[%s2544_s24 + $0x1bc0] sm:$0xff] }
 0x363   : > { %1988 = vst [vmem:[%s2553_s25 + $0x19c8] sm:$0xff] %v964_v57  ;;  %v1028_v57 = vld [vmem:[%s2544_s24 + $0x1bc8] sm:$0xff] }
 0x364   : > { %1989 = vst [vmem:[%s2553_s25 + $0x19d0] sm:$0xff] %v965_v58  ;;  %v1029_v58 = vld [vmem:[%s2544_s24 + $0x1bd0] sm:$0xff] }
 0x365   : > { %1990 = vst [vmem:[%s2553_s25 + $0x19d8] sm:$0xff] %v966_v59  ;;  %v1030_v59 = vld [vmem:[%s2544_s24 + $0x1bd8] sm:$0xff] }
 0x366   : > { %1991 = vst [vmem:[%s2553_s25 + $0x19e0] sm:$0xff] %v967_v60  ;;  %v1031_v60 = vld [vmem:[%s2544_s24 + $0x1be0] sm:$0xff] }
 0x367   : > { %1992 = vst [vmem:[%s2553_s25 + $0x19e8] sm:$0xff] %v968_v61  ;;  %v1032_v61 = vld [vmem:[%s2544_s24 + $0x1be8] sm:$0xff] }
 0x368   : > { %1993 = vst [vmem:[%s2553_s25 + $0x19f0] sm:$0xff] %v969_v62  ;;  %v1033_v62 = vld [vmem:[%s2544_s24 + $0x1bf0] sm:$0xff] }
 0x369   : > { %1994 = vst [vmem:[%s2553_s25 + $0x19f8] sm:$0xff] %v970_v63  ;;  %v1034_v63 = vld [vmem:[%s2544_s24 + $0x1bf8] sm:$0xff] }
 0x36a   : > { %1995 = vst [vmem:[%s2553_s25 + $0x1a00] sm:$0xff] %v971_v0  ;;  %v1035_v0 = vld [vmem:[%s2544_s24 + $0x1c00] sm:$0xff] }
 0x36b   : > { %1996 = vst [vmem:[%s2553_s25 + $0x1a08] sm:$0xff] %v972_v1  ;;  %v1036_v1 = vld [vmem:[%s2544_s24 + $0x1c08] sm:$0xff] }
 0x36c   : > { %1997 = vst [vmem:[%s2553_s25 + $0x1a10] sm:$0xff] %v973_v2  ;;  %v1037_v2 = vld [vmem:[%s2544_s24 + $0x1c10] sm:$0xff] }
 0x36d   : > { %1998 = vst [vmem:[%s2553_s25 + $0x1a18] sm:$0xff] %v974_v3  ;;  %v1038_v3 = vld [vmem:[%s2544_s24 + $0x1c18] sm:$0xff] }
 0x36e   : > { %1999 = vst [vmem:[%s2553_s25 + $0x1a20] sm:$0xff] %v975_v4  ;;  %v1039_v4 = vld [vmem:[%s2544_s24 + $0x1c20] sm:$0xff] }
 0x36f   : > { %2000 = vst [vmem:[%s2553_s25 + $0x1a28] sm:$0xff] %v976_v5  ;;  %v1040_v5 = vld [vmem:[%s2544_s24 + $0x1c28] sm:$0xff] }
 0x370   : > { %2001 = vst [vmem:[%s2553_s25 + $0x1a30] sm:$0xff] %v977_v6  ;;  %v1041_v6 = vld [vmem:[%s2544_s24 + $0x1c30] sm:$0xff] }
 0x371   : > { %2002 = vst [vmem:[%s2553_s25 + $0x1a38] sm:$0xff] %v978_v7  ;;  %v1042_v7 = vld [vmem:[%s2544_s24 + $0x1c38] sm:$0xff] }
 0x372   : > { %2003 = vst [vmem:[%s2553_s25 + $0x1a40] sm:$0xff] %v979_v8  ;;  %v1043_v8 = vld [vmem:[%s2544_s24 + $0x1c40] sm:$0xff] }
 0x373   : > { %2004 = vst [vmem:[%s2553_s25 + $0x1a48] sm:$0xff] %v980_v9  ;;  %v1044_v9 = vld [vmem:[%s2544_s24 + $0x1c48] sm:$0xff] }
 0x374   : > { %2005 = vst [vmem:[%s2553_s25 + $0x1a50] sm:$0xff] %v981_v10  ;;  %v1045_v10 = vld [vmem:[%s2544_s24 + $0x1c50] sm:$0xff] }
 0x375   : > { %2006 = vst [vmem:[%s2553_s25 + $0x1a58] sm:$0xff] %v982_v11  ;;  %v1046_v11 = vld [vmem:[%s2544_s24 + $0x1c58] sm:$0xff] }
 0x376   : > { %2007 = vst [vmem:[%s2553_s25 + $0x1a60] sm:$0xff] %v983_v12  ;;  %v1047_v12 = vld [vmem:[%s2544_s24 + $0x1c60] sm:$0xff] }
 0x377   : > { %2008 = vst [vmem:[%s2553_s25 + $0x1a68] sm:$0xff] %v984_v13  ;;  %v1048_v13 = vld [vmem:[%s2544_s24 + $0x1c68] sm:$0xff] }
 0x378   : > { %2009 = vst [vmem:[%s2553_s25 + $0x1a70] sm:$0xff] %v985_v14  ;;  %v1049_v14 = vld [vmem:[%s2544_s24 + $0x1c70] sm:$0xff] }
 0x379   : > { %2010 = vst [vmem:[%s2553_s25 + $0x1a78] sm:$0xff] %v986_v15  ;;  %v1050_v15 = vld [vmem:[%s2544_s24 + $0x1c78] sm:$0xff] }
 0x37a   : > { %2011 = vst [vmem:[%s2553_s25 + $0x1a80] sm:$0xff] %v987_v16  ;;  %v1051_v16 = vld [vmem:[%s2544_s24 + $0x1c80] sm:$0xff] }
 0x37b   : > { %2012 = vst [vmem:[%s2553_s25 + $0x1a88] sm:$0xff] %v988_v17  ;;  %v1052_v17 = vld [vmem:[%s2544_s24 + $0x1c88] sm:$0xff] }
 0x37c   : > { %2013 = vst [vmem:[%s2553_s25 + $0x1a90] sm:$0xff] %v989_v18  ;;  %v1053_v18 = vld [vmem:[%s2544_s24 + $0x1c90] sm:$0xff] }
 0x37d   : > { %2014 = vst [vmem:[%s2553_s25 + $0x1a98] sm:$0xff] %v990_v19  ;;  %v1054_v19 = vld [vmem:[%s2544_s24 + $0x1c98] sm:$0xff] }
 0x37e   : > { %2015 = vst [vmem:[%s2553_s25 + $0x1aa0] sm:$0xff] %v991_v20  ;;  %v1055_v20 = vld [vmem:[%s2544_s24 + $0x1ca0] sm:$0xff] }
 0x37f   : > { %2016 = vst [vmem:[%s2553_s25 + $0x1aa8] sm:$0xff] %v992_v21  ;;  %v1056_v21 = vld [vmem:[%s2544_s24 + $0x1ca8] sm:$0xff] }
 0x380   : > { %2017 = vst [vmem:[%s2553_s25 + $0x1ab0] sm:$0xff] %v993_v22  ;;  %v1057_v22 = vld [vmem:[%s2544_s24 + $0x1cb0] sm:$0xff] }
 0x381   : > { %2018 = vst [vmem:[%s2553_s25 + $0x1ab8] sm:$0xff] %v994_v23  ;;  %v1058_v23 = vld [vmem:[%s2544_s24 + $0x1cb8] sm:$0xff] }
 0x382   : > { %2019 = vst [vmem:[%s2553_s25 + $0x1ac0] sm:$0xff] %v995_v24  ;;  %v1059_v24 = vld [vmem:[%s2544_s24 + $0x1cc0] sm:$0xff] }
 0x383   : > { %2020 = vst [vmem:[%s2553_s25 + $0x1ac8] sm:$0xff] %v996_v25  ;;  %v1060_v25 = vld [vmem:[%s2544_s24 + $0x1cc8] sm:$0xff] }
 0x384   : > { %2021 = vst [vmem:[%s2553_s25 + $0x1ad0] sm:$0xff] %v997_v26  ;;  %v1061_v26 = vld [vmem:[%s2544_s24 + $0x1cd0] sm:$0xff] }
 0x385   : > { %2022 = vst [vmem:[%s2553_s25 + $0x1ad8] sm:$0xff] %v998_v27  ;;  %v1062_v27 = vld [vmem:[%s2544_s24 + $0x1cd8] sm:$0xff] }
 0x386   : > { %2023 = vst [vmem:[%s2553_s25 + $0x1ae0] sm:$0xff] %v999_v28  ;;  %v1063_v28 = vld [vmem:[%s2544_s24 + $0x1ce0] sm:$0xff] }
 0x387   : > { %2024 = vst [vmem:[%s2553_s25 + $0x1ae8] sm:$0xff] %v1000_v29  ;;  %v1064_v29 = vld [vmem:[%s2544_s24 + $0x1ce8] sm:$0xff] }
 0x388   : > { %2025 = vst [vmem:[%s2553_s25 + $0x1af0] sm:$0xff] %v1001_v30  ;;  %v1065_v30 = vld [vmem:[%s2544_s24 + $0x1cf0] sm:$0xff] }
 0x389   : > { %2026 = vst [vmem:[%s2553_s25 + $0x1af8] sm:$0xff] %v1002_v31  ;;  %v1066_v31 = vld [vmem:[%s2544_s24 + $0x1cf8] sm:$0xff] }
 0x38a   : > { %2027 = vst [vmem:[%s2553_s25 + $0x1b00] sm:$0xff] %v1003_v32  ;;  %v1067_v32 = vld [vmem:[%s2544_s24 + $0x1d00] sm:$0xff] }
 0x38b   : > { %2028 = vst [vmem:[%s2553_s25 + $0x1b08] sm:$0xff] %v1004_v33  ;;  %v1068_v33 = vld [vmem:[%s2544_s24 + $0x1d08] sm:$0xff] }
 0x38c   : > { %2029 = vst [vmem:[%s2553_s25 + $0x1b10] sm:$0xff] %v1005_v34  ;;  %v1069_v34 = vld [vmem:[%s2544_s24 + $0x1d10] sm:$0xff] }
 0x38d   : > { %2030 = vst [vmem:[%s2553_s25 + $0x1b18] sm:$0xff] %v1006_v35  ;;  %v1070_v35 = vld [vmem:[%s2544_s24 + $0x1d18] sm:$0xff] }
 0x38e   : > { %2031 = vst [vmem:[%s2553_s25 + $0x1b20] sm:$0xff] %v1007_v36  ;;  %v1071_v36 = vld [vmem:[%s2544_s24 + $0x1d20] sm:$0xff] }
 0x38f   : > { %2032 = vst [vmem:[%s2553_s25 + $0x1b28] sm:$0xff] %v1008_v37  ;;  %v1072_v37 = vld [vmem:[%s2544_s24 + $0x1d28] sm:$0xff] }
 0x390   : > { %2033 = vst [vmem:[%s2553_s25 + $0x1b30] sm:$0xff] %v1009_v38  ;;  %v1073_v38 = vld [vmem:[%s2544_s24 + $0x1d30] sm:$0xff] }
 0x391   : > { %2034 = vst [vmem:[%s2553_s25 + $0x1b38] sm:$0xff] %v1010_v39  ;;  %v1074_v39 = vld [vmem:[%s2544_s24 + $0x1d38] sm:$0xff] }
 0x392   : > { %2035 = vst [vmem:[%s2553_s25 + $0x1b40] sm:$0xff] %v1011_v40  ;;  %v1075_v40 = vld [vmem:[%s2544_s24 + $0x1d40] sm:$0xff] }
 0x393   : > { %2036 = vst [vmem:[%s2553_s25 + $0x1b48] sm:$0xff] %v1012_v41  ;;  %v1076_v41 = vld [vmem:[%s2544_s24 + $0x1d48] sm:$0xff] }
 0x394   : > { %2037 = vst [vmem:[%s2553_s25 + $0x1b50] sm:$0xff] %v1013_v42  ;;  %v1077_v42 = vld [vmem:[%s2544_s24 + $0x1d50] sm:$0xff] }
 0x395   : > { %2038 = vst [vmem:[%s2553_s25 + $0x1b58] sm:$0xff] %v1014_v43  ;;  %v1078_v43 = vld [vmem:[%s2544_s24 + $0x1d58] sm:$0xff] }
 0x396   : > { %2039 = vst [vmem:[%s2553_s25 + $0x1b60] sm:$0xff] %v1015_v44  ;;  %v1079_v44 = vld [vmem:[%s2544_s24 + $0x1d60] sm:$0xff] }
 0x397   : > { %2040 = vst [vmem:[%s2553_s25 + $0x1b68] sm:$0xff] %v1016_v45  ;;  %v1080_v45 = vld [vmem:[%s2544_s24 + $0x1d68] sm:$0xff] }
 0x398   : > { %2041 = vst [vmem:[%s2553_s25 + $0x1b70] sm:$0xff] %v1017_v46  ;;  %v1081_v46 = vld [vmem:[%s2544_s24 + $0x1d70] sm:$0xff] }
 0x399   : > { %2042 = vst [vmem:[%s2553_s25 + $0x1b78] sm:$0xff] %v1018_v47  ;;  %v1082_v47 = vld [vmem:[%s2544_s24 + $0x1d78] sm:$0xff] }
 0x39a   : > { %2043 = vst [vmem:[%s2553_s25 + $0x1b80] sm:$0xff] %v1019_v48  ;;  %v1083_v48 = vld [vmem:[%s2544_s24 + $0x1d80] sm:$0xff] }
 0x39b   : > { %2044 = vst [vmem:[%s2553_s25 + $0x1b88] sm:$0xff] %v1020_v49  ;;  %v1084_v49 = vld [vmem:[%s2544_s24 + $0x1d88] sm:$0xff] }
 0x39c   : > { %2045 = vst [vmem:[%s2553_s25 + $0x1b90] sm:$0xff] %v1021_v50  ;;  %v1085_v50 = vld [vmem:[%s2544_s24 + $0x1d90] sm:$0xff] }
 0x39d   : > { %2046 = vst [vmem:[%s2553_s25 + $0x1b98] sm:$0xff] %v1022_v51  ;;  %v1086_v51 = vld [vmem:[%s2544_s24 + $0x1d98] sm:$0xff] }
 0x39e   : > { %2047 = vst [vmem:[%s2553_s25 + $0x1ba0] sm:$0xff] %v1023_v52  ;;  %v1087_v52 = vld [vmem:[%s2544_s24 + $0x1da0] sm:$0xff] }
 0x39f   : > { %2048 = vst [vmem:[%s2553_s25 + $0x1ba8] sm:$0xff] %v1024_v53  ;;  %v1088_v53 = vld [vmem:[%s2544_s24 + $0x1da8] sm:$0xff] }
 0x3a0   : > { %2049 = vst [vmem:[%s2553_s25 + $0x1bb0] sm:$0xff] %v1025_v54  ;;  %v1089_v54 = vld [vmem:[%s2544_s24 + $0x1db0] sm:$0xff] }
 0x3a1   : > { %2050 = vst [vmem:[%s2553_s25 + $0x1bb8] sm:$0xff] %v1026_v55  ;;  %v1090_v55 = vld [vmem:[%s2544_s24 + $0x1db8] sm:$0xff] }
 0x3a2   : > { %2051 = vst [vmem:[%s2553_s25 + $0x1bc0] sm:$0xff] %v1027_v56  ;;  %v1091_v56 = vld [vmem:[%s2544_s24 + $0x1dc0] sm:$0xff] }
 0x3a3   : > { %2052 = vst [vmem:[%s2553_s25 + $0x1bc8] sm:$0xff] %v1028_v57  ;;  %v1092_v57 = vld [vmem:[%s2544_s24 + $0x1dc8] sm:$0xff] }
 0x3a4   : > { %2053 = vst [vmem:[%s2553_s25 + $0x1bd0] sm:$0xff] %v1029_v58  ;;  %v1093_v58 = vld [vmem:[%s2544_s24 + $0x1dd0] sm:$0xff] }
 0x3a5   : > { %2054 = vst [vmem:[%s2553_s25 + $0x1bd8] sm:$0xff] %v1030_v59  ;;  %v1094_v59 = vld [vmem:[%s2544_s24 + $0x1dd8] sm:$0xff] }
 0x3a6   : > { %2055 = vst [vmem:[%s2553_s25 + $0x1be0] sm:$0xff] %v1031_v60  ;;  %v1095_v60 = vld [vmem:[%s2544_s24 + $0x1de0] sm:$0xff] }
 0x3a7   : > { %2056 = vst [vmem:[%s2553_s25 + $0x1be8] sm:$0xff] %v1032_v61  ;;  %v1096_v61 = vld [vmem:[%s2544_s24 + $0x1de8] sm:$0xff] }
 0x3a8   : > { %2057 = vst [vmem:[%s2553_s25 + $0x1bf0] sm:$0xff] %v1033_v62  ;;  %v1097_v62 = vld [vmem:[%s2544_s24 + $0x1df0] sm:$0xff] }
 0x3a9   : > { %2058 = vst [vmem:[%s2553_s25 + $0x1bf8] sm:$0xff] %v1034_v63  ;;  %v1098_v63 = vld [vmem:[%s2544_s24 + $0x1df8] sm:$0xff] }
 0x3aa   : > { %2059 = vst [vmem:[%s2553_s25 + $0x1c00] sm:$0xff] %v1035_v0  ;;  %v1099_v0 = vld [vmem:[%s2544_s24 + $0x1e00] sm:$0xff] }
 0x3ab   : > { %2060 = vst [vmem:[%s2553_s25 + $0x1c08] sm:$0xff] %v1036_v1  ;;  %v1100_v1 = vld [vmem:[%s2544_s24 + $0x1e08] sm:$0xff] }
 0x3ac   : > { %2061 = vst [vmem:[%s2553_s25 + $0x1c10] sm:$0xff] %v1037_v2  ;;  %v1101_v2 = vld [vmem:[%s2544_s24 + $0x1e10] sm:$0xff] }
 0x3ad   : > { %2062 = vst [vmem:[%s2553_s25 + $0x1c18] sm:$0xff] %v1038_v3  ;;  %v1102_v3 = vld [vmem:[%s2544_s24 + $0x1e18] sm:$0xff] }
 0x3ae   : > { %2063 = vst [vmem:[%s2553_s25 + $0x1c20] sm:$0xff] %v1039_v4  ;;  %v1103_v4 = vld [vmem:[%s2544_s24 + $0x1e20] sm:$0xff] }
 0x3af   : > { %2064 = vst [vmem:[%s2553_s25 + $0x1c28] sm:$0xff] %v1040_v5  ;;  %v1104_v5 = vld [vmem:[%s2544_s24 + $0x1e28] sm:$0xff] }
 0x3b0   : > { %2065 = vst [vmem:[%s2553_s25 + $0x1c30] sm:$0xff] %v1041_v6  ;;  %v1105_v6 = vld [vmem:[%s2544_s24 + $0x1e30] sm:$0xff] }
 0x3b1   : > { %2066 = vst [vmem:[%s2553_s25 + $0x1c38] sm:$0xff] %v1042_v7  ;;  %v1106_v7 = vld [vmem:[%s2544_s24 + $0x1e38] sm:$0xff] }
 0x3b2   : > { %2067 = vst [vmem:[%s2553_s25 + $0x1c40] sm:$0xff] %v1043_v8  ;;  %v1107_v8 = vld [vmem:[%s2544_s24 + $0x1e40] sm:$0xff] }
 0x3b3   : > { %2068 = vst [vmem:[%s2553_s25 + $0x1c48] sm:$0xff] %v1044_v9  ;;  %v1108_v9 = vld [vmem:[%s2544_s24 + $0x1e48] sm:$0xff] }
 0x3b4   : > { %2069 = vst [vmem:[%s2553_s25 + $0x1c50] sm:$0xff] %v1045_v10  ;;  %v1109_v10 = vld [vmem:[%s2544_s24 + $0x1e50] sm:$0xff] }
 0x3b5   : > { %2070 = vst [vmem:[%s2553_s25 + $0x1c58] sm:$0xff] %v1046_v11  ;;  %v1110_v11 = vld [vmem:[%s2544_s24 + $0x1e58] sm:$0xff] }
 0x3b6   : > { %2071 = vst [vmem:[%s2553_s25 + $0x1c60] sm:$0xff] %v1047_v12  ;;  %v1111_v12 = vld [vmem:[%s2544_s24 + $0x1e60] sm:$0xff] }
 0x3b7   : > { %2072 = vst [vmem:[%s2553_s25 + $0x1c68] sm:$0xff] %v1048_v13  ;;  %v1112_v13 = vld [vmem:[%s2544_s24 + $0x1e68] sm:$0xff] }
 0x3b8   : > { %2073 = vst [vmem:[%s2553_s25 + $0x1c70] sm:$0xff] %v1049_v14  ;;  %v1113_v14 = vld [vmem:[%s2544_s24 + $0x1e70] sm:$0xff] }
 0x3b9   : > { %2074 = vst [vmem:[%s2553_s25 + $0x1c78] sm:$0xff] %v1050_v15  ;;  %v1114_v15 = vld [vmem:[%s2544_s24 + $0x1e78] sm:$0xff] }
 0x3ba   : > { %2075 = vst [vmem:[%s2553_s25 + $0x1c80] sm:$0xff] %v1051_v16  ;;  %v1115_v16 = vld [vmem:[%s2544_s24 + $0x1e80] sm:$0xff] }
 0x3bb   : > { %2076 = vst [vmem:[%s2553_s25 + $0x1c88] sm:$0xff] %v1052_v17  ;;  %v1116_v17 = vld [vmem:[%s2544_s24 + $0x1e88] sm:$0xff] }
 0x3bc   : > { %2077 = vst [vmem:[%s2553_s25 + $0x1c90] sm:$0xff] %v1053_v18  ;;  %v1117_v18 = vld [vmem:[%s2544_s24 + $0x1e90] sm:$0xff] }
 0x3bd   : > { %2078 = vst [vmem:[%s2553_s25 + $0x1c98] sm:$0xff] %v1054_v19  ;;  %v1118_v19 = vld [vmem:[%s2544_s24 + $0x1e98] sm:$0xff] }
 0x3be   : > { %2079 = vst [vmem:[%s2553_s25 + $0x1ca0] sm:$0xff] %v1055_v20  ;;  %v1119_v20 = vld [vmem:[%s2544_s24 + $0x1ea0] sm:$0xff] }
 0x3bf   : > { %2080 = vst [vmem:[%s2553_s25 + $0x1ca8] sm:$0xff] %v1056_v21  ;;  %v1120_v21 = vld [vmem:[%s2544_s24 + $0x1ea8] sm:$0xff] }
 0x3c0   : > { %2081 = vst [vmem:[%s2553_s25 + $0x1cb0] sm:$0xff] %v1057_v22  ;;  %v1121_v22 = vld [vmem:[%s2544_s24 + $0x1eb0] sm:$0xff] }
 0x3c1   : > { %2082 = vst [vmem:[%s2553_s25 + $0x1cb8] sm:$0xff] %v1058_v23  ;;  %v1122_v23 = vld [vmem:[%s2544_s24 + $0x1eb8] sm:$0xff] }
 0x3c2   : > { %2083 = vst [vmem:[%s2553_s25 + $0x1cc0] sm:$0xff] %v1059_v24  ;;  %v1123_v24 = vld [vmem:[%s2544_s24 + $0x1ec0] sm:$0xff] }
 0x3c3   : > { %2084 = vst [vmem:[%s2553_s25 + $0x1cc8] sm:$0xff] %v1060_v25  ;;  %v1124_v25 = vld [vmem:[%s2544_s24 + $0x1ec8] sm:$0xff] }
 0x3c4   : > { %2085 = vst [vmem:[%s2553_s25 + $0x1cd0] sm:$0xff] %v1061_v26  ;;  %v1125_v26 = vld [vmem:[%s2544_s24 + $0x1ed0] sm:$0xff] }
 0x3c5   : > { %2086 = vst [vmem:[%s2553_s25 + $0x1cd8] sm:$0xff] %v1062_v27  ;;  %v1126_v27 = vld [vmem:[%s2544_s24 + $0x1ed8] sm:$0xff] }
 0x3c6   : > { %2087 = vst [vmem:[%s2553_s25 + $0x1ce0] sm:$0xff] %v1063_v28  ;;  %v1127_v28 = vld [vmem:[%s2544_s24 + $0x1ee0] sm:$0xff] }
 0x3c7   : > { %2088 = vst [vmem:[%s2553_s25 + $0x1ce8] sm:$0xff] %v1064_v29  ;;  %v1128_v29 = vld [vmem:[%s2544_s24 + $0x1ee8] sm:$0xff] }
 0x3c8   : > { %2089 = vst [vmem:[%s2553_s25 + $0x1cf0] sm:$0xff] %v1065_v30  ;;  %v1129_v30 = vld [vmem:[%s2544_s24 + $0x1ef0] sm:$0xff] }
 0x3c9   : > { %2090 = vst [vmem:[%s2553_s25 + $0x1cf8] sm:$0xff] %v1066_v31  ;;  %v1130_v31 = vld [vmem:[%s2544_s24 + $0x1ef8] sm:$0xff] }
 0x3ca   : > { %2091 = vst [vmem:[%s2553_s25 + $0x1d00] sm:$0xff] %v1067_v32  ;;  %v1131_v32 = vld [vmem:[%s2544_s24 + $0x1f00] sm:$0xff] }
 0x3cb   : > { %2092 = vst [vmem:[%s2553_s25 + $0x1d08] sm:$0xff] %v1068_v33  ;;  %v1132_v33 = vld [vmem:[%s2544_s24 + $0x1f08] sm:$0xff] }
 0x3cc   : > { %2093 = vst [vmem:[%s2553_s25 + $0x1d10] sm:$0xff] %v1069_v34  ;;  %v1133_v34 = vld [vmem:[%s2544_s24 + $0x1f10] sm:$0xff] }
 0x3cd   : > { %2094 = vst [vmem:[%s2553_s25 + $0x1d18] sm:$0xff] %v1070_v35  ;;  %v1134_v35 = vld [vmem:[%s2544_s24 + $0x1f18] sm:$0xff] }
 0x3ce   : > { %2095 = vst [vmem:[%s2553_s25 + $0x1d20] sm:$0xff] %v1071_v36  ;;  %v1135_v36 = vld [vmem:[%s2544_s24 + $0x1f20] sm:$0xff] }
 0x3cf   : > { %2096 = vst [vmem:[%s2553_s25 + $0x1d28] sm:$0xff] %v1072_v37  ;;  %v1136_v37 = vld [vmem:[%s2544_s24 + $0x1f28] sm:$0xff] }
 0x3d0   : > { %2097 = vst [vmem:[%s2553_s25 + $0x1d30] sm:$0xff] %v1073_v38  ;;  %v1137_v38 = vld [vmem:[%s2544_s24 + $0x1f30] sm:$0xff] }
 0x3d1   : > { %2098 = vst [vmem:[%s2553_s25 + $0x1d38] sm:$0xff] %v1074_v39  ;;  %v1138_v39 = vld [vmem:[%s2544_s24 + $0x1f38] sm:$0xff] }
 0x3d2   : > { %2099 = vst [vmem:[%s2553_s25 + $0x1d40] sm:$0xff] %v1075_v40  ;;  %v1139_v40 = vld [vmem:[%s2544_s24 + $0x1f40] sm:$0xff] }
 0x3d3   : > { %2100 = vst [vmem:[%s2553_s25 + $0x1d48] sm:$0xff] %v1076_v41  ;;  %v1140_v41 = vld [vmem:[%s2544_s24 + $0x1f48] sm:$0xff] }
 0x3d4   : > { %2101 = vst [vmem:[%s2553_s25 + $0x1d50] sm:$0xff] %v1077_v42  ;;  %v1141_v42 = vld [vmem:[%s2544_s24 + $0x1f50] sm:$0xff] }
 0x3d5   : > { %2102 = vst [vmem:[%s2553_s25 + $0x1d58] sm:$0xff] %v1078_v43  ;;  %v1142_v43 = vld [vmem:[%s2544_s24 + $0x1f58] sm:$0xff] }
 0x3d6   : > { %2103 = vst [vmem:[%s2553_s25 + $0x1d60] sm:$0xff] %v1079_v44  ;;  %v1143_v44 = vld [vmem:[%s2544_s24 + $0x1f60] sm:$0xff] }
 0x3d7   : > { %2104 = vst [vmem:[%s2553_s25 + $0x1d68] sm:$0xff] %v1080_v45  ;;  %v1144_v45 = vld [vmem:[%s2544_s24 + $0x1f68] sm:$0xff] }
 0x3d8   : > { %2105 = vst [vmem:[%s2553_s25 + $0x1d70] sm:$0xff] %v1081_v46  ;;  %v1145_v46 = vld [vmem:[%s2544_s24 + $0x1f70] sm:$0xff] }
 0x3d9   : > { %2106 = vst [vmem:[%s2553_s25 + $0x1d78] sm:$0xff] %v1082_v47  ;;  %v1146_v47 = vld [vmem:[%s2544_s24 + $0x1f78] sm:$0xff] }
 0x3da   : > { %2107 = vst [vmem:[%s2553_s25 + $0x1d80] sm:$0xff] %v1083_v48  ;;  %v1147_v48 = vld [vmem:[%s2544_s24 + $0x1f80] sm:$0xff] }
 0x3db   : > { %2108 = vst [vmem:[%s2553_s25 + $0x1d88] sm:$0xff] %v1084_v49  ;;  %v1148_v49 = vld [vmem:[%s2544_s24 + $0x1f88] sm:$0xff] }
 0x3dc   : > { %2109 = vst [vmem:[%s2553_s25 + $0x1d90] sm:$0xff] %v1085_v50  ;;  %v1149_v50 = vld [vmem:[%s2544_s24 + $0x1f90] sm:$0xff] }
 0x3dd   : > { %2110 = vst [vmem:[%s2553_s25 + $0x1d98] sm:$0xff] %v1086_v51  ;;  %v1150_v51 = vld [vmem:[%s2544_s24 + $0x1f98] sm:$0xff] }
 0x3de   : > { %2111 = vst [vmem:[%s2553_s25 + $0x1da0] sm:$0xff] %v1087_v52  ;;  %v1151_v52 = vld [vmem:[%s2544_s24 + $0x1fa0] sm:$0xff] }
 0x3df   : > { %2112 = vst [vmem:[%s2553_s25 + $0x1da8] sm:$0xff] %v1088_v53  ;;  %v1152_v53 = vld [vmem:[%s2544_s24 + $0x1fa8] sm:$0xff] }
 0x3e0   : > { %2113 = vst [vmem:[%s2553_s25 + $0x1db0] sm:$0xff] %v1089_v54  ;;  %v1153_v54 = vld [vmem:[%s2544_s24 + $0x1fb0] sm:$0xff] }
 0x3e1   : > { %2114 = vst [vmem:[%s2553_s25 + $0x1db8] sm:$0xff] %v1090_v55  ;;  %v1154_v55 = vld [vmem:[%s2544_s24 + $0x1fb8] sm:$0xff] }
 0x3e2   : > { %2115 = vst [vmem:[%s2553_s25 + $0x1dc0] sm:$0xff] %v1091_v56  ;;  %v1155_v56 = vld [vmem:[%s2544_s24 + $0x1fc0] sm:$0xff] }
 0x3e3   : > { %2116 = vst [vmem:[%s2553_s25 + $0x1dc8] sm:$0xff] %v1092_v57  ;;  %v1156_v57 = vld [vmem:[%s2544_s24 + $0x1fc8] sm:$0xff] }
 0x3e4   : > { %2117 = vst [vmem:[%s2553_s25 + $0x1dd0] sm:$0xff] %v1093_v58  ;;  %v1157_v58 = vld [vmem:[%s2544_s24 + $0x1fd0] sm:$0xff] }
 0x3e5   : > { %2118 = vst [vmem:[%s2553_s25 + $0x1dd8] sm:$0xff] %v1094_v59  ;;  %v1158_v59 = vld [vmem:[%s2544_s24 + $0x1fd8] sm:$0xff] }
 0x3e6   : > { %2119 = vst [vmem:[%s2553_s25 + $0x1de0] sm:$0xff] %v1095_v60  ;;  %v1159_v60 = vld [vmem:[%s2544_s24 + $0x1fe0] sm:$0xff] }
 0x3e7   : > { %2120 = vst [vmem:[%s2553_s25 + $0x1de8] sm:$0xff] %v1096_v61  ;;  %v1160_v61 = vld [vmem:[%s2544_s24 + $0x1fe8] sm:$0xff] }
 0x3e8   : > { %2121 = vst [vmem:[%s2553_s25 + $0x1df0] sm:$0xff] %v1097_v62  ;;  %v1161_v62 = vld [vmem:[%s2544_s24 + $0x1ff0] sm:$0xff] }
 0x3e9   : > { %2122 = vst [vmem:[%s2553_s25 + $0x1df8] sm:$0xff] %v1098_v63  ;;  %v1162_v63 = vld [vmem:[%s2544_s24 + $0x1ff8] sm:$0xff] }
 0x3ea   : > { %2123 = vst [vmem:[%s2553_s25 + $0x1e00] sm:$0xff] %v1099_v0 }
 0x3eb   : > { %2124 = vst [vmem:[%s2553_s25 + $0x1e08] sm:$0xff] %v1100_v1 }
 0x3ec   : > { %2125 = vst [vmem:[%s2553_s25 + $0x1e10] sm:$0xff] %v1101_v2 }
 0x3ed   : > { %2126 = vst [vmem:[%s2553_s25 + $0x1e18] sm:$0xff] %v1102_v3 }
 0x3ee   : > { %2127 = vst [vmem:[%s2553_s25 + $0x1e20] sm:$0xff] %v1103_v4 }
 0x3ef   : > { %2128 = vst [vmem:[%s2553_s25 + $0x1e28] sm:$0xff] %v1104_v5 }
 0x3f0   : > { %2129 = vst [vmem:[%s2553_s25 + $0x1e30] sm:$0xff] %v1105_v6 }
 0x3f1   : > { %2130 = vst [vmem:[%s2553_s25 + $0x1e38] sm:$0xff] %v1106_v7 }
 0x3f2   : > { %2131 = vst [vmem:[%s2553_s25 + $0x1e40] sm:$0xff] %v1107_v8 }
 0x3f3   : > { %2132 = vst [vmem:[%s2553_s25 + $0x1e48] sm:$0xff] %v1108_v9 }
 0x3f4   : > { %2133 = vst [vmem:[%s2553_s25 + $0x1e50] sm:$0xff] %v1109_v10 }
 0x3f5   : > { %2134 = vst [vmem:[%s2553_s25 + $0x1e58] sm:$0xff] %v1110_v11 }
 0x3f6   : > { %2135 = vst [vmem:[%s2553_s25 + $0x1e60] sm:$0xff] %v1111_v12 }
 0x3f7   : > { %2136 = vst [vmem:[%s2553_s25 + $0x1e68] sm:$0xff] %v1112_v13 }
 0x3f8   : > { %2137 = vst [vmem:[%s2553_s25 + $0x1e70] sm:$0xff] %v1113_v14 }
 0x3f9   : > { %2138 = vst [vmem:[%s2553_s25 + $0x1e78] sm:$0xff] %v1114_v15 }
 0x3fa   : > { %2139 = vst [vmem:[%s2553_s25 + $0x1e80] sm:$0xff] %v1115_v16 }
 0x3fb   : > { %2140 = vst [vmem:[%s2553_s25 + $0x1e88] sm:$0xff] %v1116_v17 }
 0x3fc   : > { %2141 = vst [vmem:[%s2553_s25 + $0x1e90] sm:$0xff] %v1117_v18 }
 0x3fd   : > { %2142 = vst [vmem:[%s2553_s25 + $0x1e98] sm:$0xff] %v1118_v19 }
 0x3fe   : > { %2143 = vst [vmem:[%s2553_s25 + $0x1ea0] sm:$0xff] %v1119_v20 }
 0x3ff   : > { %2144 = vst [vmem:[%s2553_s25 + $0x1ea8] sm:$0xff] %v1120_v21 }
 0x400   : > { %2145 = vst [vmem:[%s2553_s25 + $0x1eb0] sm:$0xff] %v1121_v22 }
 0x401   : > { %2146 = vst [vmem:[%s2553_s25 + $0x1eb8] sm:$0xff] %v1122_v23 }
 0x402   : > { %2147 = vst [vmem:[%s2553_s25 + $0x1ec0] sm:$0xff] %v1123_v24 }
 0x403   : > { %2148 = vst [vmem:[%s2553_s25 + $0x1ec8] sm:$0xff] %v1124_v25 }
 0x404   : > { %2149 = vst [vmem:[%s2553_s25 + $0x1ed0] sm:$0xff] %v1125_v26 }
 0x405   : > { %2150 = vst [vmem:[%s2553_s25 + $0x1ed8] sm:$0xff] %v1126_v27 }
 0x406   : > { %2151 = vst [vmem:[%s2553_s25 + $0x1ee0] sm:$0xff] %v1127_v28 }
 0x407   : > { %2152 = vst [vmem:[%s2553_s25 + $0x1ee8] sm:$0xff] %v1128_v29 }
 0x408   : > { %2153 = vst [vmem:[%s2553_s25 + $0x1ef0] sm:$0xff] %v1129_v30 }
 0x409   : > { %2154 = vst [vmem:[%s2553_s25 + $0x1ef8] sm:$0xff] %v1130_v31 }
 0x40a   : > { %2155 = vst [vmem:[%s2553_s25 + $0x1f00] sm:$0xff] %v1131_v32 }
 0x40b   : > { %2156 = vst [vmem:[%s2553_s25 + $0x1f08] sm:$0xff] %v1132_v33 }
 0x40c   : > { %2157 = vst [vmem:[%s2553_s25 + $0x1f10] sm:$0xff] %v1133_v34 }
 0x40d   : > { %2158 = vst [vmem:[%s2553_s25 + $0x1f18] sm:$0xff] %v1134_v35 }
 0x40e   : > { %2159 = vst [vmem:[%s2553_s25 + $0x1f20] sm:$0xff] %v1135_v36 }
 0x40f   : > { %2160 = vst [vmem:[%s2553_s25 + $0x1f28] sm:$0xff] %v1136_v37 }
 0x410   : > { %2161 = vst [vmem:[%s2553_s25 + $0x1f30] sm:$0xff] %v1137_v38 }
 0x411   : > { %2162 = vst [vmem:[%s2553_s25 + $0x1f38] sm:$0xff] %v1138_v39 }
 0x412   : > { %2163 = vst [vmem:[%s2553_s25 + $0x1f40] sm:$0xff] %v1139_v40 }
 0x413   : > { %2164 = vst [vmem:[%s2553_s25 + $0x1f48] sm:$0xff] %v1140_v41 }
 0x414   : > { %2165 = vst [vmem:[%s2553_s25 + $0x1f50] sm:$0xff] %v1141_v42 }
 0x415   : > { %2166 = vst [vmem:[%s2553_s25 + $0x1f58] sm:$0xff] %v1142_v43 }
 0x416   : > { %2167 = vst [vmem:[%s2553_s25 + $0x1f60] sm:$0xff] %v1143_v44 }
 0x417   : > { %2168 = vst [vmem:[%s2553_s25 + $0x1f68] sm:$0xff] %v1144_v45 }
 0x418   : > { %2169 = vst [vmem:[%s2553_s25 + $0x1f70] sm:$0xff] %v1145_v46 }
 0x419   : > { %2170 = vst [vmem:[%s2553_s25 + $0x1f78] sm:$0xff] %v1146_v47 }
 0x41a   : > { %2171 = vst [vmem:[%s2553_s25 + $0x1f80] sm:$0xff] %v1147_v48 }
 0x41b   : > { %2172 = vst [vmem:[%s2553_s25 + $0x1f88] sm:$0xff] %v1148_v49 }
 0x41c   : > { %2173 = vst [vmem:[%s2553_s25 + $0x1f90] sm:$0xff] %v1149_v50 }
 0x41d   : > { %2174 = vst [vmem:[%s2553_s25 + $0x1f98] sm:$0xff] %v1150_v51 }
 0x41e   : > { %2175 = vst [vmem:[%s2553_s25 + $0x1fa0] sm:$0xff] %v1151_v52 }
 0x41f   : > { %2176 = vst [vmem:[%s2553_s25 + $0x1fa8] sm:$0xff] %v1152_v53 }
 0x420   : > { %2177 = vst [vmem:[%s2553_s25 + $0x1fb0] sm:$0xff] %v1153_v54 }
 0x421   : > { %2178 = vst [vmem:[%s2553_s25 + $0x1fb8] sm:$0xff] %v1154_v55 }
 0x422   : > { %2179 = vst [vmem:[%s2553_s25 + $0x1fc0] sm:$0xff] %v1155_v56 }
 0x423   : > { %2180 = vst [vmem:[%s2553_s25 + $0x1fc8] sm:$0xff] %v1156_v57 }
 0x424   : > { %2181 = vst [vmem:[%s2553_s25 + $0x1fd0] sm:$0xff] %v1157_v58 }
 0x425   : > { %2182 = vst [vmem:[%s2553_s25 + $0x1fd8] sm:$0xff] %v1158_v59 }
 0x426   : > { %2183 = vst [vmem:[%s2553_s25 + $0x1fe0] sm:$0xff] %v1159_v60 }
 0x427   : > { %2184 = vst [vmem:[%s2553_s25 + $0x1fe8] sm:$0xff] %v1160_v61 }
 0x428   : > { %2185 = vst [vmem:[%s2553_s25 + $0x1ff0] sm:$0xff] %v1161_v62 }
 0x429   : > { %2186 = vst [vmem:[%s2553_s25 + $0x1ff8] sm:$0xff] %v1162_v63 }
 0x42a   : > { %2399 = shalt.err (!%p2396_p4)
}
 0x42b   : > { %s2442_s16 = smov 128   ;;  %s2443_s20 = smov 8  }
 0x42c   : > { %2294 = dma.vmem_to_hbm [thread:$0]  (%p2504_p11), %s2201_s10, 131072, %s2203_s29, %s2188_s30, %s2442_s16, %s2442_s16, %s2443_s20  }
 0x42d PF: > { %s2217_s21 = sand.u32 1, %s2426_s6   ;;  %p4641_p7 = scmp.ge.s32.totalorder %s2438_s9, 2 }
 0x42e   : > { %s2218_s22 = scalar_lea.sflag [#allocation4], %s2217_s21 }
 0x42f   : > { %p2301_p5 = pnand %p4641_p7, %p2508_p12 }
 0x431   : > { %p2302_p8 = pneg %p2301_p5 }
 0x433   : > { %2421 = dma.done.wait (%p2302_p8), %s2218_s22, 131072  }
 0x434   : > { %2423 = vsyncadd (%p2302_p8), %s2218_s22, 4294836224  ;;  %p14_p10 = scmp.ge.s32.totalorder %s2479_s12, 4   ;;  %s4642_s6 = smov %s2430_s7 }
 0x435   : > { %s4643_s7 = smov %s2434_s8  ;;  %s4644_s8 = smov %s2491_s15 }
 0x436   : > { %s4645_s9 = smov %s2479_s12  ;;  %16 = sbr.rel (!%p14_p10) target bundleno = 5 (0x5), region = 69 }
 0x43b   :  { %2224 = vsyncpa [#allocation3], 1 }
 0x43c   :  { %2226 = vsyncpa [#allocation3 + $0x1], 1 }
 0x43d   :  { %2227 = vsyncpa [#allocation4], 1 }
 0x43e   :  { %2229 = vsyncpa [#allocation4 + $0x1], 1 }

</bundles_post_ra>
